<compile_context>
chip_gen: v6e
topology: v6e:2x2x1
jax: 0.10.0
libtpu: 0.0.40
codegen_flags: <defaults>
</compile_context>

<pallas_src>
import numpy as np
import jax
import jax.numpy as jnp
from jax.experimental import pallas as pl
from jax.experimental.pallas import tpu as pltpu


# ----------------------------- fused kernel ----------------------------------


def _up1_fused_kernel(x1_ref, x2_ref, a_ref, w1_ref, b1_ref,
                      wc0_ref, sh0_ref, wc1_ref, sh1_ref, o_ref, pad_ref):
    """Fused upsample + 1x1 conv + skip add + (3x3 conv -> BN -> ReLU) * 2.

    x1_ref : (1, H1*W1, Cin)     NHWC-flattened low-res input
    x2_ref : (1, H2*W2, Cout)    NHWC-flattened skip connection
    a_ref  : (H2*W2, H1*W1)      bilinear resize matrix (Rh kron Rw), align_corners=True
    w1_ref : (Cin, Cout)         1x1 conv weight (VMEM)
    b1_ref : (1, Cout)           1x1 conv bias
    wc*_ref: (3, 3, Cout, Cout)  3x3 conv weights (HWIO) with BN scale pre-folded
    sh*_ref: (1, Cout)           folded conv-bias + BN shift
    o_ref  : (1, H2*W2, Cout)
    pad_ref: (H2+2, W2+2, Cout)  VMEM scratch holding the zero-padded activation
    """
    _, _, cout = o_ref.shape
    hp, wp, _ = pad_ref.shape
    h2, w2 = hp - 2, wp - 2

    # ---- stage 1: 1x1 conv (MXU) then bilinear resize (MXU), + skip + bias ----
    # 1x1 conv commutes with the (linear) resize, so do it at low resolution first.
    z = jnp.dot(x1_ref[0], w1_ref[...], preferred_element_type=jnp.float32)   # (H1W1, Cout)
    up = jnp.dot(a_ref[...], z, preferred_element_type=jnp.float32)           # (H2W2, Cout)
    # resize rows sum to 1 -> adding the 1x1 bias after the resize is equivalent.
    y = up + x2_ref[0] + b1_ref[...]                                          # (H2W2, Cout)

    # ---- stage 2: double conv; 'same' padding lives in VMEM (no HBM jnp.pad) ----
    pad_ref[...] = jnp.zeros((hp, wp, cout), jnp.float32)   # border stays zero

    def conv3x3_bn_relu(v, wc_ref, sh_ref):
        pad_ref[1:h2 + 1, 1:w2 + 1, :] = v.reshape(h2, w2, cout)
        acc = jnp.zeros((h2 * w2, cout), jnp.float32)
        for dh in range(3):
            for dw in range(3):
                win = pad_ref[dh:dh + h2, dw:dw + w2, :]          # (H2, W2, Cout) window
                acc = acc + jnp.dot(win.reshape(h2 * w2, cout), wc_ref[dh, dw],
                                    preferred_element_type=jnp.float32)
        # BN scale already folded into the weights; shift = b*scale + (beta - mean*scale).
        return jnp.maximum(acc + sh_ref[...], 0.0)

    t = conv3x3_bn_relu(y, wc0_ref, sh0_ref)
    o_ref[0] = conv3x3_bn_relu(t, wc1_ref, sh1_ref).astype(o_ref.dtype)


# ----------------------------- pallas_call wrapper ---------------------------


def up1_forward(params, x1_nchw, x2_nchw):
    """Pallas-backed forward; inputs/outputs are NCHW like the PyTorch module."""
    n, cin, h1, w1 = x1_nchw.shape
    _, cout, h2, w2 = x2_nchw.shape

    # Interface glue (XLA): NCHW -> NHWC-flattened.  The kernel itself is all NHWC.
    x1f = jnp.transpose(x1_nchw, (0, 2, 3, 1)).reshape(n, h1 * w1, cin)
    x2f = jnp.transpose(x2_nchw, (0, 2, 3, 1)).reshape(n, h2 * w2, cout)

    # Fold conv bias + BN (inference running stats) into weights / a single shift.
    wc0 = params["wc0"] * params["scale0"]
    sh0 = (params["bc0"] * params["scale0"] + params["shift0"])[None, :]
    wc1 = params["wc1"] * params["scale1"]
    sh1 = (params["bc1"] * params["scale1"] + params["shift1"])[None, :]
    b1 = params["b1x1"][None, :]

    out = pl.pallas_call(
        _up1_fused_kernel,
        out_shape=jax.ShapeDtypeStruct((n, h2 * w2, cout), jnp.float32),
        grid=(n,),
        in_specs=[
            pl.BlockSpec((1, h1 * w1, cin), lambda i: (i, 0, 0)),
            pl.BlockSpec((1, h2 * w2, cout), lambda i: (i, 0, 0)),
            pl.BlockSpec((h2 * w2, h1 * w1), lambda i: (0, 0)),
            pl.BlockSpec((cin, cout), lambda i: (0, 0)),
            pl.BlockSpec((1, cout), lambda i: (0, 0)),
            pl.BlockSpec((3, 3, cout, cout), lambda i: (0, 0, 0, 0)),
            pl.BlockSpec((1, cout), lambda i: (0, 0)),
            pl.BlockSpec((3, 3, cout, cout), lambda i: (0, 0, 0, 0)),
            pl.BlockSpec((1, cout), lambda i: (0, 0)),
        ],
        out_specs=pl.BlockSpec((1, h2 * w2, cout), lambda i: (i, 0, 0)),
        scratch_shapes=[pltpu.VMEM((h2 + 2, w2 + 2, cout), jnp.float32)],
        compiler_params=pltpu.CompilerParams(
            dimension_semantics=("parallel",),          # batch across TensorCores
            vmem_limit_bytes=48 * 1024 * 1024),
    )(x1f, x2f, params["A"], params["w1x1"], b1, wc0, sh0, wc1, sh1)

    # Back to NCHW for the PyTorch-like public interface.
    return jnp.transpose(out.reshape(n, h2, w2, cout), (0, 3, 1, 2))


# ----------------------------- params ----------------------------------------


def bilinear_matrix(out_size, in_size):
    """Interpolation matrix M so y = M @ x matches PyTorch bilinear (align_corners=True)."""
    m = np.zeros((out_size, in_size), np.float32)
    if out_size == 1:
        m[0, 0] = 1.0
        return m
    src = np.arange(out_size, dtype=np.float64) * (in_size - 1) / (out_size - 1)
    i0 = np.clip(np.floor(src).astype(np.int64), 0, in_size - 1)
    i1 = np.clip(i0 + 1, 0, in_size - 1)
    frac = (src - i0).astype(np.float32)
    for o in range(out_size):
        m[o, i0[o]] += 1.0 - frac[o]
        m[o, i1[o]] += frac[o]
    return m


def init_params(key, in_ch, out_ch, h1, w1, h2, w2):
    ks = jax.random.split(key, 8)
    eps = 1e-5
    rh = bilinear_matrix(h2, h1)
    rw = bilinear_matrix(w2, w1)
    p = {
        "Rh": jnp.asarray(rh),
        "Rw": jnp.asarray(rw),
        # Combined resize matrix: A[(h2,w2),(h1,w1)] = Rh[h2,h1]*Rw[w2,w1].
        "A": jnp.asarray(np.kron(rh, rw)),
        "w1x1": 0.1 * jax.random.normal(ks[0], (in_ch, out_ch), jnp.float32),
        "b1x1": 0.1 * jax.random.normal(ks[1], (out_ch,), jnp.float32),
    }
    for i, (kw, kb) in enumerate([(ks[2], ks[3]), (ks[4], ks[5])]):
        p[f"wc{i}"] = 0.1 * jax.random.normal(kw, (3, 3, out_ch, out_ch), jnp.float32)
        p[f"bc{i}"] = 0.1 * jax.random.normal(kb, (out_ch,), jnp.float32)
        gamma = 1.0 + 0.1 * jax.random.normal(jax.random.fold_in(ks[6], i), (out_ch,), jnp.float32)
        beta = 0.1 * jax.random.normal(jax.random.fold_in(ks[7], i), (out_ch,), jnp.float32)
        mean = 0.1 * jax.random.normal(jax.random.fold_in(ks[6], 10 + i), (out_ch,), jnp.float32)
        var = 1.0 + 0.1 * jax.random.uniform(jax.random.fold_in(ks[7], 10 + i), (out_ch,), jnp.float32)
        scale = gamma / jnp.sqrt(var + eps)
        p[f"scale{i}"] = scale
        p[f"shift{i}"] = beta - mean * scale
    return p


# ----------------------------- pure-JAX reference -----------------------------


def up1_reference(params, x1_nchw, x2_nchw):
    """Pure-JAX reference (PyTorch op order) for correctness checking."""
    up = jnp.einsum("ah,nchw->ncaw", params["Rh"], x1_nchw)
    up = jnp.einsum("bw,ncaw->ncab", params["Rw"], up)          # (N, Cin, H2, W2)
    up = jnp.transpose(up, (0, 2, 3, 1))                        # NHWC
    y = jnp.einsum("nhwc,cd->nhwd", up, params["w1x1"]) + params["b1x1"]
    y = y + jnp.transpose(x2_nchw, (0, 2, 3, 1))
    for i in (0, 1):
        y = jax.lax.conv_general_dilated(
            y, params[f"wc{i}"], window_strides=(1, 1), padding="SAME",
            dimension_numbers=("NHWC", "HWIO", "NHWC"))
        y = y + params[f"bc{i}"]
        y = y * params[f"scale{i}"] + params[f"shift{i}"]
        y = jnp.maximum(y, 0.0)
    return jnp.transpose(y, (0, 3, 1, 2))


# ----------------------------- main -------------------------------------------


if __name__ == "__main__":
    root = jax.random.PRNGKey(0)
    kp, kx1, kx2 = jax.random.split(root, 3)

    N, in_ch, out_ch = 2, 8, 4
    H1 = W1 = 8
    H2 = W2 = 16

    params = init_params(kp, in_ch, out_ch, H1, W1, H2, W2)
    x1 = jax.random.normal(kx1, (N, in_ch, H1, W1), jnp.float32)   # up1 input #1 (NCHW)
    x2 = jax.random.normal(kx2, (N, out_ch, H2, W2), jnp.float32)  # up1 input #2 (NCHW)

    out = jax.block_until_ready(up1_forward(params, x1, x2))
    ref = jax.block_until_ready(up1_reference(params, x1, x2))

    np.testing.assert_allclose(np.asarray(out), np.asarray(ref), rtol=1e-4, atol=1e-4)
    assert out.shape == (N, out_ch, H2, W2)
    print("KERNEL_OK")
</pallas_src>

<mosaic_0001>
module attributes {stable_mosaic.version = 11 : i64} {
  func.func @_up1_fused_kernel(%arg0: i32, %arg1: memref<1x64x8xf32, #tpu.memory_space<vmem>>, %arg2: memref<1x256x4xf32, #tpu.memory_space<vmem>>, %arg3: memref<256x64xf32, #tpu.memory_space<vmem>>, %arg4: memref<8x4xf32, #tpu.memory_space<vmem>>, %arg5: memref<1x4xf32, #tpu.memory_space<vmem>>, %arg6: memref<3x3x4x4xf32, #tpu.memory_space<vmem>>, %arg7: memref<1x4xf32, #tpu.memory_space<vmem>>, %arg8: memref<3x3x4x4xf32, #tpu.memory_space<vmem>>, %arg9: memref<1x4xf32, #tpu.memory_space<vmem>>, %arg10: memref<1x256x4xf32, #tpu.memory_space<vmem>>, %arg11: memref<18x18x4xf32, #tpu.memory_space<vmem>>) attributes {dimension_semantics = [#tpu.dimension_semantics<parallel>], iteration_bounds = array<i64: 2>, scalar_prefetch = 0 : i64, scratch_operands = 1 : i64, tpu.core_type = #tpu.core_type<tc>, window_params = [{transform_indices = @transform_0, window_bounds = array<i64: 1, 64, 8>}, {transform_indices = @transform_1, window_bounds = array<i64: 1, 256, 4>}, {pipeline_mode = #tpu.pipeline_mode<synchronous>, transform_indices = @transform_2, window_bounds = array<i64: 256, 64>}, {pipeline_mode = #tpu.pipeline_mode<synchronous>, transform_indices = @transform_3, window_bounds = array<i64: 8, 4>}, {pipeline_mode = #tpu.pipeline_mode<synchronous>, transform_indices = @transform_4, window_bounds = array<i64: 1, 4>}, {pipeline_mode = #tpu.pipeline_mode<synchronous>, transform_indices = @transform_5, window_bounds = array<i64: 3, 3, 4, 4>}, {pipeline_mode = #tpu.pipeline_mode<synchronous>, transform_indices = @transform_6, window_bounds = array<i64: 1, 4>}, {pipeline_mode = #tpu.pipeline_mode<synchronous>, transform_indices = @transform_7, window_bounds = array<i64: 3, 3, 4, 4>}, {pipeline_mode = #tpu.pipeline_mode<synchronous>, transform_indices = @transform_8, window_bounds = array<i64: 1, 4>}, {transform_indices = @transform_9, window_bounds = array<i64: 1, 256, 4>}]} {
    %c0 = arith.constant 0 : index
    %c0_0 = arith.constant 0 : index
    %c0_1 = arith.constant 0 : index
    %0 = vector.load %arg1[%c0, %c0_0, %c0_1] : memref<1x64x8xf32, #tpu.memory_space<vmem>>, vector<1x64x8xf32>
    %1 = vector.shape_cast %0 : vector<1x64x8xf32> to vector<64x8xf32>
    %c0_2 = arith.constant 0 : index
    %c0_3 = arith.constant 0 : index
    %2 = vector.load %arg4[%c0_2, %c0_3] : memref<8x4xf32, #tpu.memory_space<vmem>>, vector<8x4xf32>
    %cst = arith.constant dense<0.000000e+00> : vector<64x4xf32>
    %3 = tpu.matmul %1, %2, %cst {dimension_numbers = #tpu.dot_dimension_numbers<[1], [0], [0], [1], [0, 0, 1, 1], [], []>} : vector<64x8xf32>, vector<8x4xf32>, vector<64x4xf32> -> vector<64x4xf32>
    %c0_4 = arith.constant 0 : index
    %c0_5 = arith.constant 0 : index
    %4 = vector.load %arg3[%c0_4, %c0_5] : memref<256x64xf32, #tpu.memory_space<vmem>>, vector<256x64xf32>
    %cst_6 = arith.constant dense<0.000000e+00> : vector<256x4xf32>
    %5 = tpu.matmul %4, %3, %cst_6 {dimension_numbers = #tpu.dot_dimension_numbers<[1], [0], [0], [1], [0, 0, 1, 1], [], []>} : vector<256x64xf32>, vector<64x4xf32>, vector<256x4xf32> -> vector<256x4xf32>
    %c0_7 = arith.constant 0 : index
    %c0_8 = arith.constant 0 : index
    %c0_9 = arith.constant 0 : index
    %6 = vector.load %arg2[%c0_7, %c0_8, %c0_9] : memref<1x256x4xf32, #tpu.memory_space<vmem>>, vector<1x256x4xf32>
    %7 = vector.shape_cast %6 : vector<1x256x4xf32> to vector<256x4xf32>
    %8 = arith.addf %5, %7 : vector<256x4xf32>
    %c0_10 = arith.constant 0 : index
    %c0_11 = arith.constant 0 : index
    %9 = vector.load %arg5[%c0_10, %c0_11] : memref<1x4xf32, #tpu.memory_space<vmem>>, vector<1x4xf32>
    %10 = vector.broadcast %9 : vector<1x4xf32> to vector<256x4xf32>
    %11 = arith.addf %8, %10 : vector<256x4xf32>
    %cst_12 = arith.constant 0.000000e+00 : f32
    %12 = vector.broadcast %cst_12 : f32 to vector<18x18x4xf32>
    %c0_13 = arith.constant 0 : index
    %c0_14 = arith.constant 0 : index
    %c0_15 = arith.constant 0 : index
    %13 = vector.load %arg11[%c0_13, %c0_14, %c0_15] : memref<18x18x4xf32, #tpu.memory_space<vmem>>, vector<18x18x4xf32>
    tpu.vector_store %arg11[%c0_13, %c0_14, %c0_15], %12 {strides = array<i32>} : memref<18x18x4xf32, #tpu.memory_space<vmem>>, vector<18x18x4xf32>,
    %14 = vector.shape_cast %11 : vector<256x4xf32> to vector<16x16x4xf32>
    %c1 = arith.constant 1 : index
    %c1_16 = arith.constant 1 : index
    %c0_17 = arith.constant 0 : index
    %15 = vector.load %arg11[%c1, %c1_16, %c0_17] : memref<18x18x4xf32, #tpu.memory_space<vmem>>, vector<16x16x4xf32>
    tpu.vector_store %arg11[%c1, %c1_16, %c0_17], %14 {strides = array<i32>} : memref<18x18x4xf32, #tpu.memory_space<vmem>>, vector<16x16x4xf32>,
    %cst_18 = arith.constant 0.000000e+00 : f32
    %16 = vector.broadcast %cst_18 : f32 to vector<256x4xf32>
    %c0_19 = arith.constant 0 : index
    %c0_20 = arith.constant 0 : index
    %c0_21 = arith.constant 0 : index
    %17 = vector.load %arg11[%c0_19, %c0_20, %c0_21] : memref<18x18x4xf32, #tpu.memory_space<vmem>>, vector<16x16x4xf32>
    %18 = vector.shape_cast %17 : vector<16x16x4xf32> to vector<256x4xf32>
    %c0_22 = arith.constant 0 : index
    %c0_23 = arith.constant 0 : index
    %c0_24 = arith.constant 0 : index
    %c0_25 = arith.constant 0 : index
    %19 = vector.load %arg6[%c0_22, %c0_23, %c0_24, %c0_25] : memref<3x3x4x4xf32, #tpu.memory_space<vmem>>, vector<1x1x4x4xf32>
    %20 = vector.shape_cast %19 : vector<1x1x4x4xf32> to vector<4x4xf32>
    %cst_26 = arith.constant dense<0.000000e+00> : vector<256x4xf32>
    %21 = tpu.matmul %18, %20, %cst_26 {dimension_numbers = #tpu.dot_dimension_numbers<[1], [0], [0], [1], [0, 0, 1, 1], [], []>} : vector<256x4xf32>, vector<4x4xf32>, vector<256x4xf32> -> vector<256x4xf32>
    %22 = arith.addf %16, %21 : vector<256x4xf32>
    %c0_27 = arith.constant 0 : index
    %c1_28 = arith.constant 1 : index
    %c0_29 = arith.constant 0 : index
    %23 = vector.load %arg11[%c0_27, %c1_28, %c0_29] : memref<18x18x4xf32, #tpu.memory_space<vmem>>, vector<16x16x4xf32>
    %24 = vector.shape_cast %23 : vector<16x16x4xf32> to vector<256x4xf32>
    %c0_30 = arith.constant 0 : index
    %c1_31 = arith.constant 1 : index
    %c0_32 = arith.constant 0 : index
    %c0_33 = arith.constant 0 : index
    %25 = vector.load %arg6[%c0_30, %c1_31, %c0_32, %c0_33] : memref<3x3x4x4xf32, #tpu.memory_space<vmem>>, vector<1x1x4x4xf32>
    %26 = vector.shape_cast %25 : vector<1x1x4x4xf32> to vector<4x4xf32>
    %cst_34 = arith.constant dense<0.000000e+00> : vector<256x4xf32>
    %27 = tpu.matmul %24, %26, %cst_34 {dimension_numbers = #tpu.dot_dimension_numbers<[1], [0], [0], [1], [0, 0, 1, 1], [], []>} : vector<256x4xf32>, vector<4x4xf32>, vector<256x4xf32> -> vector<256x4xf32>
    %28 = arith.addf %22, %27 : vector<256x4xf32>
    %c0_35 = arith.constant 0 : index
    %c2 = arith.constant 2 : index
    %c0_36 = arith.constant 0 : index
    %29 = vector.load %arg11[%c0_35, %c2, %c0_36] : memref<18x18x4xf32, #tpu.memory_space<vmem>>, vector<16x16x4xf32>
    %30 = vector.shape_cast %29 : vector<16x16x4xf32> to vector<256x4xf32>
    %c0_37 = arith.constant 0 : index
    %c2_38 = arith.constant 2 : index
    %c0_39 = arith.constant 0 : index
    %c0_40 = arith.constant 0 : index
    %31 = vector.load %arg6[%c0_37, %c2_38, %c0_39, %c0_40] : memref<3x3x4x4xf32, #tpu.memory_space<vmem>>, vector<1x1x4x4xf32>
    %32 = vector.shape_cast %31 : vector<1x1x4x4xf32> to vector<4x4xf32>
    %cst_41 = arith.constant dense<0.000000e+00> : vector<256x4xf32>
    %33 = tpu.matmul %30, %32, %cst_41 {dimension_numbers = #tpu.dot_dimension_numbers<[1], [0], [0], [1], [0, 0, 1, 1], [], []>} : vector<256x4xf32>, vector<4x4xf32>, vector<256x4xf32> -> vector<256x4xf32>
    %34 = arith.addf %28, %33 : vector<256x4xf32>
    %c1_42 = arith.constant 1 : index
    %c0_43 = arith.constant 0 : index
    %c0_44 = arith.constant 0 : index
    %35 = vector.load %arg11[%c1_42, %c0_43, %c0_44] : memref<18x18x4xf32, #tpu.memory_space<vmem>>, vector<16x16x4xf32>
    %36 = vector.shape_cast %35 : vector<16x16x4xf32> to vector<256x4xf32>
    %c1_45 = arith.constant 1 : index
    %c0_46 = arith.constant 0 : index
    %c0_47 = arith.constant 0 : index
    %c0_48 = arith.constant 0 : index
    %37 = vector.load %arg6[%c1_45, %c0_46, %c0_47, %c0_48] : memref<3x3x4x4xf32, #tpu.memory_space<vmem>>, vector<1x1x4x4xf32>
    %38 = vector.shape_cast %37 : vector<1x1x4x4xf32> to vector<4x4xf32>
    %cst_49 = arith.constant dense<0.000000e+00> : vector<256x4xf32>
    %39 = tpu.matmul %36, %38, %cst_49 {dimension_numbers = #tpu.dot_dimension_numbers<[1], [0], [0], [1], [0, 0, 1, 1], [], []>} : vector<256x4xf32>, vector<4x4xf32>, vector<256x4xf32> -> vector<256x4xf32>
    %40 = arith.addf %34, %39 : vector<256x4xf32>
    %c1_50 = arith.constant 1 : index
    %c1_51 = arith.constant 1 : index
    %c0_52 = arith.constant 0 : index
    %41 = vector.load %arg11[%c1_50, %c1_51, %c0_52] : memref<18x18x4xf32, #tpu.memory_space<vmem>>, vector<16x16x4xf32>
    %42 = vector.shape_cast %41 : vector<16x16x4xf32> to vector<256x4xf32>
    %c1_53 = arith.constant 1 : index
    %c1_54 = arith.constant 1 : index
    %c0_55 = arith.constant 0 : index
    %c0_56 = arith.constant 0 : index
    %43 = vector.load %arg6[%c1_53, %c1_54, %c0_55, %c0_56] : memref<3x3x4x4xf32, #tpu.memory_space<vmem>>, vector<1x1x4x4xf32>
    %44 = vector.shape_cast %43 : vector<1x1x4x4xf32> to vector<4x4xf32>
    %cst_57 = arith.constant dense<0.000000e+00> : vector<256x4xf32>
    %45 = tpu.matmul %42, %44, %cst_57 {dimension_numbers = #tpu.dot_dimension_numbers<[1], [0], [0], [1], [0, 0, 1, 1], [], []>} : vector<256x4xf32>, vector<4x4xf32>, vector<256x4xf32> -> vector<256x4xf32>
    %46 = arith.addf %40, %45 : vector<256x4xf32>
    %c1_58 = arith.constant 1 : index
    %c2_59 = arith.constant 2 : index
    %c0_60 = arith.constant 0 : index
    %47 = vector.load %arg11[%c1_58, %c2_59, %c0_60] : memref<18x18x4xf32, #tpu.memory_space<vmem>>, vector<16x16x4xf32>
    %48 = vector.shape_cast %47 : vector<16x16x4xf32> to vector<256x4xf32>
    %c1_61 = arith.constant 1 : index
    %c2_62 = arith.constant 2 : index
    %c0_63 = arith.constant 0 : index
    %c0_64 = arith.constant 0 : index
    %49 = vector.load %arg6[%c1_61, %c2_62, %c0_63, %c0_64] : memref<3x3x4x4xf32, #tpu.memory_space<vmem>>, vector<1x1x4x4xf32>
    %50 = vector.shape_cast %49 : vector<1x1x4x4xf32> to vector<4x4xf32>
    %cst_65 = arith.constant dense<0.000000e+00> : vector<256x4xf32>
    %51 = tpu.matmul %48, %50, %cst_65 {dimension_numbers = #tpu.dot_dimension_numbers<[1], [0], [0], [1], [0, 0, 1, 1], [], []>} : vector<256x4xf32>, vector<4x4xf32>, vector<256x4xf32> -> vector<256x4xf32>
    %52 = arith.addf %46, %51 : vector<256x4xf32>
    %c2_66 = arith.constant 2 : index
    %c0_67 = arith.constant 0 : index
    %c0_68 = arith.constant 0 : index
    %53 = vector.load %arg11[%c2_66, %c0_67, %c0_68] : memref<18x18x4xf32, #tpu.memory_space<vmem>>, vector<16x16x4xf32>
    %54 = vector.shape_cast %53 : vector<16x16x4xf32> to vector<256x4xf32>
    %c2_69 = arith.constant 2 : index
    %c0_70 = arith.constant 0 : index
    %c0_71 = arith.constant 0 : index
    %c0_72 = arith.constant 0 : index
    %55 = vector.load %arg6[%c2_69, %c0_70, %c0_71, %c0_72] : memref<3x3x4x4xf32, #tpu.memory_space<vmem>>, vector<1x1x4x4xf32>
    %56 = vector.shape_cast %55 : vector<1x1x4x4xf32> to vector<4x4xf32>
    %cst_73 = arith.constant dense<0.000000e+00> : vector<256x4xf32>
    %57 = tpu.matmul %54, %56, %cst_73 {dimension_numbers = #tpu.dot_dimension_numbers<[1], [0], [0], [1], [0, 0, 1, 1], [], []>} : vector<256x4xf32>, vector<4x4xf32>, vector<256x4xf32> -> vector<256x4xf32>
    %58 = arith.addf %52, %57 : vector<256x4xf32>
    %c2_74 = arith.constant 2 : index
    %c1_75 = arith.constant 1 : index
    %c0_76 = arith.constant 0 : index
    %59 = vector.load %arg11[%c2_74, %c1_75, %c0_76] : memref<18x18x4xf32, #tpu.memory_space<vmem>>, vector<16x16x4xf32>
    %60 = vector.shape_cast %59 : vector<16x16x4xf32> to vector<256x4xf32>
    %c2_77 = arith.constant 2 : index
    %c1_78 = arith.constant 1 : index
    %c0_79 = arith.constant 0 : index
    %c0_80 = arith.constant 0 : index
    %61 = vector.load %arg6[%c2_77, %c1_78, %c0_79, %c0_80] : memref<3x3x4x4xf32, #tpu.memory_space<vmem>>, vector<1x1x4x4xf32>
    %62 = vector.shape_cast %61 : vector<1x1x4x4xf32> to vector<4x4xf32>
    %cst_81 = arith.constant dense<0.000000e+00> : vector<256x4xf32>
    %63 = tpu.matmul %60, %62, %cst_81 {dimension_numbers = #tpu.dot_dimension_numbers<[1], [0], [0], [1], [0, 0, 1, 1], [], []>} : vector<256x4xf32>, vector<4x4xf32>, vector<256x4xf32> -> vector<256x4xf32>
    %64 = arith.addf %58, %63 : vector<256x4xf32>
    %c2_82 = arith.constant 2 : index
    %c2_83 = arith.constant 2 : index
    %c0_84 = arith.constant 0 : index
    %65 = vector.load %arg11[%c2_82, %c2_83, %c0_84] : memref<18x18x4xf32, #tpu.memory_space<vmem>>, vector<16x16x4xf32>
    %66 = vector.shape_cast %65 : vector<16x16x4xf32> to vector<256x4xf32>
    %c2_85 = arith.constant 2 : index
    %c2_86 = arith.constant 2 : index
    %c0_87 = arith.constant 0 : index
    %c0_88 = arith.constant 0 : index
    %67 = vector.load %arg6[%c2_85, %c2_86, %c0_87, %c0_88] : memref<3x3x4x4xf32, #tpu.memory_space<vmem>>, vector<1x1x4x4xf32>
    %68 = vector.shape_cast %67 : vector<1x1x4x4xf32> to vector<4x4xf32>
    %cst_89 = arith.constant dense<0.000000e+00> : vector<256x4xf32>
    %69 = tpu.matmul %66, %68, %cst_89 {dimension_numbers = #tpu.dot_dimension_numbers<[1], [0], [0], [1], [0, 0, 1, 1], [], []>} : vector<256x4xf32>, vector<4x4xf32>, vector<256x4xf32> -> vector<256x4xf32>
    %70 = arith.addf %64, %69 : vector<256x4xf32>
    %c0_90 = arith.constant 0 : index
    %c0_91 = arith.constant 0 : index
    %71 = vector.load %arg7[%c0_90, %c0_91] : memref<1x4xf32, #tpu.memory_space<vmem>>, vector<1x4xf32>
    %72 = vector.broadcast %71 : vector<1x4xf32> to vector<256x4xf32>
    %73 = arith.addf %70, %72 : vector<256x4xf32>
    %cst_92 = arith.constant 0.000000e+00 : f32
    %74 = vector.broadcast %cst_92 : f32 to vector<256x4xf32>
    %75 = arith.maximumf %73, %74 : vector<256x4xf32>
    %76 = vector.shape_cast %75 : vector<256x4xf32> to vector<16x16x4xf32>
    %c1_93 = arith.constant 1 : index
    %c1_94 = arith.constant 1 : index
    %c0_95 = arith.constant 0 : index
    %77 = vector.load %arg11[%c1_93, %c1_94, %c0_95] : memref<18x18x4xf32, #tpu.memory_space<vmem>>, vector<16x16x4xf32>
    tpu.vector_store %arg11[%c1_93, %c1_94, %c0_95], %76 {strides = array<i32>} : memref<18x18x4xf32, #tpu.memory_space<vmem>>, vector<16x16x4xf32>,
    %cst_96 = arith.constant 0.000000e+00 : f32
    %78 = vector.broadcast %cst_96 : f32 to vector<256x4xf32>
    %c0_97 = arith.constant 0 : index
    %c0_98 = arith.constant 0 : index
    %c0_99 = arith.constant 0 : index
    %79 = vector.load %arg11[%c0_97, %c0_98, %c0_99] : memref<18x18x4xf32, #tpu.memory_space<vmem>>, vector<16x16x4xf32>
    %80 = vector.shape_cast %79 : vector<16x16x4xf32> to vector<256x4xf32>
    %c0_100 = arith.constant 0 : index
    %c0_101 = arith.constant 0 : index
    %c0_102 = arith.constant 0 : index
    %c0_103 = arith.constant 0 : index
    %81 = vector.load %arg8[%c0_100, %c0_101, %c0_102, %c0_103] : memref<3x3x4x4xf32, #tpu.memory_space<vmem>>, vector<1x1x4x4xf32>
    %82 = vector.shape_cast %81 : vector<1x1x4x4xf32> to vector<4x4xf32>
    %cst_104 = arith.constant dense<0.000000e+00> : vector<256x4xf32>
    %83 = tpu.matmul %80, %82, %cst_104 {dimension_numbers = #tpu.dot_dimension_numbers<[1], [0], [0], [1], [0, 0, 1, 1], [], []>} : vector<256x4xf32>, vector<4x4xf32>, vector<256x4xf32> -> vector<256x4xf32>
    %84 = arith.addf %78, %83 : vector<256x4xf32>
    %c0_105 = arith.constant 0 : index
    %c1_106 = arith.constant 1 : index
    %c0_107 = arith.constant 0 : index
    %85 = vector.load %arg11[%c0_105, %c1_106, %c0_107] : memref<18x18x4xf32, #tpu.memory_space<vmem>>, vector<16x16x4xf32>
    %86 = vector.shape_cast %85 : vector<16x16x4xf32> to vector<256x4xf32>
    %c0_108 = arith.constant 0 : index
    %c1_109 = arith.constant 1 : index
    %c0_110 = arith.constant 0 : index
    %c0_111 = arith.constant 0 : index
    %87 = vector.load %arg8[%c0_108, %c1_109, %c0_110, %c0_111] : memref<3x3x4x4xf32, #tpu.memory_space<vmem>>, vector<1x1x4x4xf32>
    %88 = vector.shape_cast %87 : vector<1x1x4x4xf32> to vector<4x4xf32>
    %cst_112 = arith.constant dense<0.000000e+00> : vector<256x4xf32>
    %89 = tpu.matmul %86, %88, %cst_112 {dimension_numbers = #tpu.dot_dimension_numbers<[1], [0], [0], [1], [0, 0, 1, 1], [], []>} : vector<256x4xf32>, vector<4x4xf32>, vector<256x4xf32> -> vector<256x4xf32>
    %90 = arith.addf %84, %89 : vector<256x4xf32>
    %c0_113 = arith.constant 0 : index
    %c2_114 = arith.constant 2 : index
    %c0_115 = arith.constant 0 : index
    %91 = vector.load %arg11[%c0_113, %c2_114, %c0_115] : memref<18x18x4xf32, #tpu.memory_space<vmem>>, vector<16x16x4xf32>
    %92 = vector.shape_cast %91 : vector<16x16x4xf32> to vector<256x4xf32>
    %c0_116 = arith.constant 0 : index
    %c2_117 = arith.constant 2 : index
    %c0_118 = arith.constant 0 : index
    %c0_119 = arith.constant 0 : index
    %93 = vector.load %arg8[%c0_116, %c2_117, %c0_118, %c0_119] : memref<3x3x4x4xf32, #tpu.memory_space<vmem>>, vector<1x1x4x4xf32>
    %94 = vector.shape_cast %93 : vector<1x1x4x4xf32> to vector<4x4xf32>
    %cst_120 = arith.constant dense<0.000000e+00> : vector<256x4xf32>
    %95 = tpu.matmul %92, %94, %cst_120 {dimension_numbers = #tpu.dot_dimension_numbers<[1], [0], [0], [1], [0, 0, 1, 1], [], []>} : vector<256x4xf32>, vector<4x4xf32>, vector<256x4xf32> -> vector<256x4xf32>
    %96 = arith.addf %90, %95 : vector<256x4xf32>
    %c1_121 = arith.constant 1 : index
    %c0_122 = arith.constant 0 : index
    %c0_123 = arith.constant 0 : index
    %97 = vector.load %arg11[%c1_121, %c0_122, %c0_123] : memref<18x18x4xf32, #tpu.memory_space<vmem>>, vector<16x16x4xf32>
    %98 = vector.shape_cast %97 : vector<16x16x4xf32> to vector<256x4xf32>
    %c1_124 = arith.constant 1 : index
    %c0_125 = arith.constant 0 : index
    %c0_126 = arith.constant 0 : index
    %c0_127 = arith.constant 0 : index
    %99 = vector.load %arg8[%c1_124, %c0_125, %c0_126, %c0_127] : memref<3x3x4x4xf32, #tpu.memory_space<vmem>>, vector<1x1x4x4xf32>
    %100 = vector.shape_cast %99 : vector<1x1x4x4xf32> to vector<4x4xf32>
    %cst_128 = arith.constant dense<0.000000e+00> : vector<256x4xf32>
    %101 = tpu.matmul %98, %100, %cst_128 {dimension_numbers = #tpu.dot_dimension_numbers<[1], [0], [0], [1], [0, 0, 1, 1], [], []>} : vector<256x4xf32>, vector<4x4xf32>, vector<256x4xf32> -> vector<256x4xf32>
    %102 = arith.addf %96, %101 : vector<256x4xf32>
    %c1_129 = arith.constant 1 : index
    %c1_130 = arith.constant 1 : index
    %c0_131 = arith.constant 0 : index
    %103 = vector.load %arg11[%c1_129, %c1_130, %c0_131] : memref<18x18x4xf32, #tpu.memory_space<vmem>>, vector<16x16x4xf32>
    %104 = vector.shape_cast %103 : vector<16x16x4xf32> to vector<256x4xf32>
    %c1_132 = arith.constant 1 : index
    %c1_133 = arith.constant 1 : index
    %c0_134 = arith.constant 0 : index
    %c0_135 = arith.constant 0 : index
    %105 = vector.load %arg8[%c1_132, %c1_133, %c0_134, %c0_135] : memref<3x3x4x4xf32, #tpu.memory_space<vmem>>, vector<1x1x4x4xf32>
    %106 = vector.shape_cast %105 : vector<1x1x4x4xf32> to vector<4x4xf32>
    %cst_136 = arith.constant dense<0.000000e+00> : vector<256x4xf32>
    %107 = tpu.matmul %104, %106, %cst_136 {dimension_numbers = #tpu.dot_dimension_numbers<[1], [0], [0], [1], [0, 0, 1, 1], [], []>} : vector<256x4xf32>, vector<4x4xf32>, vector<256x4xf32> -> vector<256x4xf32>
    %108 = arith.addf %102, %107 : vector<256x4xf32>
    %c1_137 = arith.constant 1 : index
    %c2_138 = arith.constant 2 : index
    %c0_139 = arith.constant 0 : index
    %109 = vector.load %arg11[%c1_137, %c2_138, %c0_139] : memref<18x18x4xf32, #tpu.memory_space<vmem>>, vector<16x16x4xf32>
    %110 = vector.shape_cast %109 : vector<16x16x4xf32> to vector<256x4xf32>
    %c1_140 = arith.constant 1 : index
    %c2_141 = arith.constant 2 : index
    %c0_142 = arith.constant 0 : index
    %c0_143 = arith.constant 0 : index
    %111 = vector.load %arg8[%c1_140, %c2_141, %c0_142, %c0_143] : memref<3x3x4x4xf32, #tpu.memory_space<vmem>>, vector<1x1x4x4xf32>
    %112 = vector.shape_cast %111 : vector<1x1x4x4xf32> to vector<4x4xf32>
    %cst_144 = arith.constant dense<0.000000e+00> : vector<256x4xf32>
    %113 = tpu.matmul %110, %112, %cst_144 {dimension_numbers = #tpu.dot_dimension_numbers<[1], [0], [0], [1], [0, 0, 1, 1], [], []>} : vector<256x4xf32>, vector<4x4xf32>, vector<256x4xf32> -> vector<256x4xf32>
    %114 = arith.addf %108, %113 : vector<256x4xf32>
    %c2_145 = arith.constant 2 : index
    %c0_146 = arith.constant 0 : index
    %c0_147 = arith.constant 0 : index
    %115 = vector.load %arg11[%c2_145, %c0_146, %c0_147] : memref<18x18x4xf32, #tpu.memory_space<vmem>>, vector<16x16x4xf32>
    %116 = vector.shape_cast %115 : vector<16x16x4xf32> to vector<256x4xf32>
    %c2_148 = arith.constant 2 : index
    %c0_149 = arith.constant 0 : index
    %c0_150 = arith.constant 0 : index
    %c0_151 = arith.constant 0 : index
    %117 = vector.load %arg8[%c2_148, %c0_149, %c0_150, %c0_151] : memref<3x3x4x4xf32, #tpu.memory_space<vmem>>, vector<1x1x4x4xf32>
    %118 = vector.shape_cast %117 : vector<1x1x4x4xf32> to vector<4x4xf32>
    %cst_152 = arith.constant dense<0.000000e+00> : vector<256x4xf32>
    %119 = tpu.matmul %116, %118, %cst_152 {dimension_numbers = #tpu.dot_dimension_numbers<[1], [0], [0], [1], [0, 0, 1, 1], [], []>} : vector<256x4xf32>, vector<4x4xf32>, vector<256x4xf32> -> vector<256x4xf32>
    %120 = arith.addf %114, %119 : vector<256x4xf32>
    %c2_153 = arith.constant 2 : index
    %c1_154 = arith.constant 1 : index
    %c0_155 = arith.constant 0 : index
    %121 = vector.load %arg11[%c2_153, %c1_154, %c0_155] : memref<18x18x4xf32, #tpu.memory_space<vmem>>, vector<16x16x4xf32>
    %122 = vector.shape_cast %121 : vector<16x16x4xf32> to vector<256x4xf32>
    %c2_156 = arith.constant 2 : index
    %c1_157 = arith.constant 1 : index
    %c0_158 = arith.constant 0 : index
    %c0_159 = arith.constant 0 : index
    %123 = vector.load %arg8[%c2_156, %c1_157, %c0_158, %c0_159] : memref<3x3x4x4xf32, #tpu.memory_space<vmem>>, vector<1x1x4x4xf32>
    %124 = vector.shape_cast %123 : vector<1x1x4x4xf32> to vector<4x4xf32>
    %cst_160 = arith.constant dense<0.000000e+00> : vector<256x4xf32>
    %125 = tpu.matmul %122, %124, %cst_160 {dimension_numbers = #tpu.dot_dimension_numbers<[1], [0], [0], [1], [0, 0, 1, 1], [], []>} : vector<256x4xf32>, vector<4x4xf32>, vector<256x4xf32> -> vector<256x4xf32>
    %126 = arith.addf %120, %125 : vector<256x4xf32>
    %c2_161 = arith.constant 2 : index
    %c2_162 = arith.constant 2 : index
    %c0_163 = arith.constant 0 : index
    %127 = vector.load %arg11[%c2_161, %c2_162, %c0_163] : memref<18x18x4xf32, #tpu.memory_space<vmem>>, vector<16x16x4xf32>
    %128 = vector.shape_cast %127 : vector<16x16x4xf32> to vector<256x4xf32>
    %c2_164 = arith.constant 2 : index
    %c2_165 = arith.constant 2 : index
    %c0_166 = arith.constant 0 : index
    %c0_167 = arith.constant 0 : index
    %129 = vector.load %arg8[%c2_164, %c2_165, %c0_166, %c0_167] : memref<3x3x4x4xf32, #tpu.memory_space<vmem>>, vector<1x1x4x4xf32>
    %130 = vector.shape_cast %129 : vector<1x1x4x4xf32> to vector<4x4xf32>
    %cst_168 = arith.constant dense<0.000000e+00> : vector<256x4xf32>
    %131 = tpu.matmul %128, %130, %cst_168 {dimension_numbers = #tpu.dot_dimension_numbers<[1], [0], [0], [1], [0, 0, 1, 1], [], []>} : vector<256x4xf32>, vector<4x4xf32>, vector<256x4xf32> -> vector<256x4xf32>
    %132 = arith.addf %126, %131 : vector<256x4xf32>
    %c0_169 = arith.constant 0 : index
    %c0_170 = arith.constant 0 : index
    %133 = vector.load %arg9[%c0_169, %c0_170] : memref<1x4xf32, #tpu.memory_space<vmem>>, vector<1x4xf32>
    %134 = vector.broadcast %133 : vector<1x4xf32> to vector<256x4xf32>
    %135 = arith.addf %132, %134 : vector<256x4xf32>
    %cst_171 = arith.constant 0.000000e+00 : f32
    %136 = vector.broadcast %cst_171 : f32 to vector<256x4xf32>
    %137 = arith.maximumf %135, %136 : vector<256x4xf32>
    %c0_172 = arith.constant 0 : index
    %c0_173 = arith.constant 0 : index
    %c0_174 = arith.constant 0 : index
    %138 = vector.load %arg10[%c0_172, %c0_173, %c0_174] : memref<1x256x4xf32, #tpu.memory_space<vmem>>, vector<1x256x4xf32>
    %139 = vector.shape_cast %138 : vector<1x256x4xf32> to vector<256x4xf32>
    %140 = vector.shape_cast %137 : vector<256x4xf32> to vector<1x256x4xf32>
    tpu.vector_store %arg10[%c0_172, %c0_173, %c0_174], %140 {strides = array<i32>} : memref<1x256x4xf32, #tpu.memory_space<vmem>>, vector<1x256x4xf32>,
    return
  }
  func.func @transform_0(%arg0: i32) -> (i32, i32, i32) {
    %c0_i32 = arith.constant 0 : i32
    %c0_i32_0 = arith.constant 0 : i32
    %c0_i32_1 = arith.constant 0 : i32
    return %arg0, %c0_i32, %c0_i32_0 : i32, i32, i32
  }
  func.func @transform_1(%arg0: i32) -> (i32, i32, i32) {
    %c0_i32 = arith.constant 0 : i32
    %c0_i32_0 = arith.constant 0 : i32
    %c0_i32_1 = arith.constant 0 : i32
    return %arg0, %c0_i32, %c0_i32_0 : i32, i32, i32
  }
  func.func @transform_2(%arg0: i32) -> (i32, i32) {
    %c0_i32 = arith.constant 0 : i32
    %c0_i32_0 = arith.constant 0 : i32
    %c0_i32_1 = arith.constant 0 : i32
    return %c0_i32, %c0_i32_0 : i32, i32
  }
  func.func @transform_3(%arg0: i32) -> (i32, i32) {
    %c0_i32 = arith.constant 0 : i32
    %c0_i32_0 = arith.constant 0 : i32
    %c0_i32_1 = arith.constant 0 : i32
    return %c0_i32, %c0_i32_0 : i32, i32
  }
  func.func @transform_4(%arg0: i32) -> (i32, i32) {
    %c0_i32 = arith.constant 0 : i32
    %c0_i32_0 = arith.constant 0 : i32
    %c0_i32_1 = arith.constant 0 : i32
    return %c0_i32, %c0_i32_0 : i32, i32
  }
  func.func @transform_5(%arg0: i32) -> (i32, i32, i32, i32) {
    %c0_i32 = arith.constant 0 : i32
    %c0_i32_0 = arith.constant 0 : i32
    %c0_i32_1 = arith.constant 0 : i32
    %c0_i32_2 = arith.constant 0 : i32
    %c0_i32_3 = arith.constant 0 : i32
    return %c0_i32, %c0_i32_0, %c0_i32_1, %c0_i32_2 : i32, i32, i32, i32
  }
  func.func @transform_6(%arg0: i32) -> (i32, i32) {
    %c0_i32 = arith.constant 0 : i32
    %c0_i32_0 = arith.constant 0 : i32
    %c0_i32_1 = arith.constant 0 : i32
    return %c0_i32, %c0_i32_0 : i32, i32
  }
  func.func @transform_7(%arg0: i32) -> (i32, i32, i32, i32) {
    %c0_i32 = arith.constant 0 : i32
    %c0_i32_0 = arith.constant 0 : i32
    %c0_i32_1 = arith.constant 0 : i32
    %c0_i32_2 = arith.constant 0 : i32
    %c0_i32_3 = arith.constant 0 : i32
    return %c0_i32, %c0_i32_0, %c0_i32_1, %c0_i32_2 : i32, i32, i32, i32
  }
  func.func @transform_8(%arg0: i32) -> (i32, i32) {
    %c0_i32 = arith.constant 0 : i32
    %c0_i32_0 = arith.constant 0 : i32
    %c0_i32_1 = arith.constant 0 : i32
    return %c0_i32, %c0_i32_0 : i32, i32
  }
  func.func @transform_9(%arg0: i32) -> (i32, i32, i32) {
    %c0_i32 = arith.constant 0 : i32
    %c0_i32_0 = arith.constant 0 : i32
    %c0_i32_1 = arith.constant 0 : i32
    return %arg0, %c0_i32, %c0_i32_0 : i32, i32, i32
  }
}

</mosaic_0001>

<bundles_post_ra>
// kernel: tpu_custom_call.1
= control target key start
LH: loop header
LB: loop body
LE: loop exit
PB: predicated region body
PF: predicated region fallthrough
CT: control target
= control target key end

     0   :  { %s10545_s30 = smov 0   ;;  %s13844_s0 = inlined_call_operand.vmem [shape: f32[2,64,8], index: 0, kind: input, shape index: {}]   ;;  %s13845_s1 = inlined_call_operand.vmem [shape: f32[2,256,4], index: 1, kind: input, shape index: {}]   ;;  %s13846_s2 = inlined_call_operand.vmem [shape: f32[256,64], index: 2, kind: input, shape index: {}]   ;;  %s13847_s3 = inlined_call_operand.vmem [shape: f32[8,4], index: 3, kind: input, shape index: {}]   ;;  %s13848_s4 = inlined_call_operand.vmem [shape: f32[1,4], index: 4, kind: input, shape index: {}]   ;;  %s13849_s5 = inlined_call_operand.vmem [shape: f32[3,3,4,4], index: 5, kind: input, shape index: {}]   ;;  %s13850_s6 = inlined_call_operand.vmem [shape: f32[1,4], index: 6, kind: input, shape index: {}]   ;;  %s13851_s7 = inlined_call_operand.vmem [shape: f32[3,3,4,4], index: 7, kind: input, shape index: {}]   ;;  %s13852_s8 = inlined_call_operand.vmem [shape: f32[1,4], index: 8, kind: input, shape index: {}]   ;;  %s13853_s9 = inlined_call_operand.vmem [shape: f32[2,256,4], index: 9, kind: output, shape index: {}]  }
   0x1 LB: > { %s8171_s10 = sadd.s32 4294967295, %s10492_s30   ;;  %p8175_p0 = scmp.ge.s32.totalorder %s10492_s30, 1  ;;  %s10492_s30 = sphi %s10545_s30, %s19_s30  }
   0x2   : > { %p297_p1 = scmp.lt.s32.totalorder %s10492_s30, 3 }
   0x4   : > { %p298_p2 = pnand %p8175_p0, %p297_p1 }
   0x6   : > { %301 = sbr.rel (%p298_p2) target bundleno = 1427 (0x593), region = 56 }
   0xb   : > { %v361_v0 = vld [vmem:[%s13847_s3] sm:$0xff]  ;;  %p338_p3 = scmp.lt.s32.totalorder %s8171_s10, 1  ;;  %vm362_vm0 = vcmask 64512   ;;  %vm556_vm1 = vcmask 523264   ;;  %v506_v10 = vld [vmem:[%s13846_s2 + $0x70] sm:$0xff]  ;;  %v493_v19 = vld [vmem:[%s13846_s2 + $0x8] sm:$0xff] }
   0xc   : > { %9483 = vmatprep.subr.mxu0 %v361_v0  ;;  %v492_v9 = vld [vmem:[%s13846_s2] sm:$0xff]  ;;  %9534 = vmatprep.mubr.msk.f32.mxu1 %vm556_vm1, %v506_v10  ;;  %v507_v20 = vld [vmem:[%s13846_s2 + $0x78] sm:$0xff]  ;;  %v494_v21 = vld [vmem:[%s13846_s2 + $0x10] sm:$0xff]  ;;  %vm1169_vm2 = vcmask 1043456   ;;  %vm917_vm3 = vcmask 31744   ;;  %vm920_vm4 = vcmask 25600  }
   0xd   : > { %9484 = vmatpush3.msra.mxu0 %v361_v0  ;;  %s14347_s10 = smov (!%p338_p3, %s8171_s10), 1  ;;  %v508_v22 = vld [vmem:[%s13846_s2 + $0x80] sm:$0xff]  ;;  %v495_v24 = vld [vmem:[%s13846_s2 + $0x18] sm:$0xff]  ;;  %v509_v25 = vld [vmem:[%s13846_s2 + $0x88] sm:$0xff]  ;;  %v10494_v50 = vmov 0.0  }
   0xe   : > { %s8837_s13 = sshll.u32 %s14347_s10, 6  ;;  %v8223_v23 = vld [vmem:[%s13849_s5 + $0x4] sm:$0xf]  ;;  %v510_v27 = vld [vmem:[%s13846_s2 + $0x90] sm:$0xff]  ;;  %v497_v28 = vld [vmem:[%s13846_s2 + $0x28] sm:$0xff]  ;;  %923 = vst.msk [vmem:[#allocation2 + $0x20] sm:$0xff] %vm917_vm3, %v10494_v50 }
   0xf   : > { %s342_s16 = scalar_lea.vmem %s13844_s0, %s8837_s13  ;;  %v496_v26 = vld [vmem:[%s13846_s2 + $0x20] sm:$0xff]  ;;  %v511_v29 = vld [vmem:[%s13846_s2 + $0x98] sm:$0xff]  ;;  %v498_v30 = vld [vmem:[%s13846_s2 + $0x30] sm:$0xff]  ;;  %918 = vst.msk [vmem:[#allocation2] sm:$0xff] %vm917_vm3, %v10494_v50  ;;  %s8838_s15 = sshll.u32 %s14347_s10, 8 }
  0x10   : > { %v353_v1 = vld [vmem:[%s342_s16] sm:$0xff]  ;;  %v354_v2 = vld [vmem:[%s342_s16 + $0x8] sm:$0xff]  ;;  %v355_v3 = vld [vmem:[%s342_s16 + $0x10] sm:$0xff]  ;;  %919 = vst.msk [vmem:[#allocation2 + $0x8] sm:$0xff] %vm917_vm3, %v10494_v50  ;;  %s10789_s18 = scalar_lea.vmem %s13845_s1, %s8838_s15  ;;  %s13630_s17 = scalar_lea.vmem %s13853_s9, %s8838_s15 }
  0x11   : > { %9485 = vmatprep.mubr.msk.f32.mxu0 %vm362_vm0, %v353_v1  ;;  %v356_v4 = vld [vmem:[%s342_s16 + $0x18] sm:$0xff]  ;;  %v357_v5 = vld [vmem:[%s342_s16 + $0x20] sm:$0xff]  ;;  %v358_v6 = vld [vmem:[%s342_s16 + $0x28] sm:$0xff]  ;;  %922 = vst.msk [vmem:[#allocation2 + $0x18] sm:$0xff] %vm917_vm3, %v10494_v50 }
  0x12   : > { %9486 = vmatmul.mubr.msk.f32.vlgmr.msra.gmra.mxu0 %vm362_vm0, %v354_v2  ;;  %v359_v7 = vld [vmem:[%s342_s16 + $0x30] sm:$0xff]  ;;  %v360_v8 = vld [vmem:[%s342_s16 + $0x38] sm:$0xff]  ;;  %v512_v31 = vld [vmem:[%s13846_s2 + $0xa0] sm:$0xff]  ;;  %925 = vst.msk [vmem:[#allocation2 + $0x30] sm:$0xff] %vm917_vm3, %v10494_v50 }
  0x13   : > { %9488 = vmatprep.mubr.msk.f32.mxu0 %vm362_vm0, %v355_v3  ;;  %v499_v32 = vld [vmem:[%s13846_s2 + $0x38] sm:$0xff]  ;;  %v513_v33 = vld [vmem:[%s13846_s2 + $0xa8] sm:$0xff]  ;;  %v500_v34 = vld [vmem:[%s13846_s2 + $0x40] sm:$0xff]  ;;  %926 = vst.msk [vmem:[#allocation2 + $0x38] sm:$0xff] %vm917_vm3, %v10494_v50 }
  0x14   : > { %v514_v35 = vld [vmem:[%s13846_s2 + $0xb0] sm:$0xff]  ;;  %v501_v36 = vld [vmem:[%s13846_s2 + $0x48] sm:$0xff]  ;;  %v515_v37 = vld [vmem:[%s13846_s2 + $0xb8] sm:$0xff]  ;;  %928 = vst.msk [vmem:[#allocation2 + $0x48] sm:$0xff] %vm917_vm3, %v10494_v50 }
  0x15   : > { %v502_v38 = vld [vmem:[%s13846_s2 + $0x50] sm:$0xff]  ;;  %v516_v39 = vld [vmem:[%s13846_s2 + $0xc0] sm:$0xff]  ;;  %v503_v40 = vld [vmem:[%s13846_s2 + $0x58] sm:$0xff]  ;;  %929 = vst.msk [vmem:[#allocation2 + $0x50] sm:$0xff] %vm917_vm3, %v10494_v50 }
  0x16   : > { %9489 = vmatmul.mubr.msk.f32.gmra.mxu0 %vm362_vm0, %v356_v4  ;;  %v517_v41 = vld [vmem:[%s13846_s2 + $0xc8] sm:$0xff]  ;;  %v504_v42 = vld [vmem:[%s13846_s2 + $0x60] sm:$0xff]  ;;  %v518_v43 = vld [vmem:[%s13846_s2 + $0xd0] sm:$0xff]  ;;  %931 = vst.msk [vmem:[#allocation2 + $0x60] sm:$0xff] %vm917_vm3, %v10494_v50 }
  0x17   : > { %9491 = vmatprep.mubr.msk.f32.mxu0 %vm362_vm0, %v357_v5  ;;  %v505_v44 = vld [vmem:[%s13846_s2 + $0x68] sm:$0xff]  ;;  %v519_v45 = vld [vmem:[%s13846_s2 + $0xd8] sm:$0xff]  ;;  %v520_v46 = vld [vmem:[%s13846_s2 + $0xe0] sm:$0xff]  ;;  %932 = vst.msk [vmem:[#allocation2 + $0x68] sm:$0xff] %vm917_vm3, %v10494_v50 }
  0x18   : > { %v521_v47 = vld [vmem:[%s13846_s2 + $0xe8] sm:$0xff]  ;;  %v522_v48 = vld [vmem:[%s13846_s2 + $0xf0] sm:$0xff]  ;;  %v523_v49 = vld [vmem:[%s13846_s2 + $0xf8] sm:$0xff]  ;;  %934 = vst.msk [vmem:[#allocation2 + $0x78] sm:$0xff] %vm917_vm3, %v10494_v50 }
  0x19   : > { %935 = vst.msk [vmem:[#allocation2 + $0x80] sm:$0xff] %vm917_vm3, %v10494_v50  ;;  %937 = vst.msk [vmem:[#allocation2 + $0x90] sm:$0xff] %vm917_vm3, %v10494_v50  ;;  %v1038_v51 = vld [vmem:[%s13849_s5] sm:$0xf]  ;;  %v1007_v55 = vld [vmem:[#allocation2 + $0x8] sm:$0xff] }
  0x1a   : > { %9492 = vmatmul.mubr.msk.f32.gmra.mxu0 %vm362_vm0, %v358_v6  ;;  %938 = vst.msk [vmem:[#allocation2 + $0x98] sm:$0xff] %vm917_vm3, %v10494_v50  ;;  %940 = vst.msk [vmem:[#allocation2 + $0xa8] sm:$0xff] %vm917_vm3, %v10494_v50  ;;  %v1039_v52 = vld [vmem:[#allocation2 + $0x1] sm:$0xff]  ;;  %v8324_v57 = vld [vmem:[%s13849_s5 + $0xc] sm:$0xf] }
  0x1b   : > { %9494 = vmatprep.mubr.msk.f32.mxu0 %vm362_vm0, %v359_v7  ;;  %941 = vst.msk [vmem:[#allocation2 + $0xb0] sm:$0xff] %vm917_vm3, %v10494_v50  ;;  %943 = vst.msk [vmem:[#allocation2 + $0xc0] sm:$0xff] %vm917_vm3, %v10494_v50  ;;  %v1006_v53 = vld [vmem:[#allocation2] sm:$0xff]  ;;  %v8290_v56 = vld [vmem:[%s13849_s5 + $0x8] sm:$0xf] }
  0x1c   : > { %944 = vst.msk [vmem:[#allocation2 + $0xc8] sm:$0xff] %vm917_vm3, %v10494_v50  ;;  %946 = vst.msk [vmem:[#allocation2 + $0xd8] sm:$0xff] %vm917_vm3, %v10494_v50  ;;  %v10779_v58 = vld [vmem:[%s13849_s5 + $0x10] sm:$0xf]  ;;  %v525_v59 = vld [vmem:[%s10789_s18 + $0x8] sm:$0xff] }
  0x1d   : > { %947 = vst.msk [vmem:[#allocation2 + $0xe0] sm:$0xff] %vm917_vm3, %v10494_v50  ;;  %949 = vst.msk [vmem:[#allocation2 + $0xf0] sm:$0xff] %vm917_vm3, %v10494_v50  ;;  %v539_v60 = vld [vmem:[%s10789_s18 + $0x78] sm:$0xff]  ;;  %v10796_v62 = vld [vmem:[%s13848_s4] ss:$0 sm:$0xff] }
  0x1e   : > { %9495 = vmatmul.mubr.msk.f32.gmra.mxu0 %vm362_vm0, %v360_v8  ;;  %950 = vst.msk [vmem:[#allocation2 + $0xf8] sm:$0xff] %vm917_vm3, %v10494_v50  ;;  %952 = vst.msk [vmem:[#allocation2 + $0x108] sm:$0xff] %vm917_vm3, %v10494_v50  ;;  %v524_v63 = vld [vmem:[%s10789_s18] sm:$0xff]  ;;  %v538_v1 = vld [vmem:[%s10789_s18 + $0x70] sm:$0xff] }
  0x1f   : > { %9513 = vmatprep.mubr.msk.f32.mxu0 %vm556_vm1, %v492_v9  ;;  %953 = vst.msk [vmem:[#allocation2 + $0x110] sm:$0xff] %vm917_vm3, %v10494_v50  ;;  %955 = vst.msk [vmem:[#allocation2 + $0x120] sm:$0xff] %vm917_vm3, %v10494_v50  ;;  %v527_v5 = vld [vmem:[%s10789_s18 + $0x18] sm:$0xff]  ;;  %v541_v7 = vld [vmem:[%s10789_s18 + $0x88] sm:$0xff] }
  0x20   : > { %956 = vst.msk [vmem:[#allocation2 + $0x128] sm:$0xff] %vm917_vm3, %v10494_v50  ;;  %958 = vst.msk [vmem:[#allocation2 + $0x138] sm:$0xff] %vm917_vm3, %v10494_v50 }
  0x21   : > { %959 = vst.msk [vmem:[#allocation2 + $0x140] sm:$0xff] %vm917_vm3, %v10494_v50  ;;  %961 = vst.msk [vmem:[#allocation2 + $0x150] sm:$0xff] %vm917_vm3, %v10494_v50 }
  0x22   : > { %962 = vst.msk [vmem:[#allocation2 + $0x158] sm:$0xff] %vm917_vm3, %v10494_v50  ;;  %964 = vst.msk [vmem:[#allocation2 + $0x168] sm:$0xff] %vm917_vm3, %v10494_v50 }
  0x23   : > { %965 = vst.msk [vmem:[#allocation2 + $0x170] sm:$0xff] %vm917_vm3, %v10494_v50  ;;  %967 = vst.msk [vmem:[#allocation2 + $0x180] sm:$0xff] %vm917_vm3, %v10494_v50 }
  0x24   : > { %968 = vst.msk [vmem:[#allocation2 + $0x188] sm:$0xff] %vm917_vm3, %v10494_v50  ;;  %970 = vst.msk [vmem:[#allocation2 + $0x198] sm:$0xff] %vm917_vm3, %v10494_v50 }
  0x25   : > { %971 = vst.msk [vmem:[#allocation2 + $0x1a0] sm:$0xff] %vm917_vm3, %v10494_v50 }
  0x26   : > { %924 = vst.msk [vmem:[#allocation2 + $0x28] sm:$0x3] %vm920_vm4, %v10494_v50  ;;  %921 = vst.msk [vmem:[#allocation2 + $0x10] sm:$0x3] %vm920_vm4, %v10494_v50 }
  0x27   : > { %927 = vst.msk [vmem:[#allocation2 + $0x40] sm:$0x3] %vm920_vm4, %v10494_v50  ;;  %930 = vst.msk [vmem:[#allocation2 + $0x58] sm:$0x3] %vm920_vm4, %v10494_v50 }
  0x28   : > { %933 = vst.msk [vmem:[#allocation2 + $0x70] sm:$0x3] %vm920_vm4, %v10494_v50  ;;  %936 = vst.msk [vmem:[#allocation2 + $0x88] sm:$0x3] %vm920_vm4, %v10494_v50 }
  0x29   : > { %939 = vst.msk [vmem:[#allocation2 + $0xa0] sm:$0x3] %vm920_vm4, %v10494_v50  ;;  %942 = vst.msk [vmem:[#allocation2 + $0xb8] sm:$0x3] %vm920_vm4, %v10494_v50 }
  0x2a   : > { %945 = vst.msk [vmem:[#allocation2 + $0xd0] sm:$0x3] %vm920_vm4, %v10494_v50  ;;  %948 = vst.msk [vmem:[#allocation2 + $0xe8] sm:$0x3] %vm920_vm4, %v10494_v50 }
  0x2b   : > { %951 = vst.msk [vmem:[#allocation2 + $0x100] sm:$0x3] %vm920_vm4, %v10494_v50  ;;  %954 = vst.msk [vmem:[#allocation2 + $0x118] sm:$0x3] %vm920_vm4, %v10494_v50 }
  0x2c   : > { %957 = vst.msk [vmem:[#allocation2 + $0x130] sm:$0x3] %vm920_vm4, %v10494_v50  ;;  %960 = vst.msk [vmem:[#allocation2 + $0x148] sm:$0x3] %vm920_vm4, %v10494_v50 }
  0x2d   : > { %963 = vst.msk [vmem:[#allocation2 + $0x160] sm:$0x3] %vm920_vm4, %v10494_v50  ;;  %966 = vst.msk [vmem:[#allocation2 + $0x178] sm:$0x3] %vm920_vm4, %v10494_v50  ;;  %v1040_v54 = vld [vmem:[#allocation2 + $0x9] sm:$0xff] }
  0x2e   : > { %969 = vst.msk [vmem:[#allocation2 + $0x190] sm:$0x3] %vm920_vm4, %v10494_v50  ;;  %972 = vst.msk [vmem:[#allocation2 + $0x1a8] sm:$0x3] %vm920_vm4, %v10494_v50  ;;  %v533_v50 = vld [vmem:[%s10789_s18 + $0x48] sm:$0xff] }
  0xd2   : > { %v9487_v11 = vpop.f32.mrf.mxu0 }
  0xd4   : > { %v453_v12 = vpop.f32.mrf.mxu0 }
  0xd6   : > { %v9490_v13 = vpop.f32.mrf.mxu0 }
  0xd8   : > { %v463_v14 = vpop.f32.mrf.mxu0 }
  0xda   : > { %v9493_v15 = vpop.f32.mrf.mxu0 }
  0xdc   : > { %v473_v16 = vpop.f32.mrf.mxu0 }
  0xde   : > { %v9496_v17 = vpop.f32.mrf.mxu0 }
  0xdf   : > { %9497 = vmatprep.subr.mxu0 %v9496_v17  ;;  %10461 = vmatprep.subr.mxu1 %v9496_v17 }
  0xe0   : > { %v483_v18 = vpop.f32.mrf.mxu0  ;;  %9498 = vmatpush3.msra.mxu0 %v9496_v17  ;;  %10469 = vmatpush3.msra.mxu1 %v9496_v17 }
  0xe1   : > { %9499 = vmatprep.subr.mxu0 %v483_v18  ;;  %10462 = vmatprep.subr.mxu1 %v483_v18 }
  0xe2   : > { %9500 = vmatpush3.msra.mxu0 %v483_v18  ;;  %10470 = vmatpush3.msra.mxu1 %v483_v18 }
  0xe3   : > { %9501 = vmatprep.subr.mxu0 %v9493_v15  ;;  %10463 = vmatprep.subr.mxu1 %v9493_v15 }
  0xe4   : > { %9502 = vmatpush3.msra.mxu0 %v9493_v15  ;;  %10471 = vmatpush3.msra.mxu1 %v9493_v15  ;;  %v540_v15 = vld [vmem:[%s10789_s18 + $0x80] sm:$0xff] }
  0xe5   : > { %9503 = vmatprep.subr.mxu0 %v473_v16  ;;  %10464 = vmatprep.subr.mxu1 %v473_v16 }
  0xe6   : > { %9504 = vmatpush3.msra.mxu0 %v473_v16  ;;  %10472 = vmatpush3.msra.mxu1 %v473_v16 }
  0xe7   : > { %9505 = vmatprep.subr.mxu0 %v9490_v13  ;;  %10465 = vmatprep.subr.mxu1 %v9490_v13 }
  0xe8   : > { %9506 = vmatpush3.msra.mxu0 %v9490_v13  ;;  %10473 = vmatpush3.msra.mxu1 %v9490_v13  ;;  %v526_v13 = vld [vmem:[%s10789_s18 + $0x10] sm:$0xff] }
  0xe9   : > { %9507 = vmatprep.subr.mxu0 %v463_v14  ;;  %10466 = vmatprep.subr.mxu1 %v463_v14 }
  0xea   : > { %9508 = vmatpush3.msra.mxu0 %v463_v14  ;;  %10474 = vmatpush3.msra.mxu1 %v463_v14 }
  0xeb   : > { %9509 = vmatprep.subr.mxu0 %v9487_v11  ;;  %10467 = vmatprep.subr.mxu1 %v9487_v11 }
  0xec   : > { %9510 = vmatpush3.msra.mxu0 %v9487_v11  ;;  %10475 = vmatpush3.msra.mxu1 %v9487_v11 }
  0xed   : > { %9511 = vmatprep.subr.mxu0 %v453_v12  ;;  %10468 = vmatprep.subr.mxu1 %v453_v12 }
  0xee   : > { %9512 = vmatpush3.msra.mxu0 %v453_v12  ;;  %10476 = vmatpush3.msra.mxu1 %v453_v12 }
  0xef   : > { %9514 = vmatmul.mubr.msk.f32.vlgmr.msra.gmra.mxu0 %vm556_vm1, %v493_v19  ;;  %9535 = vmatmul.mubr.msk.f32.vlgmr.msra.gmra.mxu1 %vm556_vm1, %v507_v20 }
  0xf0   : > { %9516 = vmatprep.mubr.msk.f32.mxu0 %vm556_vm1, %v494_v21  ;;  %9537 = vmatprep.mubr.msk.f32.mxu1 %vm556_vm1, %v508_v22  ;;  %v529_v21 = vld [vmem:[%s10789_s18 + $0x28] sm:$0xff] }
  0xf1   : > { %9561 = vmatprep.subr.msk.mxu0 %vm1169_vm2, %v8223_v23  ;;  %9611 = vmatprep.subr.msk.mxu1 %vm1169_vm2, %v1038_v51 }
  0xf2   : > { %9562 = vmatpush3.msk.msra.mxu0 %vm1169_vm2, %v8223_v23  ;;  %9612 = vmatpush3.msk.msra.mxu1 %vm1169_vm2, %v1038_v51  ;;  %v543_v23 = vld [vmem:[%s10789_s18 + $0x98] sm:$0xff] }
  0xf3   : > { %9517 = vmatmul.mubr.msk.f32.gmra.mxu0 %vm556_vm1, %v495_v24  ;;  %9538 = vmatmul.mubr.msk.f32.gmra.mxu1 %vm556_vm1, %v509_v25 }
  0xf4   : > { %9519 = vmatprep.mubr.msk.f32.mxu0 %vm556_vm1, %v496_v26  ;;  %9540 = vmatprep.mubr.msk.f32.mxu1 %vm556_vm1, %v510_v27 }
  0xf5   : > { %9661 = vmatprep.subr.msk.mxu0 %vm1169_vm2, %v8290_v56  ;;  %9711 = vmatprep.subr.msk.mxu1 %vm1169_vm2, %v8324_v57 }
  0xf7   : > { %9520 = vmatmul.mubr.msk.f32.gmra.mxu0 %vm556_vm1, %v497_v28  ;;  %9541 = vmatmul.mubr.msk.f32.gmra.mxu1 %vm556_vm1, %v511_v29  ;;  %v528_v29 = vld [vmem:[%s10789_s18 + $0x20] sm:$0xff] }
  0xf8   : > { %9522 = vmatprep.mubr.msk.f32.mxu0 %vm556_vm1, %v498_v30  ;;  %9543 = vmatprep.mubr.msk.f32.mxu1 %vm556_vm1, %v512_v31  ;;  %v542_v31 = vld [vmem:[%s10789_s18 + $0x90] sm:$0xff] }
  0xfb   : > { %9523 = vmatmul.mubr.msk.f32.gmra.mxu0 %vm556_vm1, %v499_v32  ;;  %9544 = vmatmul.mubr.msk.f32.gmra.mxu1 %vm556_vm1, %v513_v33 }
  0xfc   : > { %9525 = vmatprep.mubr.msk.f32.mxu0 %vm556_vm1, %v500_v34  ;;  %9546 = vmatprep.mubr.msk.f32.mxu1 %vm556_vm1, %v514_v35 }
  0xff   : > { %9526 = vmatmul.mubr.msk.f32.gmra.mxu0 %vm556_vm1, %v501_v36  ;;  %9547 = vmatmul.mubr.msk.f32.gmra.mxu1 %vm556_vm1, %v515_v37  ;;  %v10825_v36 = vld [vmem:[%s13849_s5 + $0x14] sm:$0xf] }
 0x100   : > { %9528 = vmatprep.mubr.msk.f32.mxu0 %vm556_vm1, %v502_v38  ;;  %9549 = vmatprep.mubr.msk.f32.mxu1 %vm556_vm1, %v516_v39  ;;  %v531_v38 = vld [vmem:[%s10789_s18 + $0x38] sm:$0xff] }
 0x103   : > { %9529 = vmatmul.mubr.msk.f32.gmra.mxu0 %vm556_vm1, %v503_v40  ;;  %9550 = vmatmul.mubr.msk.f32.gmra.mxu1 %vm556_vm1, %v517_v41  ;;  %v545_v40 = vld [vmem:[%s10789_s18 + $0xa8] sm:$0xff] }
 0x104   : > { %9531 = vmatprep.mubr.msk.f32.mxu0 %vm556_vm1, %v504_v42  ;;  %9552 = vmatprep.mubr.msk.f32.mxu1 %vm556_vm1, %v518_v43 }
 0x107   : > { %9532 = vmatmul.mubr.msk.f32.gmra.mxu0 %vm556_vm1, %v505_v44  ;;  %9553 = vmatmul.mubr.msk.f32.gmra.mxu1 %vm556_vm1, %v519_v45 }
 0x108   : > { %9555 = vmatprep.mubr.msk.f32.mxu1 %vm556_vm1, %v520_v46  ;;  %9563 = vmatprep.mubr.msk.f32.mxu0 %vm917_vm3, %v1039_v52  ;;  %v530_v46 = vld [vmem:[%s10789_s18 + $0x30] sm:$0xff] }
 0x10b   : > { %9556 = vmatmul.mubr.msk.f32.gmra.mxu1 %vm556_vm1, %v521_v47  ;;  %9564 = vmatmul.mubr.msk.f32.vlgmr.msra.gmra.mxu0 %vm917_vm3, %v1040_v54  ;;  %v547_v54 = vld [vmem:[%s10789_s18 + $0xb8] sm:$0xff] }
 0x10c   : > { %9558 = vmatprep.mubr.msk.f32.mxu1 %vm556_vm1, %v522_v48  ;;  %9662 = vmatpush3.msk.msra.mxu0 %vm1169_vm2, %v8290_v56 }
 0x10d   : > { %9761 = vmatprep.subr.msk.mxu0 %vm1169_vm2, %v10779_v58 }
 0x10f   : > { %9559 = vmatmul.mubr.msk.f32.gmra.mxu1 %vm556_vm1, %v523_v49 }
 0x110   : > { %9613 = vmatprep.mubr.msk.f32.mxu1 %vm917_vm3, %v1006_v53  ;;  %v544_v53 = vld [vmem:[%s10789_s18 + $0xa0] sm:$0xff] }
 0x113   : > { %9614 = vmatmul.mubr.msk.f32.vlgmr.msra.gmra.mxu1 %vm917_vm3, %v1007_v55 }
 0x114   : > { %9712 = vmatpush3.msk.msra.mxu1 %vm1169_vm2, %v8324_v57 }
 0x115   : > { %9811 = vmatprep.subr.msk.mxu1 %vm1169_vm2, %v10825_v36 }
 0x1af   : > { %v9515_v61 = vpop.f32.mrf.mxu0  ;;  %v9536_v0 = vpop.f32.mrf.mxu1 }
 0x1b0   : > { %v725_v2 = vadd.f32 %v9515_v61, %v525_v59  ;;  %v795_v3 = vadd.f32 %v9536_v0, %v539_v60 }
 0x1b1   : > { %v719_v4 = vpop.f32.mrf.mxu0  ;;  %v789_v6 = vpop.f32.mrf.mxu1 }
 0x1b2   : > { %v886_v8 = vadd.f32 %v10796_v62, %v725_v2  ;;  %v720_v9 = vadd.f32 %v719_v4, %v524_v63  ;;  %v900_v10 = vadd.f32 %v10796_v62, %v795_v3  ;;  %v790_v11 = vadd.f32 %v789_v6, %v538_v1  ;;  %v532_v3 = vld [vmem:[%s10789_s18 + $0x40] sm:$0xff] }
 0x1b3   : > { %v9518_v12 = vpop.f32.mrf.mxu0  ;;  %v9539_v14 = vpop.f32.mrf.mxu1 }
 0x1b4   : > { %975 = vst.msk [vmem:[#allocation2 + $0x21] sm:$0xff] %vm917_vm3, %v886_v8  ;;  %v885_v16 = vadd.f32 %v10796_v62, %v720_v9  ;;  %v735_v17 = vadd.f32 %v9518_v12, %v527_v5  ;;  %989 = vst.msk [vmem:[#allocation2 + $0xc9] sm:$0xff] %vm917_vm3, %v900_v10  ;;  %v899_v18 = vadd.f32 %v10796_v62, %v790_v11  ;;  %v535_v8 = vld [vmem:[%s10789_s18 + $0x58] sm:$0xff]  ;;  %v546_v10 = vld [vmem:[%s10789_s18 + $0xb0] sm:$0xff] }
 0x1b5   : > { %v805_v19 = vadd.f32 %v9539_v14, %v541_v7  ;;  %v729_v20 = vpop.f32.mrf.mxu0  ;;  %v799_v22 = vpop.f32.mrf.mxu1  ;;  %v549_v11 = vld [vmem:[%s10789_s18 + $0xc8] sm:$0xff] }
 0x1b6   : > { %974 = vst.msk [vmem:[#allocation2 + $0x19] sm:$0xff] %vm917_vm3, %v885_v16  ;;  %v888_v24 = vadd.f32 %v10796_v62, %v735_v17  ;;  %v730_v25 = vadd.f32 %v729_v20, %v526_v13  ;;  %988 = vst.msk [vmem:[#allocation2 + $0xc1] sm:$0xff] %vm917_vm3, %v899_v18  ;;  %v800_v27 = vadd.f32 %v799_v22, %v540_v15 }
 0x1b7   : > { %v902_v26 = vadd.f32 %v10796_v62, %v805_v19  ;;  %v9521_v28 = vpop.f32.mrf.mxu0  ;;  %v9542_v30 = vpop.f32.mrf.mxu1 }
 0x1b8   : > { %977 = vst.msk [vmem:[#allocation2 + $0x39] sm:$0xff] %vm917_vm3, %v888_v24  ;;  %v887_v32 = vadd.f32 %v10796_v62, %v730_v25  ;;  %v745_v33 = vadd.f32 %v9521_v28, %v529_v21  ;;  %v901_v34 = vadd.f32 %v10796_v62, %v800_v27  ;;  %v815_v35 = vadd.f32 %v9542_v30, %v543_v23  ;;  %v534_v23 = vld [vmem:[%s10789_s18 + $0x50] sm:$0xff]  ;;  %v537_v28 = vld [vmem:[%s10789_s18 + $0x68] sm:$0xff]  ;;  %v548_v30 = vld [vmem:[%s10789_s18 + $0xc0] sm:$0xff] }
 0x1b9   : > { %991 = vst.msk [vmem:[#allocation2 + $0xe1] sm:$0xff] %vm917_vm3, %v902_v26  ;;  %v739_v37 = vpop.f32.mrf.mxu0  ;;  %v809_v39 = vpop.f32.mrf.mxu1 }
 0x1ba   : > { %976 = vst.msk [vmem:[#allocation2 + $0x31] sm:$0xff] %vm917_vm3, %v887_v32  ;;  %v890_v41 = vadd.f32 %v10796_v62, %v745_v33  ;;  %v740_v42 = vadd.f32 %v739_v37, %v528_v29  ;;  %990 = vst.msk [vmem:[#allocation2 + $0xd9] sm:$0xff] %vm917_vm3, %v901_v34  ;;  %v904_v43 = vadd.f32 %v10796_v62, %v815_v35 }
 0x1bb   : > { %v810_v44 = vadd.f32 %v809_v39, %v542_v31  ;;  %v9524_v45 = vpop.f32.mrf.mxu0  ;;  %v9545_v47 = vpop.f32.mrf.mxu1  ;;  %v10855_v0 = vld [vmem:[#allocation2 + $0x21] sm:$0xff]  ;;  %v551_v31 = vld [vmem:[%s10789_s18 + $0xd8] sm:$0xff] }
 0x1bc   : > { %979 = vst.msk [vmem:[#allocation2 + $0x51] sm:$0xff] %vm917_vm3, %v890_v41  ;;  %v889_v48 = vadd.f32 %v10796_v62, %v740_v42  ;;  %v755_v49 = vadd.f32 %v9524_v45, %v531_v38  ;;  %993 = vst.msk [vmem:[#allocation2 + $0xf9] sm:$0xff] %vm917_vm3, %v904_v43  ;;  %v825_v52 = vadd.f32 %v9545_v47, %v545_v40 }
 0x1bd   : > { %v903_v51 = vadd.f32 %v10796_v62, %v810_v44  ;;  %v749_v55 = vpop.f32.mrf.mxu0  ;;  %v10843_v56 = vld [vmem:[#allocation2 + $0x19] sm:$0xff]  ;;  %v819_v60 = vpop.f32.mrf.mxu1 }
 0x1be   : > { %v10845_v57 = vld [vmem:[#allocation2 + $0x18] sm:$0xff]  ;;  %v10847_v59 = vld [vmem:[#allocation2 + $0x20] sm:$0xff]  ;;  %978 = vst.msk [vmem:[#allocation2 + $0x49] sm:$0xff] %vm917_vm3, %v889_v48  ;;  %v892_v61 = vadd.f32 %v10796_v62, %v755_v49  ;;  %v750_v63 = vadd.f32 %v749_v55, %v530_v46  ;;  %9566 = vmatprep.mubr.msk.f32.mxu0 %vm917_vm3, %v10843_v56  ;;  %v906_v1 = vadd.f32 %v10796_v62, %v825_v52 }
 0x1bf   : > { %9616 = vmatprep.mubr.msk.f32.mxu1 %vm917_vm3, %v10845_v57  ;;  %992 = vst.msk [vmem:[#allocation2 + $0xf1] sm:$0xff] %vm917_vm3, %v903_v51  ;;  %v9527_v2 = vpop.f32.mrf.mxu0  ;;  %9567 = vmatmul.mubr.msk.f32.gmra.mxu0 %vm917_vm3, %v10855_v0  ;;  %v820_v4 = vadd.f32 %v819_v60, %v544_v53  ;;  %v9548_v5 = vpop.f32.mrf.mxu1  ;;  %v10883_v20 = vld [vmem:[#allocation2 + $0x39] sm:$0xff]  ;;  %v553_v51 = vld [vmem:[%s10789_s18 + $0xe8] sm:$0xff] }
 0x1c0   : > { %9617 = vmatmul.mubr.msk.f32.gmra.mxu1 %vm917_vm3, %v10847_v59  ;;  %981 = vst.msk [vmem:[#allocation2 + $0x69] sm:$0xff] %vm917_vm3, %v892_v61  ;;  %v891_v6 = vadd.f32 %v10796_v62, %v750_v63  ;;  %v765_v7 = vadd.f32 %v9527_v2, %v533_v50  ;;  %995 = vst.msk [vmem:[#allocation2 + $0x111] sm:$0xff] %vm917_vm3, %v906_v1  ;;  %v835_v9 = vadd.f32 %v9548_v5, %v547_v54  ;;  %v536_v44 = vld [vmem:[%s10789_s18 + $0x60] sm:$0xff]  ;;  %v550_v50 = vld [vmem:[%s10789_s18 + $0xd0] sm:$0xff] }
 0x1c1   : > { %v759_v12 = vpop.f32.mrf.mxu0  ;;  %v10870_v13 = vld [vmem:[#allocation2 + $0x31] sm:$0xff]  ;;  %v905_v16 = vadd.f32 %v10796_v62, %v820_v4  ;;  %v829_v17 = vpop.f32.mrf.mxu1 }
 0x1c2   : > { %v10872_v14 = vld [vmem:[#allocation2 + $0x30] sm:$0xff]  ;;  %v10874_v15 = vld [vmem:[#allocation2 + $0x38] sm:$0xff]  ;;  %980 = vst.msk [vmem:[#allocation2 + $0x61] sm:$0xff] %vm917_vm3, %v891_v6  ;;  %v894_v18 = vadd.f32 %v10796_v62, %v765_v7  ;;  %v760_v19 = vadd.f32 %v759_v12, %v532_v3  ;;  %9569 = vmatprep.mubr.msk.f32.mxu0 %vm917_vm3, %v10870_v13  ;;  %v908_v21 = vadd.f32 %v10796_v62, %v835_v9  ;;  %v552_v6 = vld [vmem:[%s10789_s18 + $0xe0] sm:$0xff] }
 0x1c3   : > { %9619 = vmatprep.mubr.msk.f32.mxu1 %vm917_vm3, %v10872_v14  ;;  %v9530_v22 = vpop.f32.mrf.mxu0  ;;  %9570 = vmatmul.mubr.msk.f32.gmra.mxu0 %vm917_vm3, %v10883_v20  ;;  %994 = vst.msk [vmem:[#allocation2 + $0x109] sm:$0xff] %vm917_vm3, %v905_v16  ;;  %v830_v24 = vadd.f32 %v829_v17, %v546_v10  ;;  %v9551_v25 = vpop.f32.mrf.mxu1  ;;  %v10911_v41 = vld [vmem:[#allocation2 + $0x51] sm:$0xff] }
 0x1c4   : > { %9620 = vmatmul.mubr.msk.f32.gmra.mxu1 %vm917_vm3, %v10874_v15  ;;  %983 = vst.msk [vmem:[#allocation2 + $0x81] sm:$0xff] %vm917_vm3, %v894_v18  ;;  %v893_v26 = vadd.f32 %v10796_v62, %v760_v19  ;;  %v775_v27 = vadd.f32 %v9530_v22, %v535_v8  ;;  %997 = vst.msk [vmem:[#allocation2 + $0x129] sm:$0xff] %vm917_vm3, %v908_v21  ;;  %v845_v29 = vadd.f32 %v9551_v25, %v549_v11  ;;  %v555_v9 = vld [vmem:[%s10789_s18 + $0xf8] sm:$0xff] }
 0x1c5   : > { %v769_v32 = vpop.f32.mrf.mxu0  ;;  %v10898_v33 = vld [vmem:[#allocation2 + $0x49] sm:$0xff]  ;;  %v907_v37 = vadd.f32 %v10796_v62, %v830_v24  ;;  %v839_v38 = vpop.f32.mrf.mxu1 }
 0x1c6   : > { %v10900_v34 = vld [vmem:[#allocation2 + $0x48] sm:$0xff]  ;;  %v10902_v35 = vld [vmem:[#allocation2 + $0x50] sm:$0xff]  ;;  %982 = vst.msk [vmem:[#allocation2 + $0x79] sm:$0xff] %vm917_vm3, %v893_v26  ;;  %v896_v39 = vadd.f32 %v10796_v62, %v775_v27  ;;  %v770_v40 = vadd.f32 %v769_v32, %v534_v23  ;;  %9572 = vmatprep.mubr.msk.f32.mxu0 %vm917_vm3, %v10898_v33  ;;  %v910_v42 = vadd.f32 %v10796_v62, %v845_v29 }
 0x1c7   : > { %13920 = vst [vmem:[#allocation3_spill] sm:$0xff] %v10902_v35  ;;  %9622 = vmatprep.mubr.msk.f32.mxu1 %vm917_vm3, %v10900_v34  ;;  %v9533_v43 = vpop.f32.mrf.mxu0  ;;  %9573 = vmatmul.mubr.msk.f32.gmra.mxu0 %vm917_vm3, %v10911_v41  ;;  %996 = vst.msk [vmem:[#allocation2 + $0x121] sm:$0xff] %vm917_vm3, %v907_v37  ;;  %v840_v45 = vadd.f32 %v839_v38, %v548_v30  ;;  %v9554_v46 = vpop.f32.mrf.mxu1  ;;  %v10938_v2 = vld [vmem:[#allocation2 + $0x69] sm:$0xff]  ;;  %v10992_v37 = vld [vmem:[#allocation2 + $0xc1] sm:$0xff] }
 0x1c8   : > { %9623 = vmatmul.mubr.msk.f32.gmra.mxu1 %vm917_vm3, %v10902_v35  ;;  %985 = vst.msk [vmem:[#allocation2 + $0x99] sm:$0xff] %vm917_vm3, %v896_v39  ;;  %v895_v47 = vadd.f32 %v10796_v62, %v770_v40  ;;  %v785_v48 = vadd.f32 %v9533_v43, %v537_v28  ;;  %999 = vst.msk [vmem:[#allocation2 + $0x141] sm:$0xff] %vm917_vm3, %v910_v42  ;;  %v855_v49 = vadd.f32 %v9554_v46, %v551_v31  ;;  %v554_v23 = vld [vmem:[%s10789_s18 + $0xf0] sm:$0xff]  ;;  %v10994_v38 = vld [vmem:[#allocation2 + $0xc0] sm:$0xff] }
 0x1c9   : > { %v779_v52 = vpop.f32.mrf.mxu0  ;;  %v10925_v53 = vld [vmem:[#allocation2 + $0x61] sm:$0xff]  ;;  %v909_v60 = vadd.f32 %v10796_v62, %v840_v45  ;;  %v849_v61 = vpop.f32.mrf.mxu1  ;;  %13927 = vst [vmem:[#allocation10_spill] sm:$0xff] %v10994_v38  ;;  %v11021_v45 = vld [vmem:[#allocation2 + $0xd8] sm:$0xff]  ;;  %v11023_v46 = vld [vmem:[#allocation2 + $0xc9] sm:$0xff] }
 0x1ca   : > { %v10927_v54 = vld [vmem:[#allocation2 + $0x60] sm:$0xff]  ;;  %v10929_v55 = vld [vmem:[#allocation2 + $0x68] sm:$0xff]  ;;  %984 = vst.msk [vmem:[#allocation2 + $0x91] sm:$0xff] %vm917_vm3, %v895_v47  ;;  %v898_v63 = vadd.f32 %v10796_v62, %v785_v48  ;;  %v780_v1 = vadd.f32 %v779_v52, %v536_v44  ;;  %9575 = vmatprep.mubr.msk.f32.mxu0 %vm917_vm3, %v10925_v53  ;;  %v912_v3 = vadd.f32 %v10796_v62, %v855_v49  ;;  %13930 = vst [vmem:[#allocation13_spill] sm:$0xff] %v11021_v45 }
 0x1cb   : > { %13921 = vst [vmem:[#allocation4_spill] sm:$0xff] %v10927_v54  ;;  %13922 = vst [vmem:[#allocation5_spill] sm:$0xff] %v10929_v55  ;;  %9625 = vmatprep.mubr.msk.f32.mxu1 %vm917_vm3, %v10927_v54  ;;  %9576 = vmatmul.mubr.msk.f32.gmra.mxu0 %vm917_vm3, %v10938_v2  ;;  %v850_v4 = vadd.f32 %v849_v61, %v550_v50  ;;  %v9557_v5 = vpop.f32.mrf.mxu1  ;;  %v10963_v18 = vld [vmem:[#allocation2 + $0x81] sm:$0xff]  ;;  %v11035_v48 = vld [vmem:[#allocation2 + $0xf1] sm:$0xff] }
 0x1cc   : > { %9626 = vmatmul.mubr.msk.f32.gmra.mxu1 %vm917_vm3, %v10929_v55  ;;  %998 = vst.msk [vmem:[#allocation2 + $0x139] sm:$0xff] %vm917_vm3, %v909_v60  ;;  %987 = vst.msk [vmem:[#allocation2 + $0xb1] sm:$0xff] %vm917_vm3, %v898_v63  ;;  %v897_v7 = vadd.f32 %v10796_v62, %v780_v1  ;;  %v865_v8 = vadd.f32 %v9557_v5, %v553_v51  ;;  %v11025_v47 = vld [vmem:[#allocation2 + $0xc8] sm:$0xff]  ;;  %v11037_v49 = vld [vmem:[#allocation2 + $0xf0] sm:$0xff] }
 0x1cd   : > { %1001 = vst.msk [vmem:[#allocation2 + $0x159] sm:$0xff] %vm917_vm3, %v912_v3  ;;  %v10951_v10 = vld [vmem:[#allocation2 + $0x79] sm:$0xff]  ;;  %v911_v16 = vadd.f32 %v10796_v62, %v850_v4  ;;  %v859_v17 = vpop.f32.mrf.mxu1  ;;  %13931 = vst [vmem:[#allocation14_spill] sm:$0xff] %v11025_v47  ;;  %v11039_v50 = vld [vmem:[#allocation2 + $0xe1] sm:$0xff] }
 0x1ce   : > { %v10953_v11 = vld [vmem:[#allocation2 + $0x78] sm:$0xff]  ;;  %v10955_v12 = vld [vmem:[#allocation2 + $0x80] sm:$0xff]  ;;  %986 = vst.msk [vmem:[#allocation2 + $0xa9] sm:$0xff] %vm917_vm3, %v897_v7  ;;  %9578 = vmatprep.mubr.msk.f32.mxu0 %vm917_vm3, %v10951_v10  ;;  %v914_v19 = vadd.f32 %v10796_v62, %v865_v8  ;;  %v860_v21 = vadd.f32 %v859_v17, %v552_v6  ;;  %13932 = vst [vmem:[#allocation15_spill] sm:$0xff] %v11037_v49 }
 0x1cf   : > { %13923 = vst [vmem:[#allocation6_spill] sm:$0xff] %v10953_v11  ;;  %13924 = vst [vmem:[#allocation7_spill] sm:$0xff] %v10955_v12  ;;  %9628 = vmatprep.mubr.msk.f32.mxu1 %vm917_vm3, %v10953_v11  ;;  %9579 = vmatmul.mubr.msk.f32.gmra.mxu0 %vm917_vm3, %v10963_v18  ;;  %v9560_v22 = vpop.f32.mrf.mxu1  ;;  %v10984_v30 = vld [vmem:[#allocation2 + $0x99] sm:$0xff]  ;;  %v11051_v52 = vld [vmem:[#allocation2 + $0x109] sm:$0xff] }
 0x1d0   : > { %9629 = vmatmul.mubr.msk.f32.gmra.mxu1 %vm917_vm3, %v10955_v12  ;;  %1000 = vst.msk [vmem:[#allocation2 + $0x151] sm:$0xff] %vm917_vm3, %v911_v16  ;;  %1003 = vst.msk [vmem:[#allocation2 + $0x171] sm:$0xff] %vm917_vm3, %v914_v19  ;;  %v913_v24 = vadd.f32 %v10796_v62, %v860_v21  ;;  %v875_v25 = vadd.f32 %v9560_v22, %v555_v9  ;;  %v11041_v51 = vld [vmem:[#allocation2 + $0xe0] sm:$0xff]  ;;  %v11053_v60 = vld [vmem:[#allocation2 + $0x108] sm:$0xff] }
 0x1d1   : > { %v10974_v26 = vld [vmem:[#allocation2 + $0x91] sm:$0xff]  ;;  %v869_v29 = vpop.f32.mrf.mxu1  ;;  %13933 = vst [vmem:[#allocation16_spill] sm:$0xff] %v11041_v51  ;;  %13934 = vst [vmem:[#allocation17_spill] sm:$0xff] %v11053_v60  ;;  %v11055_v61 = vld [vmem:[#allocation2 + $0xf9] sm:$0xff] }
 0x1d2   : > { %v10976_v27 = vld [vmem:[#allocation2 + $0x90] sm:$0xff]  ;;  %v10978_v28 = vld [vmem:[#allocation2 + $0x98] sm:$0xff]  ;;  %9581 = vmatprep.mubr.msk.f32.mxu0 %vm917_vm3, %v10974_v26  ;;  %1002 = vst.msk [vmem:[#allocation2 + $0x169] sm:$0xff] %vm917_vm3, %v913_v24  ;;  %v916_v31 = vadd.f32 %v10796_v62, %v875_v25  ;;  %v870_v32 = vadd.f32 %v869_v29, %v554_v23  ;;  %v11067_v1 = vld [vmem:[#allocation2 + $0x121] sm:$0xff] }
 0x1d3   : > { %13925 = vst [vmem:[#allocation8_spill] sm:$0xff] %v10976_v27  ;;  %13926 = vst [vmem:[#allocation9_spill] sm:$0xff] %v10978_v28  ;;  %9631 = vmatprep.mubr.msk.f32.mxu1 %vm917_vm3, %v10976_v27  ;;  %9582 = vmatmul.mubr.msk.f32.gmra.mxu0 %vm917_vm3, %v10984_v30  ;;  %v11008_v44 = vld [vmem:[#allocation2 + $0xb1] sm:$0xff]  ;;  %v11069_v3 = vld [vmem:[#allocation2 + $0x120] sm:$0xff] }
 0x1d4   : > { %9632 = vmatmul.mubr.msk.f32.gmra.mxu1 %vm917_vm3, %v10978_v28  ;;  %1005 = vst.msk [vmem:[#allocation2 + $0x189] sm:$0xff] %vm917_vm3, %v916_v31  ;;  %v915_v39 = vadd.f32 %v10796_v62, %v870_v32  ;;  %v11019_v62 = vld [vmem:[#allocation2 + $0xd9] sm:$0xff]  ;;  %13936 = vst [vmem:[#allocation19_spill] sm:$0xff] %v11069_v3  ;;  %v11071_v4 = vld [vmem:[#allocation2 + $0x111] sm:$0xff] }
 0x1d5   : > { %v10998_v40 = vld [vmem:[#allocation2 + $0xa9] sm:$0xff]  ;;  %v11057_v63 = vld [vmem:[#allocation2 + $0xf8] sm:$0xff]  ;;  %v11103_v19 = vld [vmem:[#allocation2 + $0x141] sm:$0xff] }
 0x1d6   : > { %v11000_v42 = vld [vmem:[#allocation2 + $0xa8] sm:$0xff]  ;;  %v11002_v43 = vld [vmem:[#allocation2 + $0xb0] sm:$0xff]  ;;  %9584 = vmatprep.mubr.msk.f32.mxu0 %vm917_vm3, %v10998_v40  ;;  %1004 = vst.msk [vmem:[#allocation2 + $0x181] sm:$0xff] %vm917_vm3, %v915_v39  ;;  %13935 = vst [vmem:[#allocation18_spill] sm:$0xff] %v11057_v63 }
 0x1d7   : > { %13928 = vst [vmem:[#allocation11_spill] sm:$0xff] %v11000_v42  ;;  %13929 = vst [vmem:[#allocation12_spill] sm:$0xff] %v11002_v43  ;;  %9634 = vmatprep.mubr.msk.f32.mxu1 %vm917_vm3, %v11000_v42  ;;  %9585 = vmatmul.mubr.msk.f32.gmra.mxu0 %vm917_vm3, %v11008_v44  ;;  %v11073_v5 = vld [vmem:[#allocation2 + $0x110] sm:$0xff]  ;;  %v11083_v6 = vld [vmem:[#allocation2 + $0x139] sm:$0xff] }
 0x1d8   : > { %9635 = vmatmul.mubr.msk.f32.gmra.mxu1 %vm917_vm3, %v11002_v43  ;;  %9587 = vmatprep.mubr.msk.f32.mxu0 %vm917_vm3, %v10992_v37  ;;  %13937 = vst [vmem:[#allocation20_spill] sm:$0xff] %v11073_v5  ;;  %v11085_v7 = vld [vmem:[#allocation2 + $0x138] sm:$0xff]  ;;  %v11087_v8 = vld [vmem:[#allocation2 + $0x129] sm:$0xff]  ;;  %v11105_v21 = vld [vmem:[#allocation2 + $0x140] sm:$0xff] }
 0x1d9   : > { %9637 = vmatprep.mubr.msk.f32.mxu1 %vm917_vm3, %v10994_v38  ;;  %13938 = vst [vmem:[#allocation21_spill] sm:$0xff] %v11085_v7  ;;  %v11089_v9 = vld [vmem:[#allocation2 + $0x128] sm:$0xff]  ;;  %v11099_v16 = vld [vmem:[#allocation2 + $0x151] sm:$0xff]  ;;  %13942 = vst [vmem:[#allocation25_spill] sm:$0xff] %v11105_v21 }
 0x1da   : > { %13939 = vst [vmem:[#allocation22_spill] sm:$0xff] %v11089_v9  ;;  %13940 = vst [vmem:[#allocation23_spill] sm:$0xff] %v11099_v16  ;;  %v11101_v17 = vld [vmem:[#allocation2 + $0x150] sm:$0xff]  ;;  %v11117_v23 = vld [vmem:[#allocation2 + $0x168] sm:$0xff] }
 0x1db   : > { %9588 = vmatmul.mubr.msk.f32.gmra.mxu0 %vm917_vm3, %v11023_v46  ;;  %13941 = vst [vmem:[#allocation24_spill] sm:$0xff] %v11101_v17  ;;  %v11115_v22 = vld [vmem:[#allocation2 + $0x169] sm:$0xff]  ;;  %13944 = vst [vmem:[#allocation27_spill] sm:$0xff] %v11117_v23  ;;  %v11119_v24 = vld [vmem:[#allocation2 + $0x159] sm:$0xff] }
 0x1dc   : > { %9638 = vmatmul.mubr.msk.f32.gmra.mxu1 %vm917_vm3, %v11025_v47  ;;  %9590 = vmatprep.mubr.msk.f32.mxu0 %vm917_vm3, %v11019_v62  ;;  %13943 = vst [vmem:[#allocation26_spill] sm:$0xff] %v11115_v22  ;;  %13945 = vst [vmem:[#allocation28_spill] sm:$0xff] %v11119_v24  ;;  %v11121_v25 = vld [vmem:[#allocation2 + $0x158] sm:$0xff]  ;;  %v1722_v29 = vld [vmem:[#allocation2 + $0x2] sm:$0xff] }
 0x1dd   : > { %9640 = vmatprep.mubr.msk.f32.mxu1 %vm917_vm3, %v11021_v45  ;;  %13946 = vst [vmem:[#allocation29_spill] sm:$0xff] %v11121_v25  ;;  %v11131_v31 = vld [vmem:[#allocation2 + $0x171] sm:$0xff] }
 0x1de   : > { %13947 = vst [vmem:[#allocation30_spill] sm:$0xff] %v11131_v31  ;;  %v11133_v32 = vld [vmem:[#allocation2 + $0x170] sm:$0xff] }
 0x1df   : > { %9591 = vmatmul.mubr.msk.f32.gmra.mxu0 %vm917_vm3, %v11039_v50  ;;  %v1723_v39 = vld [vmem:[#allocation2 + $0xa] sm:$0xff] }
 0x1e0   : > { %9641 = vmatmul.mubr.msk.f32.gmra.mxu1 %vm917_vm3, %v11041_v51  ;;  %9593 = vmatprep.mubr.msk.f32.mxu0 %vm917_vm3, %v11035_v48 }
 0x1e1   : > { %9643 = vmatprep.mubr.msk.f32.mxu1 %vm917_vm3, %v11037_v49 }
 0x1e3   : > { %9594 = vmatmul.mubr.msk.f32.gmra.mxu0 %vm917_vm3, %v11055_v61 }
 0x1e4   : > { %9644 = vmatmul.mubr.msk.f32.gmra.mxu1 %vm917_vm3, %v11057_v63  ;;  %9596 = vmatprep.mubr.msk.f32.mxu0 %vm917_vm3, %v11051_v52 }
 0x1e5   : > { %9646 = vmatprep.mubr.msk.f32.mxu1 %vm917_vm3, %v11053_v60 }
 0x1e7   : > { %9597 = vmatmul.mubr.msk.f32.gmra.mxu0 %vm917_vm3, %v11071_v4 }
 0x1e8   : > { %9647 = vmatmul.mubr.msk.f32.gmra.mxu1 %vm917_vm3, %v11073_v5  ;;  %9599 = vmatprep.mubr.msk.f32.mxu0 %vm917_vm3, %v11067_v1 }
 0x1e9   : > { %9649 = vmatprep.mubr.msk.f32.mxu1 %vm917_vm3, %v11069_v3 }
 0x1eb   : > { %9600 = vmatmul.mubr.msk.f32.gmra.mxu0 %vm917_vm3, %v11087_v8 }
 0x1ec   : > { %9650 = vmatmul.mubr.msk.f32.gmra.mxu1 %vm917_vm3, %v11089_v9  ;;  %9602 = vmatprep.mubr.msk.f32.mxu0 %vm917_vm3, %v11083_v6 }
 0x1ed   : > { %9652 = vmatprep.mubr.msk.f32.mxu1 %vm917_vm3, %v11085_v7 }
 0x1ef   : > { %9603 = vmatmul.mubr.msk.f32.gmra.mxu0 %vm917_vm3, %v11103_v19 }
 0x1f0   : > { %9653 = vmatmul.mubr.msk.f32.gmra.mxu1 %vm917_vm3, %v11105_v21  ;;  %9605 = vmatprep.mubr.msk.f32.mxu0 %vm917_vm3, %v11099_v16  ;;  %v11145_v16 = vld [vmem:[#allocation2 + $0x1a] sm:$0xff] }
 0x1f1   : > { %9655 = vmatprep.mubr.msk.f32.mxu1 %vm917_vm3, %v11101_v17 }
 0x1f3   : > { %9606 = vmatmul.mubr.msk.f32.gmra.mxu0 %vm917_vm3, %v11119_v24  ;;  %v9615_v24 = vpop.f32.mrf.mxu1 }
 0x1f4   : > { %9656 = vmatmul.mubr.msk.f32.gmra.mxu1 %vm917_vm3, %v11121_v25  ;;  %9608 = vmatprep.mubr.msk.f32.mxu0 %vm917_vm3, %v11115_v22  ;;  %v9565_v22 = vpop.f32.mrf.mxu0 }
 0x1f5   : > { %9658 = vmatprep.mubr.msk.f32.mxu1 %vm917_vm3, %v11117_v23 }
 0x1f7   : > { %9609 = vmatmul.mubr.msk.f32.gmra.mxu0 %vm917_vm3, %v11131_v31  ;;  %v11150_v31 = vld [vmem:[%s13849_s5 + $0x18] sm:$0xf] }
 0x1f8   : > { %9659 = vmatmul.mubr.msk.f32.gmra.mxu1 %vm917_vm3, %v11133_v32  ;;  %9663 = vmatprep.mubr.msk.f32.mxu0 %vm917_vm3, %v1722_v29  ;;  %v11157_v29 = vadd.f32 %v9615_v24, %v9565_v22  ;;  %v11177_v22 = vld [vmem:[#allocation2 + $0x32] sm:$0xff] }
 0x1f9   : > { %9713 = vmatprep.mubr.msk.f32.mxu1 %vm917_vm3, %v10845_v57  ;;  %v11155_v57 = vld [vmem:[%s13849_s5 + $0x1c] sm:$0xf]  ;;  %v11195_v24 = vld [vmem:[#allocation2 + $0x52] sm:$0xff] }
 0x1fa   : > { %13948 = vst [vmem:[#allocation31_spill] sm:$0xff] %v11157_v29  ;;  %v11207_v29 = vld [vmem:[#allocation2 + $0x6a] sm:$0xff] }
 0x1fb   : > { %9664 = vmatmul.mubr.msk.f32.vlgmr.msra.gmra.mxu0 %vm917_vm3, %v1723_v39  ;;  %v11201_v39 = vld [vmem:[#allocation2 + $0x62] sm:$0xff] }
 0x1fc   : > { %9714 = vmatmul.mubr.msk.f32.vlgmr.msra.gmra.mxu1 %vm917_vm3, %v10847_v59  ;;  %9666 = vmatprep.mubr.msk.f32.mxu0 %vm917_vm3, %v11145_v16  ;;  %v11167_v59 = vld [vmem:[#allocation2 + $0x22] sm:$0xff] }
 0x1fd   : > { %9716 = vmatprep.mubr.msk.f32.mxu1 %vm917_vm3, %v10872_v14  ;;  %9762 = vmatpush3.msk.msra.mxu0 %vm1169_vm2, %v10779_v58  ;;  %v11183_v58 = vld [vmem:[#allocation2 + $0x3a] sm:$0xff] }
 0x1fe   : > { %9812 = vmatpush3.msk.msra.mxu1 %vm1169_vm2, %v10825_v36  ;;  %9861 = vmatprep.subr.msk.mxu0 %vm1169_vm2, %v11150_v31  ;;  %v11189_v36 = vld [vmem:[#allocation2 + $0x4a] sm:$0xff] }
 0x1ff   : > { %9911 = vmatprep.subr.msk.mxu1 %vm1169_vm2, %v11155_v57  ;;  %9667 = vmatmul.mubr.msk.f32.gmra.mxu0 %vm917_vm3, %v11167_v59 }
 0x200   : > { %9717 = vmatmul.mubr.msk.f32.gmra.mxu1 %vm917_vm3, %v10874_v15  ;;  %9669 = vmatprep.mubr.msk.f32.mxu0 %vm917_vm3, %v11177_v22 }
 0x201   : > { %9719 = vmatprep.mubr.msk.f32.mxu1 %vm917_vm3, %v10900_v34 }
 0x203   : > { %9670 = vmatmul.mubr.msk.f32.gmra.mxu0 %vm917_vm3, %v11183_v58 }
 0x204   : > { %9720 = vmatmul.mubr.msk.f32.gmra.mxu1 %vm917_vm3, %v10902_v35  ;;  %9672 = vmatprep.mubr.msk.f32.mxu0 %vm917_vm3, %v11189_v36  ;;  %v11329_v35 = vld [vmem:[#allocation2 + $0x15a] sm:$0xff] }
 0x205   : > { %9722 = vmatprep.mubr.msk.f32.mxu1 %vm917_vm3, %v10927_v54  ;;  %v11213_v54 = vld [vmem:[#allocation2 + $0x7a] sm:$0xff] }
 0x207   : > { %9673 = vmatmul.mubr.msk.f32.gmra.mxu0 %vm917_vm3, %v11195_v24 }
 0x208   : > { %9723 = vmatmul.mubr.msk.f32.gmra.mxu1 %vm917_vm3, %v10929_v55  ;;  %9675 = vmatprep.mubr.msk.f32.mxu0 %vm917_vm3, %v11201_v39  ;;  %v11219_v55 = vld [vmem:[#allocation2 + $0x82] sm:$0xff] }
 0x209   : > { %9725 = vmatprep.mubr.msk.f32.mxu1 %vm917_vm3, %v10953_v11  ;;  %v11225_v11 = vld [vmem:[#allocation2 + $0x92] sm:$0xff] }
 0x20b   : > { %9676 = vmatmul.mubr.msk.f32.gmra.mxu0 %vm917_vm3, %v11207_v29 }
 0x20c   : > { %9726 = vmatmul.mubr.msk.f32.gmra.mxu1 %vm917_vm3, %v10955_v12  ;;  %9678 = vmatprep.mubr.msk.f32.mxu0 %vm917_vm3, %v11213_v54  ;;  %v11231_v12 = vld [vmem:[#allocation2 + $0x9a] sm:$0xff] }
 0x20d   : > { %9728 = vmatprep.mubr.msk.f32.mxu1 %vm917_vm3, %v10976_v27  ;;  %v11237_v27 = vld [vmem:[#allocation2 + $0xaa] sm:$0xff] }
 0x20f   : > { %9679 = vmatmul.mubr.msk.f32.gmra.mxu0 %vm917_vm3, %v11219_v55 }
 0x210   : > { %9729 = vmatmul.mubr.msk.f32.gmra.mxu1 %vm917_vm3, %v10978_v28  ;;  %9681 = vmatprep.mubr.msk.f32.mxu0 %vm917_vm3, %v11225_v11  ;;  %v11243_v28 = vld [vmem:[#allocation2 + $0xb2] sm:$0xff] }
 0x211   : > { %9731 = vmatprep.mubr.msk.f32.mxu1 %vm917_vm3, %v11000_v42  ;;  %v11249_v42 = vld [vmem:[#allocation2 + $0xc2] sm:$0xff] }
 0x213   : > { %9682 = vmatmul.mubr.msk.f32.gmra.mxu0 %vm917_vm3, %v11231_v12 }
 0x214   : > { %9732 = vmatmul.mubr.msk.f32.gmra.mxu1 %vm917_vm3, %v11002_v43  ;;  %9684 = vmatprep.mubr.msk.f32.mxu0 %vm917_vm3, %v11237_v27  ;;  %v11255_v43 = vld [vmem:[#allocation2 + $0xca] sm:$0xff] }
 0x215   : > { %9734 = vmatprep.mubr.msk.f32.mxu1 %vm917_vm3, %v10994_v38  ;;  %v11261_v38 = vld [vmem:[#allocation2 + $0xda] sm:$0xff] }
 0x217   : > { %9685 = vmatmul.mubr.msk.f32.gmra.mxu0 %vm917_vm3, %v11243_v28 }
 0x218   : > { %9735 = vmatmul.mubr.msk.f32.gmra.mxu1 %vm917_vm3, %v11025_v47  ;;  %9687 = vmatprep.mubr.msk.f32.mxu0 %vm917_vm3, %v11249_v42  ;;  %v11267_v47 = vld [vmem:[#allocation2 + $0xe2] sm:$0xff] }
 0x219   : > { %9737 = vmatprep.mubr.msk.f32.mxu1 %vm917_vm3, %v11021_v45  ;;  %v11273_v45 = vld [vmem:[#allocation2 + $0xf2] sm:$0xff] }
 0x21b   : > { %9688 = vmatmul.mubr.msk.f32.gmra.mxu0 %vm917_vm3, %v11255_v43 }
 0x21c   : > { %9738 = vmatmul.mubr.msk.f32.gmra.mxu1 %vm917_vm3, %v11041_v51  ;;  %9690 = vmatprep.mubr.msk.f32.mxu0 %vm917_vm3, %v11261_v38  ;;  %v11279_v51 = vld [vmem:[#allocation2 + $0xfa] sm:$0xff] }
 0x21d   : > { %9740 = vmatprep.mubr.msk.f32.mxu1 %vm917_vm3, %v11037_v49  ;;  %v11285_v49 = vld [vmem:[#allocation2 + $0x10a] sm:$0xff] }
 0x21f   : > { %9691 = vmatmul.mubr.msk.f32.gmra.mxu0 %vm917_vm3, %v11267_v47 }
 0x220   : > { %9741 = vmatmul.mubr.msk.f32.gmra.mxu1 %vm917_vm3, %v11057_v63  ;;  %9693 = vmatprep.mubr.msk.f32.mxu0 %vm917_vm3, %v11273_v45  ;;  %v11291_v63 = vld [vmem:[#allocation2 + $0x112] sm:$0xff] }
 0x221   : > { %9743 = vmatprep.mubr.msk.f32.mxu1 %vm917_vm3, %v11053_v60  ;;  %v11297_v60 = vld [vmem:[#allocation2 + $0x122] sm:$0xff] }
 0x223   : > { %9694 = vmatmul.mubr.msk.f32.gmra.mxu0 %vm917_vm3, %v11279_v51 }
 0x224   : > { %9744 = vmatmul.mubr.msk.f32.gmra.mxu1 %vm917_vm3, %v11073_v5  ;;  %9696 = vmatprep.mubr.msk.f32.mxu0 %vm917_vm3, %v11285_v49  ;;  %v11303_v5 = vld [vmem:[#allocation2 + $0x12a] sm:$0xff] }
 0x225   : > { %9746 = vmatprep.mubr.msk.f32.mxu1 %vm917_vm3, %v11069_v3  ;;  %v11309_v3 = vld [vmem:[#allocation2 + $0x13a] sm:$0xff] }
 0x227   : > { %9697 = vmatmul.mubr.msk.f32.gmra.mxu0 %vm917_vm3, %v11291_v63 }
 0x228   : > { %9747 = vmatmul.mubr.msk.f32.gmra.mxu1 %vm917_vm3, %v11089_v9  ;;  %9699 = vmatprep.mubr.msk.f32.mxu0 %vm917_vm3, %v11297_v60  ;;  %v11315_v9 = vld [vmem:[#allocation2 + $0x142] sm:$0xff] }
 0x229   : > { %9749 = vmatprep.mubr.msk.f32.mxu1 %vm917_vm3, %v11085_v7  ;;  %v11321_v7 = vld [vmem:[#allocation2 + $0x152] sm:$0xff] }
 0x22b   : > { %9700 = vmatmul.mubr.msk.f32.gmra.mxu0 %vm917_vm3, %v11303_v5 }
 0x22c   : > { %9750 = vmatmul.mubr.msk.f32.gmra.mxu1 %vm917_vm3, %v11105_v21  ;;  %9702 = vmatprep.mubr.msk.f32.mxu0 %vm917_vm3, %v11309_v3  ;;  %v11327_v21 = vld [vmem:[#allocation2 + $0x180] sm:$0xff] }
 0x22d   : > { %9752 = vmatprep.mubr.msk.f32.mxu1 %vm917_vm3, %v11101_v17  ;;  %13949 = vst [vmem:[#allocation32_spill] sm:$0xff] %v11327_v21  ;;  %v11335_v17 = vld [vmem:[#allocation2 + $0x16a] sm:$0xff] }
 0x22f   : > { %9703 = vmatmul.mubr.msk.f32.gmra.mxu0 %vm917_vm3, %v11315_v9 }
 0x230   : > { %9753 = vmatmul.mubr.msk.f32.gmra.mxu1 %vm917_vm3, %v11121_v25  ;;  %9705 = vmatprep.mubr.msk.f32.mxu0 %vm917_vm3, %v11321_v7  ;;  %v11341_v25 = vld [vmem:[#allocation2 + $0x188] sm:$0xff] }
 0x231   : > { %9755 = vmatprep.mubr.msk.f32.mxu1 %vm917_vm3, %v11117_v23  ;;  %v11343_v23 = vld [vmem:[#allocation2 + $0x172] sm:$0xff] }
 0x233   : > { %9706 = vmatmul.mubr.msk.f32.gmra.mxu0 %vm917_vm3, %v11329_v35 }
 0x234   : > { %9756 = vmatmul.mubr.msk.f32.gmra.mxu1 %vm917_vm3, %v11133_v32  ;;  %9708 = vmatprep.mubr.msk.f32.mxu0 %vm917_vm3, %v11335_v17 }
 0x235   : > { %9758 = vmatprep.mubr.msk.f32.mxu1 %vm917_vm3, %v11327_v21  ;;  %v11360_v21 = vld [vmem:[%s13849_s5 + $0x20] sm:$0xf] }
 0x237   : > { %9709 = vmatmul.mubr.msk.f32.gmra.mxu0 %vm917_vm3, %v11343_v23 }
 0x238   : > { %9759 = vmatmul.mubr.msk.f32.gmra.mxu1 %vm917_vm3, %v11341_v25  ;;  %9763 = vmatprep.mubr.msk.f32.mxu0 %vm917_vm3, %v10843_v56  ;;  %v13950_v56 = vld [vmem:[#allocation23_spill] sm:$0xff] }
 0x239   : > { %9813 = vmatprep.mubr.msk.f32.mxu1 %vm917_vm3, %v11145_v16 }
 0x23b   : > { %9764 = vmatmul.mubr.msk.f32.vlgmr.msra.gmra.mxu0 %vm917_vm3, %v10855_v0  ;;  %v13951_v0 = vld [vmem:[#allocation28_spill] sm:$0xff] }
 0x23c   : > { %9814 = vmatmul.mubr.msk.f32.vlgmr.msra.gmra.mxu1 %vm917_vm3, %v11167_v59  ;;  %9766 = vmatprep.mubr.msk.f32.mxu0 %vm917_vm3, %v10870_v13 }
 0x23d   : > { %9816 = vmatprep.mubr.msk.f32.mxu1 %vm917_vm3, %v11177_v22  ;;  %9862 = vmatpush3.msk.msra.mxu0 %vm1169_vm2, %v11150_v31 }
 0x23e   : > { %9912 = vmatpush3.msk.msra.mxu1 %vm1169_vm2, %v11155_v57  ;;  %9961 = vmatprep.subr.msk.mxu0 %vm1169_vm2, %v11360_v21 }
 0x23f   : > { %9767 = vmatmul.mubr.msk.f32.gmra.mxu0 %vm917_vm3, %v10883_v20 }
 0x240   : > { %9817 = vmatmul.mubr.msk.f32.gmra.mxu1 %vm917_vm3, %v11183_v58  ;;  %9769 = vmatprep.mubr.msk.f32.mxu0 %vm917_vm3, %v10898_v33 }
 0x241   : > { %9819 = vmatprep.mubr.msk.f32.mxu1 %vm917_vm3, %v11189_v36 }
 0x243   : > { %9770 = vmatmul.mubr.msk.f32.gmra.mxu0 %vm917_vm3, %v10911_v41 }
 0x244   : > { %9820 = vmatmul.mubr.msk.f32.gmra.mxu1 %vm917_vm3, %v11195_v24  ;;  %9772 = vmatprep.mubr.msk.f32.mxu0 %vm917_vm3, %v10925_v53 }
 0x245   : > { %9822 = vmatprep.mubr.msk.f32.mxu1 %vm917_vm3, %v11201_v39 }
 0x247   : > { %9773 = vmatmul.mubr.msk.f32.gmra.mxu0 %vm917_vm3, %v10938_v2 }
 0x248   : > { %9823 = vmatmul.mubr.msk.f32.gmra.mxu1 %vm917_vm3, %v11207_v29  ;;  %9775 = vmatprep.mubr.msk.f32.mxu0 %vm917_vm3, %v10951_v10 }
 0x249   : > { %9825 = vmatprep.mubr.msk.f32.mxu1 %vm917_vm3, %v11213_v54 }
 0x24b   : > { %9776 = vmatmul.mubr.msk.f32.gmra.mxu0 %vm917_vm3, %v10963_v18 }
 0x24c   : > { %9826 = vmatmul.mubr.msk.f32.gmra.mxu1 %vm917_vm3, %v11219_v55  ;;  %9778 = vmatprep.mubr.msk.f32.mxu0 %vm917_vm3, %v10974_v26 }
 0x24d   : > { %9828 = vmatprep.mubr.msk.f32.mxu1 %vm917_vm3, %v11225_v11 }
 0x24f   : > { %9779 = vmatmul.mubr.msk.f32.gmra.mxu0 %vm917_vm3, %v10984_v30 }
 0x250   : > { %9829 = vmatmul.mubr.msk.f32.gmra.mxu1 %vm917_vm3, %v11231_v12  ;;  %9781 = vmatprep.mubr.msk.f32.mxu0 %vm917_vm3, %v10998_v40 }
 0x251   : > { %9831 = vmatprep.mubr.msk.f32.mxu1 %vm917_vm3, %v11237_v27 }
 0x253   : > { %9782 = vmatmul.mubr.msk.f32.gmra.mxu0 %vm917_vm3, %v11008_v44 }
 0x254   : > { %9832 = vmatmul.mubr.msk.f32.gmra.mxu1 %vm917_vm3, %v11243_v28  ;;  %9784 = vmatprep.mubr.msk.f32.mxu0 %vm917_vm3, %v10992_v37 }
 0x255   : > { %9834 = vmatprep.mubr.msk.f32.mxu1 %vm917_vm3, %v11249_v42 }
 0x257   : > { %9785 = vmatmul.mubr.msk.f32.gmra.mxu0 %vm917_vm3, %v11023_v46 }
 0x258   : > { %9835 = vmatmul.mubr.msk.f32.gmra.mxu1 %vm917_vm3, %v11255_v43  ;;  %9787 = vmatprep.mubr.msk.f32.mxu0 %vm917_vm3, %v11019_v62 }
 0x259   : > { %9837 = vmatprep.mubr.msk.f32.mxu1 %vm917_vm3, %v11261_v38 }
 0x25b   : > { %9788 = vmatmul.mubr.msk.f32.gmra.mxu0 %vm917_vm3, %v11039_v50 }
 0x25c   : > { %9838 = vmatmul.mubr.msk.f32.gmra.mxu1 %vm917_vm3, %v11267_v47  ;;  %9790 = vmatprep.mubr.msk.f32.mxu0 %vm917_vm3, %v11035_v48  ;;  %v13953_v47 = vld [vmem:[#allocation30_spill] sm:$0xff] }
 0x25d   : > { %9840 = vmatprep.mubr.msk.f32.mxu1 %vm917_vm3, %v11273_v45  ;;  %v13952_v45 = vld [vmem:[#allocation26_spill] sm:$0xff] }
 0x25f   : > { %9791 = vmatmul.mubr.msk.f32.gmra.mxu0 %vm917_vm3, %v11055_v61 }
 0x260   : > { %9841 = vmatmul.mubr.msk.f32.gmra.mxu1 %vm917_vm3, %v11279_v51  ;;  %9793 = vmatprep.mubr.msk.f32.mxu0 %vm917_vm3, %v11051_v52  ;;  %v11482_v51 = vld [vmem:[#allocation2 + $0x182] sm:$0xff] }
 0x261   : > { %9843 = vmatprep.mubr.msk.f32.mxu1 %vm917_vm3, %v11285_v49  ;;  %v11480_v49 = vld [vmem:[#allocation2 + $0x181] sm:$0xff] }
 0x263   : > { %9794 = vmatmul.mubr.msk.f32.gmra.mxu0 %vm917_vm3, %v11071_v4 }
 0x264   : > { %9844 = vmatmul.mubr.msk.f32.gmra.mxu1 %vm917_vm3, %v11291_v63  ;;  %9796 = vmatprep.mubr.msk.f32.mxu0 %vm917_vm3, %v11067_v1  ;;  %v11508_v63 = vpop.f32.mrf.mxu0 }
 0x265   : > { %9846 = vmatprep.mubr.msk.f32.mxu1 %vm917_vm3, %v11297_v60  ;;  %v11490_v60 = vld [vmem:[#allocation2 + $0x18a] sm:$0xff] }
 0x267   : > { %9797 = vmatmul.mubr.msk.f32.gmra.mxu0 %vm917_vm3, %v11087_v8 }
 0x268   : > { %9847 = vmatmul.mubr.msk.f32.gmra.mxu1 %vm917_vm3, %v11303_v5  ;;  %9799 = vmatprep.mubr.msk.f32.mxu0 %vm917_vm3, %v11083_v6  ;;  %v13954_v5 = vld [vmem:[#allocation3_spill] sm:$0xff] }
 0x269   : > { %9849 = vmatprep.mubr.msk.f32.mxu1 %vm917_vm3, %v11309_v3  ;;  %v11510_v3 = vpop.f32.mrf.mxu1 }
 0x26b   : > { %9800 = vmatmul.mubr.msk.f32.gmra.mxu0 %vm917_vm3, %v11103_v19 }
 0x26c   : > { %9850 = vmatmul.mubr.msk.f32.gmra.mxu1 %vm917_vm3, %v11315_v9  ;;  %9802 = vmatprep.mubr.msk.f32.mxu0 %vm917_vm3, %v13950_v56 }
 0x26d   : > { %9852 = vmatprep.mubr.msk.f32.mxu1 %vm917_vm3, %v11321_v7 }
 0x26f   : > { %9803 = vmatmul.mubr.msk.f32.gmra.mxu0 %vm917_vm3, %v13951_v0 }
 0x270   : > { %9853 = vmatmul.mubr.msk.f32.gmra.mxu1 %vm917_vm3, %v11329_v35  ;;  %9805 = vmatprep.mubr.msk.f32.mxu0 %vm917_vm3, %v13952_v45  ;;  %v11488_v35 = vld [vmem:[#allocation2 + $0x189] sm:$0xff] }
 0x271   : > { %9855 = vmatprep.mubr.msk.f32.mxu1 %vm917_vm3, %v11335_v17  ;;  %v13956_v17 = vld [vmem:[#allocation5_spill] sm:$0xff] }
 0x273   : > { %9806 = vmatmul.mubr.msk.f32.gmra.mxu0 %vm917_vm3, %v13953_v47 }
 0x274   : > { %9856 = vmatmul.mubr.msk.f32.gmra.mxu1 %vm917_vm3, %v11343_v23  ;;  %9808 = vmatprep.mubr.msk.f32.mxu0 %vm917_vm3, %v11480_v49 }
 0x275   : > { %9858 = vmatprep.mubr.msk.f32.mxu1 %vm917_vm3, %v11482_v51 }
 0x277   : > { %9809 = vmatmul.mubr.msk.f32.gmra.mxu0 %vm917_vm3, %v11488_v35 }
 0x278   : > { %9859 = vmatmul.mubr.msk.f32.gmra.mxu1 %vm917_vm3, %v11490_v60  ;;  %9863 = vmatprep.mubr.msk.f32.mxu0 %vm917_vm3, %v10872_v14 }
 0x279   : > { %9913 = vmatprep.mubr.msk.f32.mxu1 %vm917_vm3, %v10870_v13 }
 0x27b   : > { %9864 = vmatmul.mubr.msk.f32.vlgmr.msra.gmra.mxu0 %vm917_vm3, %v10874_v15 }
 0x27c   : > { %9914 = vmatmul.mubr.msk.f32.vlgmr.msra.gmra.mxu1 %vm917_vm3, %v10883_v20  ;;  %9866 = vmatprep.mubr.msk.f32.mxu0 %vm917_vm3, %v10900_v34  ;;  %v13955_v20 = vld [vmem:[#allocation4_spill] sm:$0xff] }
 0x27d   : > { %9916 = vmatprep.mubr.msk.f32.mxu1 %vm917_vm3, %v10898_v33  ;;  %9962 = vmatpush3.msk.msra.mxu0 %vm1169_vm2, %v11360_v21  ;;  %v13957_v21 = vld [vmem:[#allocation6_spill] sm:$0xff] }
 0x27f   : > { %v9568_v13 = vpop.f32.mrf.mxu0  ;;  %9867 = vmatmul.mubr.msk.f32.gmra.mxu0 %vm917_vm3, %v13954_v5 }
 0x280   : > { %v9618_v14 = vpop.f32.mrf.mxu1  ;;  %9917 = vmatmul.mubr.msk.f32.gmra.mxu1 %vm917_vm3, %v10911_v41  ;;  %9869 = vmatprep.mubr.msk.f32.mxu0 %vm917_vm3, %v13955_v20 }
 0x281   : > { %v11518_v15 = vadd.f32 %v9618_v14, %v9568_v13  ;;  %9919 = vmatprep.mubr.msk.f32.mxu1 %vm917_vm3, %v10925_v53  ;;  %v1249_v33 = vpop.f32.mrf.mxu0  ;;  %v13958_v13 = vld [vmem:[#allocation7_spill] sm:$0xff]  ;;  %v13959_v14 = vld [vmem:[#allocation8_spill] sm:$0xff] }
 0x282   : > { %v1573_v34 = vpop.f32.mrf.mxu1 }
 0x283   : > { %v11524_v7 = vadd.f32 %v1573_v34, %v1249_v33  ;;  %v9571_v9 = vpop.f32.mrf.mxu0  ;;  %9870 = vmatmul.mubr.msk.f32.gmra.mxu0 %vm917_vm3, %v13956_v17 }
 0x284   : > { %v9621_v16 = vpop.f32.mrf.mxu1  ;;  %9920 = vmatmul.mubr.msk.f32.gmra.mxu1 %vm917_vm3, %v10938_v2  ;;  %9872 = vmatprep.mubr.msk.f32.mxu0 %vm917_vm3, %v13957_v21 }
 0x285   : > { %v11530_v41 = vadd.f32 %v9621_v16, %v9571_v9  ;;  %9922 = vmatprep.mubr.msk.f32.mxu1 %vm917_vm3, %v10951_v10  ;;  %v1259_v53 = vpop.f32.mrf.mxu0  ;;  %v13960_v9 = vld [vmem:[#allocation9_spill] sm:$0xff]  ;;  %v13961_v16 = vld [vmem:[#allocation11_spill] sm:$0xff] }
 0x286   : > { %v1583_v23 = vpop.f32.mrf.mxu1 }
 0x287   : > { %v11536_v31 = vadd.f32 %v1583_v23, %v1259_v53  ;;  %v9574_v57 = vpop.f32.mrf.mxu0  ;;  %9873 = vmatmul.mubr.msk.f32.gmra.mxu0 %vm917_vm3, %v13958_v13 }
 0x288   : > { %v9624_v59 = vpop.f32.mrf.mxu1  ;;  %9923 = vmatmul.mubr.msk.f32.gmra.mxu1 %vm917_vm3, %v10963_v18  ;;  %9875 = vmatprep.mubr.msk.f32.mxu0 %vm917_vm3, %v13959_v14 }
 0x289   : > { %v11542_v2 = vadd.f32 %v9624_v59, %v9574_v57  ;;  %9925 = vmatprep.mubr.msk.f32.mxu1 %vm917_vm3, %v10974_v26  ;;  %v1269_v10 = vpop.f32.mrf.mxu0  ;;  %v13962_v57 = vld [vmem:[#allocation12_spill] sm:$0xff]  ;;  %v13963_v59 = vld [vmem:[#allocation10_spill] sm:$0xff] }
 0x28a   : > { %v1593_v5 = vpop.f32.mrf.mxu1 }
 0x28b   : > { %v11548_v20 = vadd.f32 %v1593_v5, %v1269_v10  ;;  %v9577_v33 = vpop.f32.mrf.mxu0  ;;  %9876 = vmatmul.mubr.msk.f32.gmra.mxu0 %vm917_vm3, %v13960_v9 }
 0x28c   : > { %v9627_v34 = vpop.f32.mrf.mxu1  ;;  %9926 = vmatmul.mubr.msk.f32.gmra.mxu1 %vm917_vm3, %v10984_v30  ;;  %9878 = vmatprep.mubr.msk.f32.mxu0 %vm917_vm3, %v13961_v16 }
 0x28d   : > { %v11554_v18 = vadd.f32 %v9627_v34, %v9577_v33  ;;  %9928 = vmatprep.mubr.msk.f32.mxu1 %vm917_vm3, %v10998_v40  ;;  %v1279_v26 = vpop.f32.mrf.mxu0  ;;  %v13964_v33 = vld [vmem:[#allocation14_spill] sm:$0xff]  ;;  %v13965_v34 = vld [vmem:[#allocation13_spill] sm:$0xff] }
 0x28e   : > { %v1603_v17 = vpop.f32.mrf.mxu1 }
 0x28f   : > { %v11560_v21 = vadd.f32 %v1603_v17, %v1279_v26  ;;  %v9580_v53 = vpop.f32.mrf.mxu0  ;;  %9879 = vmatmul.mubr.msk.f32.gmra.mxu0 %vm917_vm3, %v13962_v57 }
 0x290   : > { %v9630_v23 = vpop.f32.mrf.mxu1  ;;  %9929 = vmatmul.mubr.msk.f32.gmra.mxu1 %vm917_vm3, %v11008_v44  ;;  %9881 = vmatprep.mubr.msk.f32.mxu0 %vm917_vm3, %v13963_v59 }
 0x291   : > { %v11566_v30 = vadd.f32 %v9630_v23, %v9580_v53  ;;  %9931 = vmatprep.mubr.msk.f32.mxu1 %vm917_vm3, %v10992_v37  ;;  %v1289_v40 = vpop.f32.mrf.mxu0  ;;  %v13966_v53 = vld [vmem:[#allocation16_spill] sm:$0xff]  ;;  %v13967_v23 = vld [vmem:[#allocation15_spill] sm:$0xff] }
 0x292   : > { %v1613_v13 = vpop.f32.mrf.mxu1 }
 0x293   : > { %v11572_v14 = vadd.f32 %v1613_v13, %v1289_v40  ;;  %v9583_v10 = vpop.f32.mrf.mxu0  ;;  %9882 = vmatmul.mubr.msk.f32.gmra.mxu0 %vm917_vm3, %v13964_v33 }
 0x294   : > { %v9633_v5 = vpop.f32.mrf.mxu1  ;;  %9932 = vmatmul.mubr.msk.f32.gmra.mxu1 %vm917_vm3, %v11023_v46  ;;  %9884 = vmatprep.mubr.msk.f32.mxu0 %vm917_vm3, %v13965_v34 }
 0x295   : > { %v11578_v44 = vadd.f32 %v9633_v5, %v9583_v10  ;;  %9934 = vmatprep.mubr.msk.f32.mxu1 %vm917_vm3, %v11019_v62  ;;  %v1299_v37 = vpop.f32.mrf.mxu0  ;;  %v13968_v10 = vld [vmem:[#allocation18_spill] sm:$0xff]  ;;  %v13969_v5 = vld [vmem:[#allocation17_spill] sm:$0xff] }
 0x296   : > { %v1623_v9 = vpop.f32.mrf.mxu1 }
 0x297   : > { %v11584_v16 = vadd.f32 %v1623_v9, %v1299_v37  ;;  %v9586_v26 = vpop.f32.mrf.mxu0  ;;  %9885 = vmatmul.mubr.msk.f32.gmra.mxu0 %vm917_vm3, %v13966_v53  ;;  %v13970_v9 = vld [vmem:[#allocation20_spill] sm:$0xff] }
 0x298   : > { %v9636_v17 = vpop.f32.mrf.mxu1  ;;  %9935 = vmatmul.mubr.msk.f32.gmra.mxu1 %vm917_vm3, %v11039_v50  ;;  %9887 = vmatprep.mubr.msk.f32.mxu0 %vm917_vm3, %v13967_v23 }
 0x299   : > { %v11590_v46 = vadd.f32 %v9636_v17, %v9586_v26  ;;  %9937 = vmatprep.mubr.msk.f32.mxu1 %vm917_vm3, %v11035_v48  ;;  %v1309_v62 = vpop.f32.mrf.mxu0  ;;  %v13971_v26 = vld [vmem:[#allocation19_spill] sm:$0xff] }
 0x29a   : > { %v1633_v57 = vpop.f32.mrf.mxu1 }
 0x29b   : > { %v11596_v59 = vadd.f32 %v1633_v57, %v1309_v62  ;;  %v9589_v40 = vpop.f32.mrf.mxu0  ;;  %9888 = vmatmul.mubr.msk.f32.gmra.mxu0 %vm917_vm3, %v13968_v10  ;;  %v13972_v62 = vld [vmem:[#allocation22_spill] sm:$0xff]  ;;  %v13973_v57 = vld [vmem:[#allocation21_spill] sm:$0xff] }
 0x29c   : > { %v9639_v13 = vpop.f32.mrf.mxu1  ;;  %9938 = vmatmul.mubr.msk.f32.gmra.mxu1 %vm917_vm3, %v11055_v61  ;;  %9890 = vmatprep.mubr.msk.f32.mxu0 %vm917_vm3, %v13969_v5  ;;  %v13974_v5 = vld [vmem:[#allocation25_spill] sm:$0xff] }
 0x29d   : > { %v11602_v50 = vadd.f32 %v9639_v13, %v9589_v40  ;;  %9940 = vmatprep.mubr.msk.f32.mxu1 %vm917_vm3, %v11051_v52  ;;  %v11608_v48 = vpop.f32.mrf.mxu0 }
 0x29e   : > { %v11610_v33 = vpop.f32.mrf.mxu1 }
 0x29f   : > { %v9592_v34 = vpop.f32.mrf.mxu0  ;;  %9891 = vmatmul.mubr.msk.f32.gmra.mxu0 %vm917_vm3, %v13970_v9 }
 0x2a0   : > { %v9642_v37 = vpop.f32.mrf.mxu1  ;;  %9941 = vmatmul.mubr.msk.f32.gmra.mxu1 %vm917_vm3, %v11071_v4  ;;  %9893 = vmatprep.mubr.msk.f32.mxu0 %vm917_vm3, %v13971_v26 }
 0x2a1   : > { %v11616_v61 = vadd.f32 %v9642_v37, %v9592_v34  ;;  %9943 = vmatprep.mubr.msk.f32.mxu1 %vm917_vm3, %v11067_v1  ;;  %v11622_v52 = vpop.f32.mrf.mxu0  ;;  %v13975_v34 = vld [vmem:[#allocation24_spill] sm:$0xff] }
 0x2a2   : > { %v11624_v17 = vpop.f32.mrf.mxu1 }
 0x2a3   : > { %v9595_v53 = vpop.f32.mrf.mxu0  ;;  %9894 = vmatmul.mubr.msk.f32.gmra.mxu0 %vm917_vm3, %v13972_v62 }
 0x2a4   : > { %v9645_v23 = vpop.f32.mrf.mxu1  ;;  %9944 = vmatmul.mubr.msk.f32.gmra.mxu1 %vm917_vm3, %v11087_v8  ;;  %9896 = vmatprep.mubr.msk.f32.mxu0 %vm917_vm3, %v13973_v57 }
 0x2a5   : > { %v11630_v4 = vadd.f32 %v9645_v23, %v9595_v53  ;;  %9946 = vmatprep.mubr.msk.f32.mxu1 %vm917_vm3, %v11083_v6  ;;  %v11636_v1 = vpop.f32.mrf.mxu0  ;;  %v13976_v53 = vld [vmem:[#allocation29_spill] sm:$0xff]  ;;  %v13977_v23 = vld [vmem:[#allocation27_spill] sm:$0xff] }
 0x2a6   : > { %v11638_v40 = vpop.f32.mrf.mxu1 }
 0x2a7   : > { %v9598_v13 = vpop.f32.mrf.mxu0  ;;  %9897 = vmatmul.mubr.msk.f32.gmra.mxu0 %vm917_vm3, %v13974_v5 }
 0x2a8   : > { %v9648_v10 = vpop.f32.mrf.mxu1  ;;  %9947 = vmatmul.mubr.msk.f32.gmra.mxu1 %vm917_vm3, %v11103_v19  ;;  %9899 = vmatprep.mubr.msk.f32.mxu0 %vm917_vm3, %v13975_v34  ;;  %v3313_v34 = vld [vmem:[#allocation2 + $0x198] sm:$0xff] }
 0x2a9   : > { %v11644_v8 = vadd.f32 %v9648_v10, %v9598_v13  ;;  %9949 = vmatprep.mubr.msk.f32.mxu1 %vm917_vm3, %v13950_v56  ;;  %v11650_v6 = vpop.f32.mrf.mxu0  ;;  %v13980_v10 = vld [vmem:[#allocation32_spill] sm:$0xff] }
 0x2aa   : > { %v11652_v37 = vpop.f32.mrf.mxu1 }
 0x2ab   : > { %v9601_v9 = vpop.f32.mrf.mxu0  ;;  %9900 = vmatmul.mubr.msk.f32.gmra.mxu0 %vm917_vm3, %v13976_v53 }
 0x2ac   : > { %v9651_v26 = vpop.f32.mrf.mxu1  ;;  %9950 = vmatmul.mubr.msk.f32.gmra.mxu1 %vm917_vm3, %v13951_v0  ;;  %9902 = vmatprep.mubr.msk.f32.mxu0 %vm917_vm3, %v13977_v23 }
 0x2ad   : > { %v11658_v19 = vadd.f32 %v9651_v26, %v9601_v9  ;;  %9952 = vmatprep.mubr.msk.f32.mxu1 %vm917_vm3, %v13952_v45  ;;  %v11664_v56 = vpop.f32.mrf.mxu0  ;;  %v3703_v9 = vld [vmem:[#allocation2 + $0x199] sm:$0xff] }
 0x2ae   : > { %13978 = vst [vmem:[#allocation23_spill] sm:$0xff] %v11664_v56  ;;  %v11666_v62 = vpop.f32.mrf.mxu1 }
 0x2af   : > { %13979 = vst [vmem:[#allocation28_spill] sm:$0xff] %v11666_v62  ;;  %v9604_v57 = vpop.f32.mrf.mxu0  ;;  %9903 = vmatmul.mubr.msk.f32.gmra.mxu0 %vm917_vm3, %v11133_v32 }
 0x2b0   : > { %v9654_v13 = vpop.f32.mrf.mxu1  ;;  %9953 = vmatmul.mubr.msk.f32.gmra.mxu1 %vm917_vm3, %v13953_v47  ;;  %9905 = vmatprep.mubr.msk.f32.mxu0 %vm917_vm3, %v13980_v10  ;;  %v3314_v47 = vld [vmem:[#allocation2 + $0x1a0] sm:$0xff] }
 0x2b1   : > { %v11672_v0 = vadd.f32 %v9654_v13, %v9604_v57  ;;  %9955 = vmatprep.mubr.msk.f32.mxu1 %vm917_vm3, %v11480_v49  ;;  %v11678_v45 = vpop.f32.mrf.mxu0  ;;  %v3704_v49 = vld [vmem:[#allocation2 + $0x1a1] sm:$0xff] }
 0x2b2   : > { %13981 = vst [vmem:[#allocation26_spill] sm:$0xff] %v11678_v45  ;;  %v11680_v5 = vpop.f32.mrf.mxu1 }
 0x2b3   : > { %13982 = vst [vmem:[#allocation30_spill] sm:$0xff] %v11680_v5  ;;  %v9607_v26 = vpop.f32.mrf.mxu0  ;;  %9906 = vmatmul.mubr.msk.f32.gmra.mxu0 %vm917_vm3, %v11341_v25 }
 0x2b4   : > { %v9657_v53 = vpop.f32.mrf.mxu1  ;;  %9956 = vmatmul.mubr.msk.f32.gmra.mxu1 %vm917_vm3, %v11488_v35  ;;  %9908 = vmatprep.mubr.msk.f32.mxu0 %vm917_vm3, %v3313_v34 }
 0x2b5   : > { %v11686_v32 = vadd.f32 %v9657_v53, %v9607_v26  ;;  %9958 = vmatprep.mubr.msk.f32.mxu1 %vm917_vm3, %v3703_v9  ;;  %v11690_v23 = vpop.f32.mrf.mxu0  ;;  %v13987_v53 = vld [vmem:[#allocation31_spill] sm:$0xff] }
 0x2b6   : > { %13983 = vst [vmem:[#allocation3_spill] sm:$0xff] %v11690_v23  ;;  %v11692_v57 = vpop.f32.mrf.mxu1 }
 0x2b7   : > { %13984 = vst [vmem:[#allocation4_spill] sm:$0xff] %v11692_v57  ;;  %v9610_v13 = vpop.f32.mrf.mxu0  ;;  %9909 = vmatmul.mubr.msk.f32.gmra.mxu0 %vm917_vm3, %v3314_v47 }
 0x2b8   : > { %v9660_v10 = vpop.f32.mrf.mxu1  ;;  %9959 = vmatmul.mubr.msk.f32.gmra.mxu1 %vm917_vm3, %v3704_v49  ;;  %9963 = vmatprep.mubr.msk.f32.mxu0 %vm917_vm3, %v11177_v22 }
 0x2b9   : > { %v11696_v25 = vadd.f32 %v9660_v10, %v9610_v13  ;;  %v11700_v35 = vpop.f32.mrf.mxu0 }
 0x2ba   : > { %13985 = vst [vmem:[#allocation5_spill] sm:$0xff] %v11700_v35  ;;  %v11702_v34 = vpop.f32.mrf.mxu1 }
 0x2bb   : > { %13986 = vst [vmem:[#allocation6_spill] sm:$0xff] %v11702_v34  ;;  %v9665_v9 = vpop.f32.mrf.mxu0  ;;  %9964 = vmatmul.mubr.msk.f32.vlgmr.msra.gmra.mxu0 %vm917_vm3, %v11183_v58 }
 0x2bc   : > { %v9715_v26 = vpop.f32.mrf.mxu1  ;;  %v2081_v57 = vadd.f32 %v9665_v9, %v13987_v53  ;;  %9966 = vmatprep.mubr.msk.f32.mxu0 %vm917_vm3, %v11189_v36 }
 0x2bd   : > { %v11709_v47 = vpop.f32.mrf.mxu0 }
 0x2be   : > { %v11711_v49 = vpop.f32.mrf.mxu1  ;;  %v11713_v13 = vadd.f32 %v9715_v26, %v2081_v57 }
 0x2bf   : > { %v9668_v22 = vpop.f32.mrf.mxu0  ;;  %9967 = vmatmul.mubr.msk.f32.gmra.mxu0 %vm917_vm3, %v11195_v24 }
 0x2c0   : > { %v9718_v10 = vpop.f32.mrf.mxu1  ;;  %v2083_v34 = vadd.f32 %v9668_v22, %v11518_v15  ;;  %9969 = vmatprep.mubr.msk.f32.mxu0 %vm917_vm3, %v11201_v39 }
 0x2c1   : > { %v1931_v58 = vpop.f32.mrf.mxu0 }
 0x2c2   : > { %v11720_v9 = vpop.f32.mrf.mxu1  ;;  %v11722_v36 = vadd.f32 %v9718_v10, %v2083_v34  ;;  %v11725_v53 = vadd.f32 %v1931_v58, %v11524_v7 }
 0x2c3   : > { %v9671_v57 = vpop.f32.mrf.mxu0  ;;  %9970 = vmatmul.mubr.msk.f32.gmra.mxu0 %vm917_vm3, %v11207_v29 }
 0x2c4   : > { %v9721_v26 = vpop.f32.mrf.mxu1  ;;  %v2085_v24 = vadd.f32 %v9671_v57, %v11530_v41  ;;  %9972 = vmatprep.mubr.msk.f32.mxu0 %vm917_vm3, %v11213_v54 }
 0x2c5   : > { %v1941_v15 = vpop.f32.mrf.mxu0 }
 0x2c6   : > { %v11732_v39 = vpop.f32.mrf.mxu1  ;;  %v11734_v22 = vadd.f32 %v9721_v26, %v2085_v24  ;;  %v11737_v34 = vadd.f32 %v1941_v15, %v11536_v31 }
 0x2c7   : > { %v9674_v7 = vpop.f32.mrf.mxu0  ;;  %9973 = vmatmul.mubr.msk.f32.gmra.mxu0 %vm917_vm3, %v11219_v55 }
 0x2c8   : > { %v9724_v10 = vpop.f32.mrf.mxu1  ;;  %v2087_v29 = vadd.f32 %v9674_v7, %v11542_v2  ;;  %9975 = vmatprep.mubr.msk.f32.mxu0 %vm917_vm3, %v11225_v11  ;;  %v8529_v11 = vld [vmem:[%s13851_s7 + $0x4] sm:$0xf] }
 0x2c9   : > { %v1951_v41 = vpop.f32.mrf.mxu0  ;;  %10011 = vmatprep.subr.msk.mxu1 %vm1169_vm2, %v8529_v11 }
 0x2ca   : > { %v11744_v54 = vpop.f32.mrf.mxu1  ;;  %v11746_v58 = vadd.f32 %v9724_v10, %v2087_v29  ;;  %v11749_v57 = vadd.f32 %v1951_v41, %v11548_v20  ;;  %10012 = vmatpush3.msk.msra.mxu1 %vm1169_vm2, %v8529_v11 }
 0x2cb   : > { %v9677_v31 = vpop.f32.mrf.mxu0  ;;  %9976 = vmatmul.mubr.msk.f32.gmra.mxu0 %vm917_vm3, %v11231_v12 }
 0x2cc   : > { %v9727_v26 = vpop.f32.mrf.mxu1  ;;  %v2089_v55 = vadd.f32 %v9677_v31, %v11554_v18  ;;  %9978 = vmatprep.mubr.msk.f32.mxu0 %vm917_vm3, %v11237_v27 }
 0x2cd   : > { %v1961_v2 = vpop.f32.mrf.mxu0 }
 0x2ce   : > { %v11759_v24 = vpop.f32.mrf.mxu1  ;;  %v11762_v20 = vadd.f32 %v9727_v26, %v2089_v55  ;;  %v11765_v15 = vadd.f32 %v1961_v2, %v11560_v21 }
 0x2cf   : > { %v9680_v12 = vpop.f32.mrf.mxu0  ;;  %9979 = vmatmul.mubr.msk.f32.gmra.mxu0 %vm917_vm3, %v11243_v28 }
 0x2d0   : > { %v9730_v18 = vpop.f32.mrf.mxu1  ;;  %v2091_v27 = vadd.f32 %v9680_v12, %v11566_v30  ;;  %9981 = vmatprep.mubr.msk.f32.mxu0 %vm917_vm3, %v11249_v42  ;;  %v4079_v12 = vld [vmem:[#allocation2 + $0xf2] sm:$0xff] }
 0x2d1   : > { %v1971_v7 = vpop.f32.mrf.mxu0 }
 0x2d2   : > { %v11773_v10 = vpop.f32.mrf.mxu1  ;;  %v11775_v29 = vadd.f32 %v9730_v18, %v2091_v27  ;;  %v11778_v21 = vadd.f32 %v1971_v7, %v11572_v14  ;;  %v4078_v14 = vld [vmem:[#allocation2 + $0xe2] sm:$0xff] }
 0x2d3   : > { %v9683_v41 = vpop.f32.mrf.mxu0  ;;  %9982 = vmatmul.mubr.msk.f32.gmra.mxu0 %vm917_vm3, %v11255_v43 }
 0x2d4   : > { %v9733_v31 = vpop.f32.mrf.mxu1  ;;  %v2093_v28 = vadd.f32 %v9683_v41, %v11578_v44  ;;  %9984 = vmatprep.mubr.msk.f32.mxu0 %vm917_vm3, %v11261_v38 }
 0x2d5   : > { %v1981_v30 = vpop.f32.mrf.mxu0 }
 0x2d6   : > { %v11785_v42 = vpop.f32.mrf.mxu1  ;;  %v11787_v26 = vadd.f32 %v9733_v31, %v2093_v28  ;;  %v11790_v55 = vadd.f32 %v1981_v30, %v11584_v16  ;;  %v4080_v16 = vld [vmem:[#allocation2 + $0xfa] sm:$0xff]  ;;  %v4081_v31 = vld [vmem:[#allocation2 + $0x10a] sm:$0xff]  ;;  %v1644_v28 = vadd.f32 %v11610_v33, %v11608_v48 }
 0x2d7   : > { %13988 = vst [vmem:[#allocation7_spill] sm:$0xff] %v11785_v42  ;;  %v9686_v11 = vpop.f32.mrf.mxu0  ;;  %9985 = vmatmul.mubr.msk.f32.gmra.mxu0 %vm917_vm3, %v4078_v14 }
 0x2d8   : > { %13989 = vst [vmem:[#allocation8_spill] sm:$0xff] %v11790_v55  ;;  %v9736_v2 = vpop.f32.mrf.mxu1  ;;  %v2095_v43 = vadd.f32 %v9686_v11, %v11590_v46  ;;  %9987 = vmatprep.mubr.msk.f32.mxu0 %vm917_vm3, %v4079_v12 }
 0x2d9   : > { %v1991_v44 = vpop.f32.mrf.mxu0 }
 0x2da   : > { %v11795_v38 = vpop.f32.mrf.mxu1  ;;  %v11797_v18 = vadd.f32 %v9736_v2, %v2095_v43  ;;  %v11800_v27 = vadd.f32 %v1991_v44, %v11596_v59  ;;  %v4082_v2 = vld [vmem:[#allocation2 + $0x112] sm:$0xff]  ;;  %v4083_v44 = vld [vmem:[#allocation2 + $0x122] sm:$0xff] }
 0x2db   : > { %13990 = vst [vmem:[#allocation9_spill] sm:$0xff] %v11795_v38  ;;  %v9689_v7 = vpop.f32.mrf.mxu0  ;;  %9988 = vmatmul.mubr.msk.f32.gmra.mxu0 %vm917_vm3, %v4080_v16 }
 0x2dc   : > { %13991 = vst [vmem:[#allocation11_spill] sm:$0xff] %v11800_v27  ;;  %v9739_v41 = vpop.f32.mrf.mxu1  ;;  %v2097_v46 = vadd.f32 %v9689_v7, %v11602_v50  ;;  %9990 = vmatprep.mubr.msk.f32.mxu0 %vm917_vm3, %v4081_v31  ;;  %v4084_v7 = vld [vmem:[#allocation2 + $0x12a] sm:$0xff] }
 0x2dd   : > { %v2001_v30 = vpop.f32.mrf.mxu0 }
 0x2de   : > { %v11807_v14 = vpop.f32.mrf.mxu1  ;;  %v11809_v11 = vadd.f32 %v9739_v41, %v2097_v46  ;;  %v11811_v59 = vadd.f32 %v2001_v30, %v1644_v28  ;;  %v4085_v28 = vld [vmem:[#allocation2 + $0x13a] sm:$0xff] }
 0x2df   : > { %13992 = vst [vmem:[#allocation12_spill] sm:$0xff] %v11807_v14  ;;  %v9692_v12 = vpop.f32.mrf.mxu0  ;;  %9991 = vmatmul.mubr.msk.f32.gmra.mxu0 %vm917_vm3, %v4082_v2 }
 0x2e0   : > { %13993 = vst [vmem:[#allocation10_spill] sm:$0xff] %v11811_v59  ;;  %v9742_v43 = vpop.f32.mrf.mxu1  ;;  %v2099_v16 = vadd.f32 %v9692_v12, %v11616_v61  ;;  %9993 = vmatprep.mubr.msk.f32.mxu0 %vm917_vm3, %v4083_v44  ;;  %v4086_v12 = vld [vmem:[#allocation2 + $0x142] sm:$0xff] }
 0x2e1   : > { %v11816_v50 = vpop.f32.mrf.mxu0 }
 0x2e2   : > { %13994 = vst [vmem:[#allocation14_spill] sm:$0xff] %v11816_v50  ;;  %v11818_v48 = vpop.f32.mrf.mxu1  ;;  %v11820_v33 = vadd.f32 %v9742_v43, %v2099_v16  ;;  %v4087_v16 = vld [vmem:[#allocation2 + $0x152] sm:$0xff]  ;;  %v4556_v50 = vld [vmem:[#allocation2] sm:$0xff] }
 0x2e3   : > { %13995 = vst [vmem:[#allocation13_spill] sm:$0xff] %v11818_v48  ;;  %v9695_v41 = vpop.f32.mrf.mxu0  ;;  %9994 = vmatmul.mubr.msk.f32.gmra.mxu0 %vm917_vm3, %v4084_v7 }
 0x2e4   : > { %v9745_v31 = vpop.f32.mrf.mxu1  ;;  %v2101_v46 = vadd.f32 %v9695_v41, %v11630_v4  ;;  %9996 = vmatprep.mubr.msk.f32.mxu0 %vm917_vm3, %v4085_v28  ;;  %v4088_v28 = vld [vmem:[#allocation2 + $0x15a] sm:$0xff] }
 0x2e5   : > { %v11825_v30 = vpop.f32.mrf.mxu0 }
 0x2e6   : > { %13996 = vst [vmem:[#allocation16_spill] sm:$0xff] %v11825_v30  ;;  %v11827_v61 = vpop.f32.mrf.mxu1  ;;  %v11829_v2 = vadd.f32 %v9745_v31, %v2101_v46  ;;  %v4089_v46 = vld [vmem:[#allocation2 + $0x16a] sm:$0xff] }
 0x2e7   : > { %13997 = vst [vmem:[#allocation15_spill] sm:$0xff] %v11827_v61  ;;  %v9698_v44 = vpop.f32.mrf.mxu0  ;;  %9997 = vmatmul.mubr.msk.f32.gmra.mxu0 %vm917_vm3, %v4086_v12 }
 0x2e8   : > { %v9748_v43 = vpop.f32.mrf.mxu1  ;;  %v2103_v48 = vadd.f32 %v9698_v44, %v11644_v8  ;;  %9999 = vmatprep.mubr.msk.f32.mxu0 %vm917_vm3, %v4087_v16  ;;  %v4090_v16 = vld [vmem:[#allocation2 + $0x172] sm:$0xff] }
 0x2e9   : > { %v11834_v7 = vpop.f32.mrf.mxu0 }
 0x2ea   : > { %13998 = vst [vmem:[#allocation18_spill] sm:$0xff] %v11834_v7  ;;  %v11836_v4 = vpop.f32.mrf.mxu1  ;;  %v11838_v41 = vadd.f32 %v9748_v43, %v2103_v48  ;;  %v4589_v7 = vld [vmem:[#allocation2 + $0x1] sm:$0xff] }
 0x2eb   : > { %13999 = vst [vmem:[#allocation17_spill] sm:$0xff] %v11836_v4  ;;  %v9701_v61 = vpop.f32.mrf.mxu0  ;;  %10000 = vmatmul.mubr.msk.f32.gmra.mxu0 %vm917_vm3, %v4088_v28  ;;  %10013 = vmatprep.mubr.msk.f32.mxu1 %vm917_vm3, %v4589_v7 }
 0x2ec   : > { %v9751_v31 = vpop.f32.mrf.mxu1  ;;  %v2105_v30 = vadd.f32 %v9701_v61, %v11658_v19  ;;  %10002 = vmatprep.mubr.msk.f32.mxu0 %vm917_vm3, %v4089_v46  ;;  %v4093_v61 = vld [vmem:[#allocation2 + $0x19a] sm:$0xff] }
 0x2ed   : > { %v11843_v12 = vpop.f32.mrf.mxu0 }
 0x2ee   : > { %14000 = vst [vmem:[#allocation20_spill] sm:$0xff] %v11843_v12  ;;  %v11845_v8 = vpop.f32.mrf.mxu1  ;;  %v11847_v44 = vadd.f32 %v9751_v31, %v2105_v30  ;;  %v4588_v12 = vld [vmem:[%s13851_s7] sm:$0xf] }
 0x2ef   : > { %14001 = vst [vmem:[#allocation19_spill] sm:$0xff] %v11845_v8  ;;  %v9704_v4 = vpop.f32.mrf.mxu0  ;;  %10003 = vmatmul.mubr.msk.f32.gmra.mxu0 %vm917_vm3, %v4090_v16  ;;  %10061 = vmatprep.subr.msk.mxu0 %vm1169_vm2, %v4588_v12 }
 0x2f0   : > { %v9754_v48 = vpop.f32.mrf.mxu1  ;;  %v2107_v43 = vadd.f32 %v9704_v4, %v11672_v0  ;;  %10005 = vmatprep.mubr.msk.f32.mxu0 %vm917_vm3, %v11482_v51  ;;  %v4094_v0 = vld [vmem:[#allocation2 + $0x1a2] sm:$0xff]  ;;  %10062 = vmatpush3.msk.msra.mxu0 %vm1169_vm2, %v4588_v12 }
 0x2f1   : > { %v11853_v28 = vpop.f32.mrf.mxu0 }
 0x2f2   : > { %14002 = vst [vmem:[#allocation22_spill] sm:$0xff] %v11853_v28  ;;  %v11855_v19 = vpop.f32.mrf.mxu1  ;;  %v11857_v46 = vadd.f32 %v9754_v48, %v2107_v43 }
 0x2f3   : > { %14003 = vst [vmem:[#allocation21_spill] sm:$0xff] %v11855_v19  ;;  %v9707_v8 = vpop.f32.mrf.mxu0  ;;  %10006 = vmatmul.mubr.msk.f32.gmra.mxu0 %vm917_vm3, %v11490_v60 }
 0x2f4   : > { %v9757_v30 = vpop.f32.mrf.mxu1  ;;  %v2109_v31 = vadd.f32 %v9707_v8, %v11686_v32  ;;  %10008 = vmatprep.mubr.msk.f32.mxu0 %vm917_vm3, %v4093_v61 }
 0x2f5   : > { %v11863_v4 = vpop.f32.mrf.mxu0 }
 0x2f6   : > { %14004 = vst [vmem:[#allocation25_spill] sm:$0xff] %v11863_v4  ;;  %v11865_v51 = vpop.f32.mrf.mxu1  ;;  %v11867_v16 = vadd.f32 %v9757_v30, %v2109_v31 }
 0x2f7   : > { %14005 = vst [vmem:[#allocation24_spill] sm:$0xff] %v11865_v51  ;;  %v9710_v19 = vpop.f32.mrf.mxu0  ;;  %10009 = vmatmul.mubr.msk.f32.gmra.mxu0 %vm917_vm3, %v4094_v0 }
 0x2f8   : > { %v9760_v28 = vpop.f32.mrf.mxu1  ;;  %v2111_v48 = vadd.f32 %v9710_v19, %v11696_v25  ;;  %10063 = vmatprep.mubr.msk.f32.mxu0 %vm917_vm3, %v4556_v50  ;;  %v8596_v50 = vld [vmem:[%s13851_s7 + $0x8] sm:$0xf] }
 0x2f9   : > { %v11871_v43 = vpop.f32.mrf.mxu0  ;;  %10111 = vmatprep.subr.msk.mxu1 %vm1169_vm2, %v8596_v50 }
 0x2fa   : > { %14006 = vst [vmem:[#allocation29_spill] sm:$0xff] %v11871_v43  ;;  %v11873_v60 = vpop.f32.mrf.mxu1  ;;  %v11875_v32 = vadd.f32 %v9760_v28, %v2111_v48 }
 0x2fb   : > { %14007 = vst [vmem:[#allocation27_spill] sm:$0xff] %v11873_v60  ;;  %v9765_v8 = vpop.f32.mrf.mxu0 }
 0x2fc   : > { %v11877_v61 = vpop.f32.mrf.mxu1  ;;  %v11880_v4 = vadd.f32 %v9765_v8, %v11713_v13 }
 0x2fd   : > { %v11882_v30 = vpop.f32.mrf.mxu0 }
 0x2fe   : > { %v11884_v31 = vpop.f32.mrf.mxu1 }
 0x2ff   : > { %v9768_v51 = vpop.f32.mrf.mxu0 }
 0x300   : > { %v11886_v0 = vpop.f32.mrf.mxu1  ;;  %v11889_v25 = vadd.f32 %v9768_v51, %v11722_v36 }
 0x301   : > { %v11891_v19 = vpop.f32.mrf.mxu0 }
 0x302   : > { %v11893_v28 = vpop.f32.mrf.mxu1 }
 0x303   : > { %v9771_v48 = vpop.f32.mrf.mxu0 }
 0x304   : > { %v11895_v60 = vpop.f32.mrf.mxu1  ;;  %v11898_v13 = vadd.f32 %v9771_v48, %v11734_v22  ;;  %v4590_v22 = vld [vmem:[#allocation2 + $0x9] sm:$0xff] }
 0x305   : > { %v11900_v8 = vpop.f32.mrf.mxu0  ;;  %v4557_v48 = vld [vmem:[#allocation2 + $0x8] sm:$0xff]  ;;  %10014 = vmatmul.mubr.msk.f32.vlgmr.msra.gmra.mxu1 %vm917_vm3, %v4590_v22 }
 0x306   : > { %v11902_v43 = vpop.f32.mrf.mxu1  ;;  %10064 = vmatmul.mubr.msk.f32.vlgmr.msra.gmra.mxu0 %vm917_vm3, %v4557_v48  ;;  %10112 = vmatpush3.msk.msra.mxu1 %vm1169_vm2, %v8596_v50 }
 0x307   : > { %v9774_v36 = vpop.f32.mrf.mxu0 }
 0x308   : > { %v11907_v51 = vpop.f32.mrf.mxu1  ;;  %v11911_v14 = vadd.f32 %v9774_v36, %v11746_v58 }
 0x309   : > { %v11915_v59 = vpop.f32.mrf.mxu0 }
 0x30a   : > { %v11917_v38 = vpop.f32.mrf.mxu1 }
 0x30b   : > { %v9777_v27 = vpop.f32.mrf.mxu0 }
 0x30c   : > { %v11922_v35 = vpop.f32.mrf.mxu1  ;;  %v11925_v58 = vadd.f32 %v9777_v27, %v11762_v20 }
 0x30d   : > { %v11927_v7 = vpop.f32.mrf.mxu0 }
 0x30e   : > { %v11929_v12 = vpop.f32.mrf.mxu1 }
 0x30f   : > { %14008 = vst [vmem:[#allocation32_spill] sm:$0xff] %v11929_v12  ;;  %v9780_v36 = vpop.f32.mrf.mxu0 }
 0x310   : > { %v11931_v23 = vpop.f32.mrf.mxu1  ;;  %v11934_v42 = vadd.f32 %v9780_v36, %v11775_v29 }
 0x311   : > { %14009 = vst [vmem:[#allocation31_spill] sm:$0xff] %v11931_v23  ;;  %v11939_v22 = vpop.f32.mrf.mxu0 }
 0x312   : > { %14010 = vst [vmem:[#allocation33_spill] sm:$0xff] %v11934_v42  ;;  %14011 = vst [vmem:[#allocation34_spill] sm:$0xff] %v11939_v22  ;;  %v11941_v48 = vpop.f32.mrf.mxu1 }
 0x313   : > { %14012 = vst [vmem:[#allocation35_spill] sm:$0xff] %v11941_v48  ;;  %v9783_v20 = vpop.f32.mrf.mxu0 }
 0x314   : > { %v11945_v27 = vpop.f32.mrf.mxu1  ;;  %v11948_v23 = vadd.f32 %v9783_v20, %v11787_v26 }
 0x315   : > { %14013 = vst [vmem:[#allocation36_spill] sm:$0xff] %v11945_v27  ;;  %v11950_v29 = vpop.f32.mrf.mxu0 }
 0x316   : > { %14014 = vst [vmem:[#allocation37_spill] sm:$0xff] %v11948_v23  ;;  %14015 = vst [vmem:[#allocation38_spill] sm:$0xff] %v11950_v29  ;;  %v11952_v36 = vpop.f32.mrf.mxu1 }
 0x317   : > { %14016 = vst [vmem:[#allocation39_spill] sm:$0xff] %v11952_v36  ;;  %v9786_v42 = vpop.f32.mrf.mxu0 }
 0x318   : > { %v11954_v55 = vpop.f32.mrf.mxu1  ;;  %v11957_v5 = vadd.f32 %v9786_v42, %v11797_v18 }
 0x319   : > { %14017 = vst [vmem:[#allocation40_spill] sm:$0xff] %v11954_v55  ;;  %v11959_v48 = vpop.f32.mrf.mxu0 }
 0x31a   : > { %14018 = vst [vmem:[#allocation41_spill] sm:$0xff] %v11957_v5  ;;  %14019 = vst [vmem:[#allocation42_spill] sm:$0xff] %v11959_v48  ;;  %v11961_v45 = vpop.f32.mrf.mxu1 }
 0x31b   : > { %14020 = vst [vmem:[#allocation43_spill] sm:$0xff] %v11961_v45  ;;  %v9789_v50 = vpop.f32.mrf.mxu0 }
 0x31c   : > { %v11963_v22 = vpop.f32.mrf.mxu1  ;;  %v11966_v26 = vadd.f32 %v9789_v50, %v11809_v11 }
 0x31d   : > { %14021 = vst [vmem:[#allocation44_spill] sm:$0xff] %v11963_v22  ;;  %v11968_v20 = vpop.f32.mrf.mxu0 }
 0x31e   : > { %14022 = vst [vmem:[#allocation45_spill] sm:$0xff] %v11966_v26  ;;  %14023 = vst [vmem:[#allocation46_spill] sm:$0xff] %v11968_v20  ;;  %v11970_v27 = vpop.f32.mrf.mxu1 }
 0x31f   : > { %14024 = vst [vmem:[#allocation47_spill] sm:$0xff] %v11970_v27  ;;  %v9792_v36 = vpop.f32.mrf.mxu0 }
 0x320   : > { %v11972_v23 = vpop.f32.mrf.mxu1  ;;  %v11975_v42 = vadd.f32 %v9792_v36, %v11820_v33 }
 0x321   : > { %14025 = vst [vmem:[#allocation48_spill] sm:$0xff] %v11972_v23  ;;  %v11977_v18 = vpop.f32.mrf.mxu0 }
 0x322   : > { %14026 = vst [vmem:[#allocation49_spill] sm:$0xff] %v11975_v42  ;;  %14027 = vst [vmem:[#allocation50_spill] sm:$0xff] %v11977_v18  ;;  %v11979_v55 = vpop.f32.mrf.mxu1 }
 0x323   : > { %14028 = vst [vmem:[#allocation51_spill] sm:$0xff] %v11979_v55  ;;  %v9795_v45 = vpop.f32.mrf.mxu0 }
 0x324   : > { %v11981_v5 = vpop.f32.mrf.mxu1  ;;  %v11984_v11 = vadd.f32 %v9795_v45, %v11829_v2 }
 0x325   : > { %14029 = vst [vmem:[#allocation52_spill] sm:$0xff] %v11981_v5  ;;  %v11986_v50 = vpop.f32.mrf.mxu0 }
 0x326   : > { %14030 = vst [vmem:[#allocation53_spill] sm:$0xff] %v11984_v11  ;;  %14031 = vst [vmem:[#allocation54_spill] sm:$0xff] %v11986_v50  ;;  %v11988_v22 = vpop.f32.mrf.mxu1 }
 0x327   : > { %14032 = vst [vmem:[#allocation55_spill] sm:$0xff] %v11988_v22  ;;  %v9798_v27 = vpop.f32.mrf.mxu0 }
 0x328   : > { %v11990_v26 = vpop.f32.mrf.mxu1  ;;  %v11993_v33 = vadd.f32 %v9798_v27, %v11838_v41 }
 0x329   : > { %14033 = vst [vmem:[#allocation56_spill] sm:$0xff] %v11990_v26  ;;  %v11995_v36 = vpop.f32.mrf.mxu0 }
 0x32a   : > { %14034 = vst [vmem:[#allocation57_spill] sm:$0xff] %v11993_v33  ;;  %14035 = vst [vmem:[#allocation58_spill] sm:$0xff] %v11995_v36  ;;  %v11997_v23 = vpop.f32.mrf.mxu1 }
 0x32b   : > { %14036 = vst [vmem:[#allocation59_spill] sm:$0xff] %v11997_v23  ;;  %v9801_v55 = vpop.f32.mrf.mxu0 }
 0x32c   : > { %v11999_v42 = vpop.f32.mrf.mxu1  ;;  %v12002_v45 = vadd.f32 %v9801_v55, %v11847_v44 }
 0x32d   : > { %14037 = vst [vmem:[#allocation60_spill] sm:$0xff] %v11999_v42  ;;  %v12004_v2 = vpop.f32.mrf.mxu0 }
 0x32e   : > { %14038 = vst [vmem:[#allocation61_spill] sm:$0xff] %v12002_v45  ;;  %14039 = vst [vmem:[#allocation62_spill] sm:$0xff] %v12004_v2  ;;  %v12006_v5 = vpop.f32.mrf.mxu1 }
 0x32f   : > { %14040 = vst [vmem:[#allocation63_spill] sm:$0xff] %v12006_v5  ;;  %v9804_v22 = vpop.f32.mrf.mxu0 }
 0x330   : > { %v12008_v11 = vpop.f32.mrf.mxu1  ;;  %v12011_v41 = vadd.f32 %v9804_v22, %v11857_v46 }
 0x331   : > { %14041 = vst [vmem:[#allocation64_spill] sm:$0xff] %v12008_v11  ;;  %v12013_v27 = vpop.f32.mrf.mxu0 }
 0x332   : > { %14042 = vst [vmem:[#allocation65_spill] sm:$0xff] %v12011_v41  ;;  %14043 = vst [vmem:[#allocation66_spill] sm:$0xff] %v12013_v27  ;;  %v12015_v26 = vpop.f32.mrf.mxu1 }
 0x333   : > { %14044 = vst [vmem:[#allocation67_spill] sm:$0xff] %v12015_v26  ;;  %v9807_v23 = vpop.f32.mrf.mxu0 }
 0x334   : > { %v12017_v33 = vpop.f32.mrf.mxu1  ;;  %v12020_v55 = vadd.f32 %v9807_v23, %v11867_v16 }
 0x335   : > { %14045 = vst [vmem:[#allocation68_spill] sm:$0xff] %v12017_v33  ;;  %v12022_v44 = vpop.f32.mrf.mxu0 }
 0x336   : > { %14046 = vst [vmem:[#allocation69_spill] sm:$0xff] %v12020_v55  ;;  %14047 = vst [vmem:[#allocation70_spill] sm:$0xff] %v12022_v44  ;;  %v12024_v42 = vpop.f32.mrf.mxu1  ;;  %v12063_v44 = vld [vmem:[%s13851_s7 + $0x10] sm:$0xf] }
 0x337   : > { %14048 = vst [vmem:[#allocation71_spill] sm:$0xff] %v12024_v42  ;;  %v9810_v5 = vpop.f32.mrf.mxu0  ;;  %14053 = vst [vmem:[#allocation76_spill] sm:$0xff] %v12063_v44  ;;  %10211 = vmatprep.subr.msk.mxu1 %vm1169_vm2, %v12063_v44 }
 0x338   : > { %v12026_v45 = vpop.f32.mrf.mxu1  ;;  %v12029_v46 = vadd.f32 %v9810_v5, %v11875_v32  ;;  %v8630_v32 = vld [vmem:[%s13851_s7 + $0xc] sm:$0xf] }
 0x339   : > { %14049 = vst [vmem:[#allocation72_spill] sm:$0xff] %v12026_v45  ;;  %v12031_v22 = vpop.f32.mrf.mxu0  ;;  %10161 = vmatprep.subr.msk.mxu0 %vm1169_vm2, %v8630_v32 }
 0x33a   : > { %14050 = vst [vmem:[#allocation73_spill] sm:$0xff] %v12029_v46  ;;  %14051 = vst [vmem:[#allocation74_spill] sm:$0xff] %v12031_v22  ;;  %v12033_v11 = vpop.f32.mrf.mxu1  ;;  %10162 = vmatpush3.msk.msra.mxu0 %vm1169_vm2, %v8630_v32 }
 0x33b   : > { %14052 = vst [vmem:[#allocation75_spill] sm:$0xff] %v12033_v11  ;;  %v9865_v26 = vpop.f32.mrf.mxu0 }
 0x33c   : > { %v12035_v41 = vpop.f32.mrf.mxu1 }
 0x33d   : > { %v3482_v33 = vpop.f32.mrf.mxu0 }
 0x33e   : > { %v12037_v23 = vpop.f32.mrf.mxu1 }
 0x33f   : > { %v12039_v16 = vpop.f32.mrf.mxu0 }
 0x340   : > { %v12043_v42 = vpop.f32.mrf.mxu1 }
 0x341   : > { %v12041_v55 = vpop.f32.mrf.mxu0 }
 0x342   : > { %v12052_v11 = vpop.f32.mrf.mxu1 }
 0x343   : > { %v12045_v45 = vpop.f32.mrf.mxu0 }
 0x344   : > { %v12067_v27 = vpop.f32.mrf.mxu1 }
 0x345   : > { %v12047_v5 = vpop.f32.mrf.mxu0 }
 0x346   : > { %v12073_v50 = vpop.f32.mrf.mxu1 }
 0x347   : > { %v12054_v46 = vpop.f32.mrf.mxu0 }
 0x348   : > { %v12079_v20 = vpop.f32.mrf.mxu1 }
 0x349   : > { %v12058_v22 = vpop.f32.mrf.mxu0  ;;  %14058 = vst [vmem:[#allocation81_spill] sm:$0xff] %v12079_v20 }
 0x34a   : > { %v12085_v12 = vpop.f32.mrf.mxu1 }
 0x34b   : > { %v12069_v2 = vpop.f32.mrf.mxu0  ;;  %14061 = vst [vmem:[#allocation84_spill] sm:$0xff] %v12085_v12 }
 0x34c   : > { %14054 = vst [vmem:[#allocation77_spill] sm:$0xff] %v12069_v2  ;;  %v12091_v2 = vpop.f32.mrf.mxu1 }
 0x34d   : > { %v12071_v36 = vpop.f32.mrf.mxu0  ;;  %14064 = vst [vmem:[#allocation87_spill] sm:$0xff] %v12091_v2 }
 0x34e   : > { %14055 = vst [vmem:[#allocation78_spill] sm:$0xff] %v12071_v36 }
 0x34f   : > { %v12075_v18 = vpop.f32.mrf.mxu0 }
 0x350   : > { %14056 = vst [vmem:[#allocation79_spill] sm:$0xff] %v12075_v18  ;;  %v12097_v18 = vpop.f32.mrf.mxu1 }
 0x351   : > { %v12077_v32 = vpop.f32.mrf.mxu0  ;;  %14067 = vst [vmem:[#allocation90_spill] sm:$0xff] %v12097_v18 }
 0x352   : > { %14057 = vst [vmem:[#allocation80_spill] sm:$0xff] %v12077_v32 }
 0x353   : > { %v12081_v48 = vpop.f32.mrf.mxu0 }
 0x354   : > { %14059 = vst [vmem:[#allocation82_spill] sm:$0xff] %v12081_v48  ;;  %v12103_v48 = vpop.f32.mrf.mxu1 }
 0x355   : > { %v12083_v29 = vpop.f32.mrf.mxu0  ;;  %14070 = vst [vmem:[#allocation93_spill] sm:$0xff] %v12103_v48 }
 0x356   : > { %14060 = vst [vmem:[#allocation83_spill] sm:$0xff] %v12083_v29 }
 0x357   : > { %v12087_v44 = vpop.f32.mrf.mxu0 }
 0x358   : > { %14062 = vst [vmem:[#allocation85_spill] sm:$0xff] %v12087_v44  ;;  %v12109_v44 = vpop.f32.mrf.mxu1 }
 0x359   : > { %v12089_v62 = vpop.f32.mrf.mxu0  ;;  %14073 = vst [vmem:[#allocation96_spill] sm:$0xff] %v12109_v44 }
 0x35a   : > { %14063 = vst [vmem:[#allocation86_spill] sm:$0xff] %v12089_v62 }
 0x35b   : > { %v12093_v36 = vpop.f32.mrf.mxu0 }
 0x35c   : > { %14065 = vst [vmem:[#allocation88_spill] sm:$0xff] %v12093_v36  ;;  %v12117_v36 = vpop.f32.mrf.mxu1 }
 0x35d   : > { %v12095_v56 = vpop.f32.mrf.mxu0 }
 0x35e   : > { %14066 = vst [vmem:[#allocation89_spill] sm:$0xff] %v12095_v56  ;;  %v1564_v56 = vadd.f32 %v11510_v3, %v11508_v63  ;;  %v2472_v3 = vadd.f32 %v11720_v9, %v11725_v53  ;;  %v3253_v9 = vadd.f32 %v11886_v0, %v11889_v25  ;;  %v12167_v25 = vld [vmem:[%s13850_s6] ss:$0 sm:$0xff] }
 0x35f   : > { %v12099_v32 = vpop.f32.mrf.mxu0 }
 0x360   : > { %14068 = vst [vmem:[#allocation91_spill] sm:$0xff] %v12099_v32 }
 0x361   : > { %v12101_v20 = vpop.f32.mrf.mxu0 }
 0x362   : > { %14069 = vst [vmem:[#allocation92_spill] sm:$0xff] %v12101_v20  ;;  %v2080_v20 = vadd.f32 %v11709_v47, %v1564_v56  ;;  %v3251_v56 = vadd.f32 %v11877_v61, %v11880_v4 }
 0x363   : > { %v12105_v29 = vpop.f32.mrf.mxu0 }
 0x364   : > { %14071 = vst [vmem:[#allocation94_spill] sm:$0xff] %v12105_v29  ;;  %v12124_v29 = vpop.f32.mrf.mxu1  ;;  %v2470_v44 = vadd.f32 %v11711_v49, %v2080_v20  ;;  %v2862_v49 = vadd.f32 %v11891_v19, %v2472_v3  ;;  %v3642_v20 = vadd.f32 %v9865_v26, %v3251_v56  ;;  %v3644_v26 = vadd.f32 %v12039_v16, %v3253_v9 }
 0x365   : > { %v12107_v12 = vpop.f32.mrf.mxu0  ;;  %v12178_v3 = vadd.f32 %v11624_v17, %v11622_v52  ;;  %v12191_v52 = vadd.f32 %v11638_v40, %v11636_v1  ;;  %v12201_v9 = vadd.f32 %v11652_v37, %v11650_v6  ;;  %v2480_v1 = vadd.f32 %v11773_v10, %v11778_v21  ;;  %v14078_v37 = vld [vmem:[#allocation23_spill] sm:$0xff]  ;;  %v14080_v10 = vld [vmem:[#allocation32_spill] sm:$0xff] }
 0x366   : > { %14072 = vst [vmem:[#allocation95_spill] sm:$0xff] %v12107_v12  ;;  %v12132_v18 = vpop.f32.mrf.mxu1  ;;  %v4032_v19 = vadd.f32 %v12035_v41, %v3642_v20  ;;  %v3259_v40 = vadd.f32 %v11922_v35, %v11925_v58  ;;  %v14081_v35 = vld [vmem:[#allocation34_spill] sm:$0xff] }
 0x367   : > { %v12111_v62 = vpop.f32.mrf.mxu0  ;;  %v2870_v58 = vadd.f32 %v14081_v35, %v2480_v1  ;;  %v14095_v1 = vld [vmem:[#allocation38_spill] sm:$0xff] }
 0x368   : > { %14074 = vst [vmem:[#allocation97_spill] sm:$0xff] %v12111_v62 }
 0x369   : > { %v12113_v2 = vpop.f32.mrf.mxu0 }
 0x36a   : > { %14075 = vst [vmem:[#allocation98_spill] sm:$0xff] %v12113_v2  ;;  %v2860_v2 = vadd.f32 %v11882_v30, %v2470_v44  ;;  %v2474_v30 = vadd.f32 %v11732_v39, %v11737_v34  ;;  %v12146_v44 = vpop.f32.mrf.mxu1  ;;  %v2476_v39 = vadd.f32 %v11744_v54, %v11749_v57  ;;  %v3255_v34 = vadd.f32 %v11895_v60, %v11898_v13 }
 0x36b   : > { %v12119_v32 = vpop.f32.mrf.mxu0  ;;  %v4034_v13 = vadd.f32 %v12043_v42, %v3644_v26 }
 0x36c   : > { %v2864_v4 = vadd.f32 %v11900_v8, %v2474_v30  ;;  %v2866_v54 = vadd.f32 %v11915_v59, %v2476_v39  ;;  %v3646_v57 = vadd.f32 %v12045_v45, %v3255_v34  ;;  %v14083_v34 = vld [vmem:[#allocation81_spill] sm:$0xff] }
 0x36d   : > { %v12122_v48 = vpop.f32.mrf.mxu0 }
 0x36e   : > { %v3256_v17 = vadd.f32 %v11917_v38, %v2866_v54  ;;  %v14085_v54 = vld [vmem:[#allocation30_spill] sm:$0xff] }
 0x36f   : > { %v12126_v12 = vpop.f32.mrf.mxu0 }
 0x370   : > { %14076 = vst [vmem:[#allocation99_spill] sm:$0xff] %v12126_v12  ;;  %v3250_v12 = vadd.f32 %v11884_v31, %v2860_v2  ;;  %v3252_v31 = vadd.f32 %v11893_v28, %v2862_v49  ;;  %v12162_v2 = vpop.f32.mrf.mxu1 }
 0x371   : > { %v12129_v62 = vpop.f32.mrf.mxu0 }
 0x372   : > { %14077 = vst [vmem:[#allocation100_spill] sm:$0xff] %v12129_v62  ;;  %v3641_v53 = vadd.f32 %v3482_v33, %v3250_v12  ;;  %v3643_v8 = vadd.f32 %v12041_v55, %v3252_v31  ;;  %v3254_v33 = vadd.f32 %v11902_v43, %v2864_v4  ;;  %v2478_v55 = vadd.f32 %v11759_v24, %v11765_v15  ;;  %v14079_v31 = vld [vmem:[#allocation28_spill] sm:$0xff] }
 0x373   : > { %v12134_v63 = vpop.f32.mrf.mxu0  ;;  %v3257_v43 = vadd.f32 %v11907_v51, %v11911_v14  ;;  %v4036_v15 = vadd.f32 %v12067_v27, %v3646_v57 }
 0x374   : > { %v4031_v28 = vadd.f32 %v12037_v23, %v3641_v53  ;;  %v3645_v59 = vadd.f32 %v12047_v5, %v3254_v33  ;;  %v12185_v23 = vpop.f32.mrf.mxu1  ;;  %v4033_v42 = vadd.f32 %v12052_v11, %v3643_v8  ;;  %v2868_v24 = vadd.f32 %v11927_v7, %v2478_v55  ;;  %v14084_v33 = vld [vmem:[#allocation26_spill] sm:$0xff]  ;;  %v14089_v55 = vld [vmem:[#allocation31_spill] sm:$0xff] }
 0x375   : > { %v12140_v47 = vpop.f32.mrf.mxu0  ;;  %v3648_v51 = vadd.f32 %v12054_v46, %v3257_v43  ;;  %v3647_v46 = vadd.f32 %v12058_v22, %v3256_v17  ;;  %v12230_v57 = vadd.f32 %v14085_v54, %v14084_v33 }
 0x376   : > { %v4035_v38 = vadd.f32 %v12073_v50, %v3645_v59  ;;  %v12208_v7 = vpop.f32.mrf.mxu1  ;;  %v3258_v21 = vadd.f32 %v14080_v10, %v2868_v24  ;;  %v14082_v50 = vld [vmem:[#allocation77_spill] sm:$0xff]  ;;  %v14090_v59 = vld [vmem:[#allocation78_spill] sm:$0xff] }
 0x377   : > { %v12148_v62 = vpop.f32.mrf.mxu0  ;;  %v3650_v26 = vadd.f32 %v14082_v50, %v3259_v40  ;;  %v14098_v10 = vld [vmem:[#allocation5_spill] sm:$0xff]  ;;  %v14100_v50 = vld [vmem:[#allocation11_spill] sm:$0xff] }
 0x379   : > { %v12153_v61 = vpop.f32.mrf.mxu0 }
 0x37b   : > { %v9965_v0 = vpop.f32.mrf.mxu0 }
 0x37c   : > { %v4422_v12 = vadd.f32 %v9965_v0, %v4032_v19  ;;  %v12215_v19 = vadd.f32 %v14079_v31, %v14078_v37  ;;  %v4038_v0 = vadd.f32 %v14083_v34, %v3648_v51  ;;  %v14093_v51 = vld [vmem:[#allocation4_spill] sm:$0xff]  ;;  %v14102_v34 = vld [vmem:[#allocation37_spill] sm:$0xff] }
 0x37d   : > { %v4262_v60 = vpop.f32.mrf.mxu0 }
 0x37e   : > { %v4461_v41 = vadd.f32 %v12167_v25, %v4422_v12  ;;  %v4421_v16 = vadd.f32 %v4262_v60, %v4031_v28  ;;  %v12226_v12 = vld [vmem:[%s13851_s7 + $0x14] sm:$0xf]  ;;  %v14086_v60 = vld [vmem:[#allocation8_spill] sm:$0xff] }
 0x37f   : > { %v9968_v45 = vpop.f32.mrf.mxu0  ;;  %10261 = vmatprep.subr.msk.mxu0 %vm1169_vm2, %v12226_v12 }
 0x380   : > { %v4493_v56 = vmax.f32 %v4461_v41, 0.0  ;;  %v4460_v49 = vadd.f32 %v12167_v25, %v4421_v16  ;;  %v4424_v20 = vadd.f32 %v9968_v45, %v4034_v13  ;;  %v14087_v13 = vld [vmem:[#allocation7_spill] sm:$0xff]  ;;  %v14088_v16 = vld [vmem:[#allocation33_spill] sm:$0xff]  ;;  %v3649_v45 = vadd.f32 %v14090_v59, %v3258_v21  ;;  %v14099_v21 = vld [vmem:[#allocation6_spill] sm:$0xff] }
 0x381   : > { %v4272_v14 = vpop.f32.mrf.mxu0  ;;  %v2482_v41 = vadd.f32 %v14087_v13, %v14086_v60  ;;  %v3261_v43 = vadd.f32 %v14089_v55, %v14088_v16  ;;  %v12256_v35 = vadd.f32 %v14099_v21, %v14098_v10  ;;  %v14115_v21 = vld [vmem:[#allocation83_spill] sm:$0xff] }
 0x382   : > { %4525 = vst.msk [vmem:[#allocation2 + $0x21] sm:$0xff] %vm917_vm3, %v4493_v56  ;;  %v4492_v11 = vmax.f32 %v4460_v49, 0.0  ;;  %v4463_v5 = vadd.f32 %v12167_v25, %v4424_v20  ;;  %v4423_v30 = vadd.f32 %v4272_v14, %v4033_v42  ;;  %v12237_v42 = vpop.f32.mrf.mxu1  ;;  %v14091_v49 = vld [vmem:[#allocation84_spill] sm:$0xff]  ;;  %v14092_v14 = vld [vmem:[#allocation3_spill] sm:$0xff] }
 0x383   : > { %v9971_v27 = vpop.f32.mrf.mxu0  ;;  %v4037_v20 = vadd.f32 %v14091_v49, %v3647_v46  ;;  %v2872_v40 = vadd.f32 %v14095_v1, %v2482_v41  ;;  %v14105_v41 = vld [vmem:[#allocation80_spill] sm:$0xff] }
 0x384   : > { %4524 = vst.msk [vmem:[#allocation2 + $0x19] sm:$0xff] %vm917_vm3, %v4492_v11  ;;  %v4495_v53 = vmax.f32 %v4463_v5, 0.0  ;;  %v4462_v4 = vadd.f32 %v12167_v25, %v4423_v30  ;;  %v4426_v6 = vadd.f32 %v9971_v27, %v4036_v15  ;;  %v12246_v11 = vadd.f32 %v14093_v51, %v14092_v14  ;;  %v14094_v5 = vld [vmem:[#allocation35_spill] sm:$0xff]  ;;  %v14109_v51 = vld [vmem:[#allocation93_spill] sm:$0xff] }
 0x385   : > { %v4282_v39 = vpop.f32.mrf.mxu0  ;;  %v3260_v30 = vadd.f32 %v14094_v5, %v2870_v58 }
 0x386   : > { %4527 = vst.msk [vmem:[#allocation2 + $0x39] sm:$0xff] %vm917_vm3, %v4495_v53  ;;  %v4494_v22 = vmax.f32 %v4462_v4, 0.0  ;;  %v4465_v28 = vadd.f32 %v12167_v25, %v4426_v6  ;;  %v4425_v8 = vadd.f32 %v4282_v39, %v4035_v38  ;;  %v14096_v38 = vld [vmem:[#allocation87_spill] sm:$0xff]  ;;  %v14101_v39 = vld [vmem:[#allocation9_spill] sm:$0xff] }
 0x387   : > { %v9974_v56 = vpop.f32.mrf.mxu0  ;;  %v4040_v27 = vadd.f32 %v14096_v38, %v3650_v26  ;;  %v14097_v4 = vld [vmem:[#allocation79_spill] sm:$0xff]  ;;  %v2484_v58 = vadd.f32 %v14101_v39, %v14100_v50  ;;  %v14104_v26 = vld [vmem:[#allocation90_spill] sm:$0xff]  ;;  %v3651_v16 = vadd.f32 %v14105_v41, %v3260_v30 }
 0x388   : > { %4526 = vst.msk [vmem:[#allocation2 + $0x31] sm:$0xff] %vm917_vm3, %v4494_v22  ;;  %v4497_v17 = vmax.f32 %v4465_v28, 0.0  ;;  %v4464_v24 = vadd.f32 %v12167_v25, %v4425_v8  ;;  %v4428_v15 = vadd.f32 %v9974_v56, %v4038_v0  ;;  %v3652_v6 = vadd.f32 %v14097_v4, %v3261_v43  ;;  %v14103_v0 = vld [vmem:[#allocation36_spill] sm:$0xff]  ;;  %v12263_v8 = vpop.f32.mrf.mxu1  ;;  %v14106_v56 = vld [vmem:[#allocation39_spill] sm:$0xff]  ;;  %v14112_v4 = vld [vmem:[#allocation14_spill] sm:$0xff] }
 0x389   : > { %v4292_v53 = vpop.f32.mrf.mxu0  ;;  %v3263_v22 = vadd.f32 %v14103_v0, %v14102_v34  ;;  %v4039_v28 = vadd.f32 %v14104_v26, %v3649_v45  ;;  %v12278_v45 = vld [vmem:[#allocation2 + $0x21] sm:$0xff]  ;;  %v3262_v49 = vadd.f32 %v14106_v56, %v2872_v40 }
 0x38a   : > { %4529 = vst.msk [vmem:[#allocation2 + $0x51] sm:$0xff] %vm917_vm3, %v4497_v17  ;;  %v4496_v46 = vmax.f32 %v4464_v24, 0.0  ;;  %v4467_v37 = vadd.f32 %v12167_v25, %v4428_v15  ;;  %v4427_v31 = vadd.f32 %v4292_v53, %v4037_v20  ;;  %v14107_v20 = vld [vmem:[#allocation42_spill] sm:$0xff]  ;;  %v4042_v5 = vadd.f32 %v14109_v51, %v3652_v6  ;;  %v12297_v39 = vpop.f32.mrf.mxu1 }
 0x38b   : > { %v9977_v33 = vpop.f32.mrf.mxu0  ;;  %v12265_v54 = vld [vmem:[#allocation2 + $0x19] sm:$0xff]  ;;  %v2874_v17 = vadd.f32 %v14107_v20, %v2484_v58  ;;  %v14108_v24 = vld [vmem:[#allocation82_spill] sm:$0xff]  ;;  %v3653_v50 = vadd.f32 %v14115_v21, %v3262_v49 }
 0x38c   : > { %v12267_v60 = vld [vmem:[#allocation2 + $0x18] sm:$0xff]  ;;  %v12269_v13 = vld [vmem:[#allocation2 + $0x20] sm:$0xff]  ;;  %4528 = vst.msk [vmem:[#allocation2 + $0x49] sm:$0xff] %vm917_vm3, %v4496_v46  ;;  %v4499_v55 = vmax.f32 %v4467_v37, 0.0  ;;  %v4466_v43 = vadd.f32 %v12167_v25, %v4427_v31  ;;  %v4430_v59 = vadd.f32 %v9977_v33, %v4040_v27  ;;  %10016 = vmatprep.mubr.msk.f32.mxu1 %vm917_vm3, %v12265_v54  ;;  %v3654_v15 = vadd.f32 %v14108_v24, %v3263_v22  ;;  %v14110_v40 = vld [vmem:[#allocation10_spill] sm:$0xff] }
 0x38d   : > { %10066 = vmatprep.mubr.msk.f32.mxu0 %vm917_vm3, %v12267_v60  ;;  %v4302_v14 = vpop.f32.mrf.mxu0  ;;  %10017 = vmatmul.mubr.msk.f32.gmra.mxu1 %vm917_vm3, %v12278_v45  ;;  %v14111_v27 = vld [vmem:[#allocation12_spill] sm:$0xff]  ;;  %v2098_v46 = vadd.f32 %v14112_v4, %v12178_v3  ;;  %v14113_v37 = vld [vmem:[#allocation41_spill] sm:$0xff]  ;;  %v14126_v21 = vld [vmem:[#allocation86_spill] sm:$0xff] }
 0x38e   : > { %10067 = vmatmul.mubr.msk.f32.gmra.mxu0 %vm917_vm3, %v12269_v13  ;;  %4531 = vst.msk [vmem:[#allocation2 + $0x69] sm:$0xff] %vm917_vm3, %v4499_v55  ;;  %v4498_v30 = vmax.f32 %v4466_v43, 0.0  ;;  %v4469_v1 = vadd.f32 %v12167_v25, %v4430_v59  ;;  %v4429_v38 = vadd.f32 %v4302_v14, %v4039_v28  ;;  %v2486_v53 = vadd.f32 %v14111_v27, %v14110_v40  ;;  %v14114_v31 = vld [vmem:[#allocation40_spill] sm:$0xff]  ;;  %v14117_v55 = vld [vmem:[#allocation43_spill] sm:$0xff]  ;;  %v14118_v59 = vld [vmem:[#allocation46_spill] sm:$0xff] }
 0x38f   : > { %v3265_v10 = vadd.f32 %v14114_v31, %v14113_v37  ;;  %v9980_v6 = vpop.f32.mrf.mxu0  ;;  %v12299_v58 = vld [vmem:[#allocation2 + $0x31] sm:$0xff]  ;;  %v12312_v41 = vld [vmem:[#allocation2 + $0x39] sm:$0xff]  ;;  %v3264_v43 = vadd.f32 %v14117_v55, %v2874_v17  ;;  %v4043_v27 = vadd.f32 %v12124_v29, %v3653_v50 }
 0x390   : > { %v12301_v34 = vld [vmem:[#allocation2 + $0x30] sm:$0xff]  ;;  %v12303_v0 = vld [vmem:[#allocation2 + $0x38] sm:$0xff]  ;;  %4530 = vst.msk [vmem:[#allocation2 + $0x61] sm:$0xff] %vm917_vm3, %v4498_v30  ;;  %v4501_v28 = vmax.f32 %v4469_v1, 0.0  ;;  %v4468_v3 = vadd.f32 %v12167_v25, %v4429_v38  ;;  %v4432_v33 = vadd.f32 %v9980_v6, %v4042_v5  ;;  %10019 = vmatprep.mubr.msk.f32.mxu1 %vm917_vm3, %v12299_v58  ;;  %v2876_v56 = vadd.f32 %v14118_v59, %v2486_v53  ;;  %v14119_v20 = vld [vmem:[#allocation85_spill] sm:$0xff]  ;;  %v12330_v53 = vpop.f32.mrf.mxu1 }
 0x391   : > { %v14116_v22 = vld [vmem:[#allocation96_spill] sm:$0xff]  ;;  %10069 = vmatprep.mubr.msk.f32.mxu0 %vm917_vm3, %v12301_v34  ;;  %v4312_v49 = vpop.f32.mrf.mxu0  ;;  %10020 = vmatmul.mubr.msk.f32.gmra.mxu1 %vm917_vm3, %v12312_v41  ;;  %v3656_v24 = vadd.f32 %v14119_v20, %v3265_v10  ;;  %v14120_v17 = vld [vmem:[#allocation13_spill] sm:$0xff]  ;;  %v3655_v6 = vadd.f32 %v14126_v21, %v3264_v43  ;;  %v14127_v50 = vld [vmem:[#allocation47_spill] sm:$0xff] }
 0x392   : > { %v4041_v26 = vadd.f32 %v14116_v22, %v3651_v16  ;;  %v4044_v16 = vadd.f32 %v12117_v36, %v3654_v15  ;;  %10070 = vmatmul.mubr.msk.f32.gmra.mxu0 %vm917_vm3, %v12303_v0  ;;  %4533 = vst.msk [vmem:[#allocation2 + $0x81] sm:$0xff] %vm917_vm3, %v4501_v28  ;;  %v4500_v14 = vmax.f32 %v4468_v3, 0.0  ;;  %v4471_v51 = vadd.f32 %v12167_v25, %v4432_v33  ;;  %v14121_v1 = vld [vmem:[#allocation16_spill] sm:$0xff]  ;;  %v14122_v15 = vld [vmem:[#allocation45_spill] sm:$0xff]  ;;  %v14128_v28 = vld [vmem:[#allocation50_spill] sm:$0xff] }
 0x393   : > { %v2488_v30 = vadd.f32 %v14120_v17, %v2098_v46  ;;  %v2100_v36 = vadd.f32 %v14121_v1, %v12191_v52  ;;  %v14123_v38 = vld [vmem:[#allocation44_spill] sm:$0xff]  ;;  %v9983_v4 = vpop.f32.mrf.mxu0  ;;  %v12332_v37 = vld [vmem:[#allocation2 + $0x49] sm:$0xff]  ;;  %v4046_v59 = vadd.f32 %v12132_v18, %v3656_v24  ;;  %v14132_v17 = vld [vmem:[#allocation49_spill] sm:$0xff] }
 0x394   : > { %v4431_v5 = vadd.f32 %v4312_v49, %v4041_v26  ;;  %v3267_v40 = vadd.f32 %v14123_v38, %v14122_v15  ;;  %v12334_v31 = vld [vmem:[#allocation2 + $0x48] sm:$0xff]  ;;  %v12336_v10 = vld [vmem:[#allocation2 + $0x50] sm:$0xff]  ;;  %4532 = vst.msk [vmem:[#allocation2 + $0x79] sm:$0xff] %vm917_vm3, %v4500_v14  ;;  %v4503_v46 = vmax.f32 %v4471_v51, 0.0  ;;  %v4434_v22 = vadd.f32 %v9983_v4, %v4044_v16  ;;  %10022 = vmatprep.mubr.msk.f32.mxu1 %vm917_vm3, %v12332_v37  ;;  %v14129_v33 = vld [vmem:[#allocation88_spill] sm:$0xff] }
 0x395   : > { %14124 = vst [vmem:[#allocation23_spill] sm:$0xff] %v12334_v31  ;;  %14125 = vst [vmem:[#allocation28_spill] sm:$0xff] %v12336_v10  ;;  %10072 = vmatprep.mubr.msk.f32.mxu0 %vm917_vm3, %v12334_v31  ;;  %v12345_v29 = vld [vmem:[#allocation2 + $0x51] sm:$0xff]  ;;  %v3266_v26 = vadd.f32 %v14127_v50, %v2876_v56  ;;  %v2878_v3 = vadd.f32 %v14128_v28, %v2488_v30  ;;  %v4322_v43 = vpop.f32.mrf.mxu0  ;;  %v14131_v51 = vld [vmem:[#allocation18_spill] sm:$0xff] }
 0x396   : > { %v4470_v52 = vadd.f32 %v12167_v25, %v4431_v5  ;;  %v3658_v55 = vadd.f32 %v14129_v33, %v3267_v40  ;;  %10023 = vmatmul.mubr.msk.f32.gmra.mxu1 %vm917_vm3, %v12345_v29  ;;  %10073 = vmatmul.mubr.msk.f32.gmra.mxu0 %vm917_vm3, %v12336_v10  ;;  %4535 = vst.msk [vmem:[#allocation2 + $0x99] sm:$0xff] %vm917_vm3, %v4503_v46  ;;  %v14130_v56 = vld [vmem:[#allocation15_spill] sm:$0xff]  ;;  %v14133_v30 = vld [vmem:[#allocation48_spill] sm:$0xff]  ;;  %v14134_v15 = vld [vmem:[#allocation89_spill] sm:$0xff]  ;;  %v12363_v40 = vpop.f32.mrf.mxu1 }
 0x397   : > { %v4473_v49 = vadd.f32 %v12167_v25, %v4434_v22  ;;  %v4433_v20 = vadd.f32 %v4322_v43, %v4043_v27  ;;  %v2490_v14 = vadd.f32 %v14130_v56, %v2100_v36  ;;  %v2102_v5 = vadd.f32 %v14131_v51, %v12201_v9  ;;  %v9986_v4 = vpop.f32.mrf.mxu0  ;;  %v12365_v18 = vld [vmem:[#allocation2 + $0x61] sm:$0xff]  ;;  %v14137_v22 = vld [vmem:[#allocation51_spill] sm:$0xff]  ;;  %v14141_v56 = vld [vmem:[#allocation20_spill] sm:$0xff] }
 0x398   : > { %v4502_v16 = vmax.f32 %v4470_v52, 0.0  ;;  %v3269_v1 = vadd.f32 %v14133_v30, %v14132_v17  ;;  %v3657_v38 = vadd.f32 %v14134_v15, %v3266_v26  ;;  %v12367_v24 = vld [vmem:[#allocation2 + $0x60] sm:$0xff]  ;;  %v12369_v21 = vld [vmem:[#allocation2 + $0x68] sm:$0xff]  ;;  %v4045_v27 = vadd.f32 %v12146_v44, %v3655_v6  ;;  %10025 = vmatprep.mubr.msk.f32.mxu1 %vm917_vm3, %v12365_v18  ;;  %v14139_v33 = vld [vmem:[#allocation91_spill] sm:$0xff]  ;;  %v12396_v30 = vpop.f32.mrf.mxu1 }
 0x399   : > { %14135 = vst [vmem:[#allocation32_spill] sm:$0xff] %v12367_v24  ;;  %14136 = vst [vmem:[#allocation34_spill] sm:$0xff] %v12369_v21  ;;  %v4505_v36 = vmax.f32 %v4473_v49, 0.0  ;;  %v4472_v9 = vadd.f32 %v12167_v25, %v4433_v20  ;;  %v4436_v46 = vadd.f32 %v9986_v4, %v4046_v59  ;;  %10075 = vmatprep.mubr.msk.f32.mxu0 %vm917_vm3, %v12367_v24  ;;  %v12378_v52 = vld [vmem:[#allocation2 + $0x69] sm:$0xff]  ;;  %v4332_v6 = vpop.f32.mrf.mxu0 }
 0x39a   : > { %4534 = vst.msk [vmem:[#allocation2 + $0x91] sm:$0xff] %vm917_vm3, %v4502_v16  ;;  %v3268_v50 = vadd.f32 %v14137_v22, %v2878_v3  ;;  %v14138_v26 = vld [vmem:[#allocation54_spill] sm:$0xff]  ;;  %v4048_v44 = vadd.f32 %v12162_v2, %v3658_v55  ;;  %10026 = vmatmul.mubr.msk.f32.gmra.mxu1 %vm917_vm3, %v12378_v52  ;;  %10076 = vmatmul.mubr.msk.f32.gmra.mxu0 %vm917_vm3, %v12369_v21  ;;  %v14140_v3 = vld [vmem:[#allocation17_spill] sm:$0xff] }
 0x39b   : > { %v2880_v28 = vadd.f32 %v14138_v26, %v2490_v14  ;;  %v3660_v43 = vadd.f32 %v14139_v33, %v3269_v1  ;;  %4537 = vst.msk [vmem:[#allocation2 + $0xb1] sm:$0xff] %vm917_vm3, %v4505_v36  ;;  %v4504_v59 = vmax.f32 %v4472_v9, 0.0  ;;  %v4475_v16 = vadd.f32 %v12167_v25, %v4436_v46  ;;  %v14142_v55 = vld [vmem:[#allocation53_spill] sm:$0xff]  ;;  %v14143_v14 = vld [vmem:[#allocation52_spill] sm:$0xff]  ;;  %v9989_v15 = vpop.f32.mrf.mxu0  ;;  %v14148_v26 = vld [vmem:[#allocation58_spill] sm:$0xff] }
 0x39c   : > { %v4435_v49 = vadd.f32 %v4332_v6, %v4045_v27  ;;  %v2492_v20 = vadd.f32 %v14140_v3, %v2102_v5  ;;  %v2104_v2 = vadd.f32 %v14141_v56, %v12215_v19  ;;  %v3271_v51 = vadd.f32 %v14143_v14, %v14142_v55  ;;  %v12398_v1 = vld [vmem:[#allocation2 + $0x79] sm:$0xff]  ;;  %v14149_v33 = vld [vmem:[#allocation94_spill] sm:$0xff] }
 0x39d   : > { %v4047_v17 = vadd.f32 %v12185_v23, %v3657_v38  ;;  %v12400_v4 = vld [vmem:[#allocation2 + $0x78] sm:$0xff]  ;;  %v12402_v36 = vld [vmem:[#allocation2 + $0x80] sm:$0xff]  ;;  %4536 = vst.msk [vmem:[#allocation2 + $0xa9] sm:$0xff] %vm917_vm3, %v4504_v59  ;;  %v4507_v5 = vmax.f32 %v4475_v16, 0.0  ;;  %v4438_v46 = vadd.f32 %v9989_v15, %v4048_v44  ;;  %10028 = vmatprep.mubr.msk.f32.mxu1 %vm917_vm3, %v12398_v1  ;;  %v14147_v38 = vld [vmem:[#allocation55_spill] sm:$0xff]  ;;  %v4342_v3 = vpop.f32.mrf.mxu0  ;;  %v4050_v44 = vadd.f32 %v12208_v7, %v3660_v43 }
 0x39e   : > { %14144 = vst [vmem:[#allocation77_spill] sm:$0xff] %v12400_v4  ;;  %14145 = vst [vmem:[#allocation81_spill] sm:$0xff] %v12402_v36  ;;  %v14146_v27 = vld [vmem:[#allocation92_spill] sm:$0xff]  ;;  %v4474_v19 = vadd.f32 %v12167_v25, %v4435_v49  ;;  %10078 = vmatprep.mubr.msk.f32.mxu0 %vm917_vm3, %v12400_v4  ;;  %v12411_v23 = vld [vmem:[#allocation2 + $0x81] sm:$0xff]  ;;  %v3270_v22 = vadd.f32 %v14147_v38, %v2880_v28  ;;  %v2882_v6 = vadd.f32 %v14148_v26, %v2492_v20  ;;  %v12429_v26 = vpop.f32.mrf.mxu1 }
 0x39f   : > { %v3659_v9 = vadd.f32 %v14146_v27, %v3268_v50  ;;  %v3662_v50 = vadd.f32 %v14149_v33, %v3271_v51  ;;  %10029 = vmatmul.mubr.msk.f32.gmra.mxu1 %vm917_vm3, %v12411_v23  ;;  %10079 = vmatmul.mubr.msk.f32.gmra.mxu0 %vm917_vm3, %v12402_v36  ;;  %4539 = vst.msk [vmem:[#allocation2 + $0xc9] sm:$0xff] %vm917_vm3, %v4507_v5  ;;  %v14150_v28 = vld [vmem:[#allocation19_spill] sm:$0xff]  ;;  %v14151_v20 = vld [vmem:[#allocation22_spill] sm:$0xff]  ;;  %v14152_v14 = vld [vmem:[#allocation57_spill] sm:$0xff]  ;;  %v9992_v33 = vpop.f32.mrf.mxu0 }
 0x3a0   : > { %v4506_v59 = vmax.f32 %v4474_v19, 0.0  ;;  %v4477_v16 = vadd.f32 %v12167_v25, %v4438_v46  ;;  %v4437_v49 = vadd.f32 %v4342_v3, %v4047_v17  ;;  %v2494_v56 = vadd.f32 %v14150_v28, %v2104_v2  ;;  %v14153_v51 = vld [vmem:[#allocation56_spill] sm:$0xff]  ;;  %v14154_v27 = vld [vmem:[#allocation95_spill] sm:$0xff]  ;;  %v14159_v28 = vld [vmem:[#allocation62_spill] sm:$0xff] }
 0x3a1   : > { %v2106_v55 = vadd.f32 %v14151_v20, %v12230_v57  ;;  %v3273_v15 = vadd.f32 %v14153_v51, %v14152_v14  ;;  %v3661_v38 = vadd.f32 %v14154_v27, %v3270_v22  ;;  %v12431_v7 = vld [vmem:[#allocation2 + $0x91] sm:$0xff]  ;;  %v4049_v17 = vadd.f32 %v12237_v42, %v3659_v9  ;;  %v12444_v46 = vld [vmem:[#allocation2 + $0x99] sm:$0xff]  ;;  %v4352_v9 = vpop.f32.mrf.mxu0 }
 0x3a2   : > { %v12433_v43 = vld [vmem:[#allocation2 + $0x90] sm:$0xff]  ;;  %v12435_v5 = vld [vmem:[#allocation2 + $0x98] sm:$0xff]  ;;  %4538 = vst.msk [vmem:[#allocation2 + $0xc1] sm:$0xff] %vm917_vm3, %v4506_v59  ;;  %v4509_v2 = vmax.f32 %v4477_v16, 0.0  ;;  %v4476_v57 = vadd.f32 %v12167_v25, %v4437_v49  ;;  %v4440_v19 = vadd.f32 %v9992_v33, %v4050_v44  ;;  %10031 = vmatprep.mubr.msk.f32.mxu1 %vm917_vm3, %v12431_v7  ;;  %14157 = vst [vmem:[#allocation8_spill] sm:$0xff] %v12444_v46 }
 0x3a3   : > { %14155 = vst [vmem:[#allocation26_spill] sm:$0xff] %v12433_v43  ;;  %14156 = vst [vmem:[#allocation30_spill] sm:$0xff] %v12435_v5  ;;  %10081 = vmatprep.mubr.msk.f32.mxu0 %vm917_vm3, %v12433_v43  ;;  %v14158_v22 = vld [vmem:[#allocation59_spill] sm:$0xff]  ;;  %v2884_v20 = vadd.f32 %v14159_v28, %v2494_v56  ;;  %v4052_v42 = vadd.f32 %v12263_v8, %v3662_v50  ;;  %10032 = vmatmul.mubr.msk.f32.gmra.mxu1 %vm917_vm3, %v12444_v46  ;;  %v14160_v44 = vld [vmem:[#allocation97_spill] sm:$0xff]  ;;  %v12462_v28 = vpop.f32.mrf.mxu1  ;;  %v9995_v46 = vpop.f32.mrf.mxu0 }
 0x3a4   : > { %v3272_v3 = vadd.f32 %v14158_v22, %v2882_v6  ;;  %10082 = vmatmul.mubr.msk.f32.gmra.mxu0 %vm917_vm3, %v12435_v5  ;;  %v3664_v59 = vadd.f32 %v14160_v44, %v3273_v15  ;;  %4541 = vst.msk [vmem:[#allocation2 + $0xe1] sm:$0xff] %vm917_vm3, %v4509_v2  ;;  %v4508_v16 = vmax.f32 %v4476_v57, 0.0  ;;  %v4479_v49 = vadd.f32 %v12167_v25, %v4440_v19  ;;  %v14161_v6 = vld [vmem:[#allocation21_spill] sm:$0xff]  ;;  %v14164_v27 = vld [vmem:[#allocation60_spill] sm:$0xff]  ;;  %v12464_v15 = vld [vmem:[#allocation2 + $0xa9] sm:$0xff] }
 0x3a5   : > { %v4439_v14 = vadd.f32 %v4352_v9, %v4049_v17  ;;  %v2496_v51 = vadd.f32 %v14161_v6, %v2106_v55  ;;  %v14162_v56 = vld [vmem:[#allocation25_spill] sm:$0xff]  ;;  %v4051_v22 = vadd.f32 %v12297_v39, %v3661_v38  ;;  %14165 = vst [vmem:[#allocation7_spill] sm:$0xff] %v12464_v15  ;;  %v12466_v2 = vld [vmem:[#allocation2 + $0xa8] sm:$0xff]  ;;  %v12468_v57 = vld [vmem:[#allocation2 + $0xb0] sm:$0xff]  ;;  %v4442_v9 = vadd.f32 %v9995_v46, %v4052_v42 }
 0x3a6   : > { %v2108_v8 = vadd.f32 %v14162_v56, %v12246_v11  ;;  %v14163_v50 = vld [vmem:[#allocation61_spill] sm:$0xff]  ;;  %14166 = vst [vmem:[#allocation33_spill] sm:$0xff] %v12466_v2  ;;  %14167 = vst [vmem:[#allocation31_spill] sm:$0xff] %v12468_v57  ;;  %v14168_v17 = vld [vmem:[#allocation98_spill] sm:$0xff]  ;;  %v4511_v55 = vmax.f32 %v4479_v49, 0.0  ;;  %10034 = vmatprep.mubr.msk.f32.mxu1 %vm917_vm3, %v12464_v15  ;;  %10084 = vmatprep.mubr.msk.f32.mxu0 %vm917_vm3, %v12466_v2  ;;  %v4054_v46 = vadd.f32 %v12330_v53, %v3664_v59 }
 0x3a7   : > { %v3275_v33 = vadd.f32 %v14164_v27, %v14163_v50  ;;  %v3663_v19 = vadd.f32 %v14168_v17, %v3272_v3  ;;  %4540 = vst.msk [vmem:[#allocation2 + $0xd9] sm:$0xff] %vm917_vm3, %v4508_v16  ;;  %v4478_v11 = vadd.f32 %v12167_v25, %v4439_v14  ;;  %v12477_v39 = vld [vmem:[#allocation2 + $0xb1] sm:$0xff]  ;;  %v14171_v6 = vld [vmem:[#allocation66_spill] sm:$0xff]  ;;  %v4362_v50 = vpop.f32.mrf.mxu0  ;;  %v4481_v16 = vadd.f32 %v12167_v25, %v4442_v9  ;;  %v14174_v27 = vld [vmem:[#allocation65_spill] sm:$0xff] }
 0x3a8   : > { %14169 = vst [vmem:[#allocation78_spill] sm:$0xff] %v12477_v39  ;;  %v14170_v38 = vld [vmem:[#allocation63_spill] sm:$0xff]  ;;  %v2886_v56 = vadd.f32 %v14171_v6, %v2496_v51  ;;  %10035 = vmatmul.mubr.msk.f32.gmra.mxu1 %vm917_vm3, %v12477_v39  ;;  %10085 = vmatmul.mubr.msk.f32.gmra.mxu0 %vm917_vm3, %v12468_v57  ;;  %4543 = vst.msk [vmem:[#allocation2 + $0xf9] sm:$0xff] %vm917_vm3, %v4511_v55  ;;  %v4441_v49 = vadd.f32 %v4362_v50, %v4051_v22  ;;  %v14173_v51 = vld [vmem:[#allocation29_spill] sm:$0xff]  ;;  %v4002_v6 = vpop.f32.mrf.mxu1 }
 0x3a9   : > { %v3274_v44 = vadd.f32 %v14170_v38, %v2884_v20  ;;  %v3666_v3 = vadd.f32 %v12119_v32, %v3275_v33  ;;  %v4510_v42 = vmax.f32 %v4478_v11, 0.0  ;;  %v14172_v20 = vld [vmem:[#allocation24_spill] sm:$0xff]  ;;  %v2110_v32 = vadd.f32 %v14173_v51, %v12256_v35  ;;  %v9998_v39 = vpop.f32.mrf.mxu0  ;;  %v12495_v15 = vld [vmem:[#allocation2 + $0xc1] sm:$0xff]  ;;  %v14178_v11 = vld [vmem:[#allocation67_spill] sm:$0xff] }
 0x3aa   : > { %v2498_v14 = vadd.f32 %v14172_v20, %v2108_v8  ;;  %v14175_v33 = vld [vmem:[#allocation64_spill] sm:$0xff]  ;;  %v12497_v53 = vld [vmem:[#allocation2 + $0xc0] sm:$0xff]  ;;  %v12499_v59 = vld [vmem:[#allocation2 + $0xc8] sm:$0xff]  ;;  %v4053_v22 = vadd.f32 %v12363_v40, %v3663_v19  ;;  %v4513_v8 = vmax.f32 %v4481_v16, 0.0  ;;  %v4480_v35 = vadd.f32 %v12167_v25, %v4441_v49  ;;  %10037 = vmatprep.mubr.msk.f32.mxu1 %vm917_vm3, %v12495_v15 }
 0x3ab   : > { %v3277_v17 = vadd.f32 %v14175_v33, %v14174_v27  ;;  %v3665_v38 = vadd.f32 %v12122_v48, %v3274_v44  ;;  %14176 = vst [vmem:[#allocation84_spill] sm:$0xff] %v12497_v53  ;;  %14177 = vst [vmem:[#allocation3_spill] sm:$0xff] %v12499_v59  ;;  %v4444_v55 = vadd.f32 %v9998_v39, %v4054_v46  ;;  %10087 = vmatprep.mubr.msk.f32.mxu0 %vm917_vm3, %v12497_v53  ;;  %v12508_v48 = vld [vmem:[#allocation2 + $0xc9] sm:$0xff]  ;;  %v4372_v19 = vpop.f32.mrf.mxu0  ;;  %v14183_v51 = vld [vmem:[#allocation68_spill] sm:$0xff]  ;;  %v9957_v27 = vpop.f32.mrf.mxu1 }
 0x3ac   : > { %4542 = vst.msk [vmem:[#allocation2 + $0xf1] sm:$0xff] %vm917_vm3, %v4510_v42  ;;  %v3276_v9 = vadd.f32 %v14178_v11, %v2886_v56  ;;  %v14179_v44 = vld [vmem:[#allocation70_spill] sm:$0xff]  ;;  %v4056_v40 = vadd.f32 %v12396_v30, %v3666_v3  ;;  %10038 = vmatmul.mubr.msk.f32.gmra.mxu1 %vm917_vm3, %v12508_v48  ;;  %10088 = vmatmul.mubr.msk.f32.gmra.mxu0 %vm917_vm3, %v12499_v59  ;;  %v14180_v39 = vld [vmem:[#allocation99_spill] sm:$0xff]  ;;  %4545 = vst.msk [vmem:[#allocation2 + $0x111] sm:$0xff] %vm917_vm3, %v4513_v8  ;;  %v4512_v42 = vmax.f32 %v4480_v35, 0.0 }
 0x3ad   : > { %v2888_v50 = vadd.f32 %v14179_v44, %v2498_v14  ;;  %v3668_v46 = vadd.f32 %v14180_v39, %v3277_v17  ;;  %v4483_v16 = vadd.f32 %v12167_v25, %v4444_v55  ;;  %v4443_v49 = vadd.f32 %v4372_v19, %v4053_v22  ;;  %v14181_v56 = vld [vmem:[#allocation27_spill] sm:$0xff]  ;;  %v14182_v14 = vld [vmem:[#allocation69_spill] sm:$0xff]  ;;  %v10001_v33 = vpop.f32.mrf.mxu0  ;;  %v14186_v8 = vld [vmem:[#allocation100_spill] sm:$0xff] }
 0x3ae   : > { %v2500_v20 = vadd.f32 %v14181_v56, %v2110_v32  ;;  %v3279_v30 = vadd.f32 %v14183_v51, %v14182_v14  ;;  %v4055_v3 = vadd.f32 %v12429_v26, %v3665_v38  ;;  %v12524_v11 = vld [vmem:[#allocation2 + $0xd9] sm:$0xff]  ;;  %v3667_v35 = vadd.f32 %v14186_v8, %v3276_v9  ;;  %4544 = vst.msk [vmem:[#allocation2 + $0x109] sm:$0xff] %vm917_vm3, %v4512_v42  ;;  %v12537_v26 = vld [vmem:[#allocation2 + $0xe1] sm:$0xff]  ;;  %v14187_v38 = vld [vmem:[#allocation71_spill] sm:$0xff] }
 0x3af   : > { %v12526_v44 = vld [vmem:[#allocation2 + $0xd8] sm:$0xff]  ;;  %v12528_v17 = vld [vmem:[#allocation2 + $0xe0] sm:$0xff]  ;;  %v4515_v22 = vmax.f32 %v4483_v16, 0.0  ;;  %v4482_v32 = vadd.f32 %v12167_v25, %v4443_v49  ;;  %v4446_v55 = vadd.f32 %v10001_v33, %v4056_v40  ;;  %10040 = vmatprep.mubr.msk.f32.mxu1 %vm917_vm3, %v12524_v11  ;;  %v3278_v19 = vadd.f32 %v14187_v38, %v2888_v50  ;;  %v14188_v39 = vld [vmem:[#allocation74_spill] sm:$0xff]  ;;  %v4382_v14 = vpop.f32.mrf.mxu0 }
 0x3b0   : > { %14184 = vst [vmem:[#allocation4_spill] sm:$0xff] %v12526_v44  ;;  %14185 = vst [vmem:[#allocation35_spill] sm:$0xff] %v12528_v17  ;;  %10090 = vmatprep.mubr.msk.f32.mxu0 %vm917_vm3, %v12526_v44  ;;  %v2890_v56 = vadd.f32 %v14188_v39, %v2500_v20  ;;  %v3670_v9 = vadd.f32 %v12134_v63, %v3279_v30  ;;  %10041 = vmatmul.mubr.msk.f32.gmra.mxu1 %vm917_vm3, %v12537_v26  ;;  %v14189_v50 = vld [vmem:[#allocation73_spill] sm:$0xff]  ;;  %v14190_v51 = vld [vmem:[#allocation72_spill] sm:$0xff]  ;;  %v4012_v30 = vpop.f32.mrf.mxu1 }
 0x3b1   : > { %10091 = vmatmul.mubr.msk.f32.gmra.mxu0 %vm917_vm3, %v12528_v17  ;;  %v4058_v40 = vadd.f32 %v12462_v28, %v3668_v46  ;;  %4547 = vst.msk [vmem:[#allocation2 + $0x129] sm:$0xff] %vm917_vm3, %v4515_v22  ;;  %v4514_v42 = vmax.f32 %v4482_v32, 0.0  ;;  %v4485_v16 = vadd.f32 %v12167_v25, %v4446_v55  ;;  %v4445_v49 = vadd.f32 %v4382_v14, %v4055_v3  ;;  %v10004_v33 = vpop.f32.mrf.mxu0  ;;  %v14193_v32 = vld [vmem:[#allocation75_spill] sm:$0xff] }
 0x3b2   : > { %v3281_v20 = vadd.f32 %v14190_v51, %v14189_v50  ;;  %v3669_v63 = vadd.f32 %v12140_v47, %v3278_v19  ;;  %v4057_v28 = vadd.f32 %v4002_v6, %v3667_v35  ;;  %v12564_v47 = vld [vmem:[#allocation2 + $0xf9] sm:$0xff]  ;;  %v3280_v55 = vadd.f32 %v14193_v32, %v2890_v56  ;;  %v9960_v14 = vpop.f32.mrf.mxu1 }
 0x3b3   : > { %v12552_v8 = vld [vmem:[#allocation2 + $0xf1] sm:$0xff]  ;;  %4546 = vst.msk [vmem:[#allocation2 + $0x121] sm:$0xff] %vm917_vm3, %v4514_v42  ;;  %v4517_v46 = vmax.f32 %v4485_v16, 0.0  ;;  %v4484_v22 = vadd.f32 %v12167_v25, %v4445_v49  ;;  %v4448_v3 = vadd.f32 %v10004_v33, %v4058_v40  ;;  %v4060_v19 = vadd.f32 %v9957_v27, %v3670_v9  ;;  %v4392_v50 = vpop.f32.mrf.mxu0 }
 0x3b4   : > { %v12554_v38 = vld [vmem:[#allocation2 + $0xf0] sm:$0xff]  ;;  %v12556_v39 = vld [vmem:[#allocation2 + $0xf8] sm:$0xff]  ;;  %10043 = vmatprep.mubr.msk.f32.mxu1 %vm917_vm3, %v12552_v8  ;;  %v3672_v6 = vadd.f32 %v12148_v62, %v3281_v20  ;;  %v4447_v42 = vadd.f32 %v4392_v50, %v4057_v28  ;;  %v4059_v16 = vadd.f32 %v4012_v30, %v3669_v63  ;;  %v3671_v51 = vadd.f32 %v12153_v61, %v3280_v55  ;;  %v4022_v30 = vpop.f32.mrf.mxu1 }
 0x3b5   : > { %14191 = vst [vmem:[#allocation38_spill] sm:$0xff] %v12554_v38  ;;  %14192 = vst [vmem:[#allocation87_spill] sm:$0xff] %v12556_v39  ;;  %10093 = vmatprep.mubr.msk.f32.mxu0 %vm917_vm3, %v12554_v38  ;;  %10044 = vmatmul.mubr.msk.f32.gmra.mxu1 %vm917_vm3, %v12564_v47  ;;  %v4516_v35 = vmax.f32 %v4484_v22, 0.0  ;;  %v4487_v40 = vadd.f32 %v12167_v25, %v4448_v3  ;;  %v10007_v49 = vpop.f32.mrf.mxu0  ;;  %v12574_v56 = vld [vmem:[#allocation2 + $0x109] sm:$0xff]  ;;  %v12587_v63 = vld [vmem:[#allocation2 + $0x111] sm:$0xff] }
 0x3b6   : > { %10094 = vmatmul.mubr.msk.f32.gmra.mxu0 %vm917_vm3, %v12556_v39  ;;  %4549 = vst.msk [vmem:[#allocation2 + $0x141] sm:$0xff] %vm917_vm3, %v4517_v46  ;;  %v12576_v27 = vld [vmem:[#allocation2 + $0x108] sm:$0xff]  ;;  %v12578_v9 = vld [vmem:[#allocation2 + $0x110] sm:$0xff]  ;;  %v4486_v62 = vadd.f32 %v12167_v25, %v4447_v42  ;;  %v4450_v20 = vadd.f32 %v10007_v49, %v4060_v19  ;;  %10046 = vmatprep.mubr.msk.f32.mxu1 %vm917_vm3, %v12574_v56 }
 0x3b7   : > { %14194 = vst [vmem:[#allocation79_spill] sm:$0xff] %v12576_v27  ;;  %14195 = vst [vmem:[#allocation5_spill] sm:$0xff] %v12578_v9  ;;  %v4519_v33 = vmax.f32 %v4487_v40, 0.0  ;;  %10096 = vmatprep.mubr.msk.f32.mxu0 %vm917_vm3, %v12576_v27  ;;  %v4402_v28 = vpop.f32.mrf.mxu0  ;;  %v4062_v61 = vadd.f32 %v9960_v14, %v3672_v6 }
 0x3b8   : > { %4548 = vst.msk [vmem:[#allocation2 + $0x139] sm:$0xff] %vm917_vm3, %v4516_v35  ;;  %v4518_v46 = vmax.f32 %v4486_v62, 0.0  ;;  %v4489_v22 = vadd.f32 %v12167_v25, %v4450_v20  ;;  %v4449_v3 = vadd.f32 %v4402_v28, %v4059_v16  ;;  %v4061_v35 = vadd.f32 %v4022_v30, %v3671_v51  ;;  %v12607_v6 = vld [vmem:[#allocation2 + $0x129] sm:$0xff] }
 0x3b9   : > { %10047 = vmatmul.mubr.msk.f32.gmra.mxu1 %vm917_vm3, %v12587_v63  ;;  %4551 = vst.msk [vmem:[#allocation2 + $0x159] sm:$0xff] %vm917_vm3, %v4519_v33  ;;  %v10010_v32 = vpop.f32.mrf.mxu0 }
 0x3ba   : > { %10097 = vmatmul.mubr.msk.f32.gmra.mxu0 %vm917_vm3, %v12578_v9  ;;  %v12595_v55 = vld [vmem:[#allocation2 + $0x121] sm:$0xff]  ;;  %4550 = vst.msk [vmem:[#allocation2 + $0x151] sm:$0xff] %vm917_vm3, %v4518_v46  ;;  %v4521_v40 = vmax.f32 %v4489_v22, 0.0  ;;  %v4488_v42 = vadd.f32 %v12167_v25, %v4449_v3  ;;  %v4452_v14 = vadd.f32 %v10010_v32, %v4062_v61 }
 0x3bb   : > { %v12597_v19 = vld [vmem:[#allocation2 + $0x120] sm:$0xff]  ;;  %v12599_v50 = vld [vmem:[#allocation2 + $0x128] sm:$0xff]  ;;  %10049 = vmatprep.mubr.msk.f32.mxu1 %vm917_vm3, %v12595_v55  ;;  %v4412_v16 = vpop.f32.mrf.mxu0 }
 0x3bc   : > { %14196 = vst [vmem:[#allocation6_spill] sm:$0xff] %v12597_v19  ;;  %14197 = vst [vmem:[#allocation11_spill] sm:$0xff] %v12599_v50  ;;  %10099 = vmatprep.mubr.msk.f32.mxu0 %vm917_vm3, %v12597_v19  ;;  %v4520_v49 = vmax.f32 %v4488_v42, 0.0  ;;  %v4491_v51 = vadd.f32 %v12167_v25, %v4452_v14  ;;  %v4451_v33 = vadd.f32 %v4412_v16, %v4061_v35 }
 0x3bd   : > { %10050 = vmatmul.mubr.msk.f32.gmra.mxu1 %vm917_vm3, %v12607_v6  ;;  %4553 = vst.msk [vmem:[#allocation2 + $0x171] sm:$0xff] %vm917_vm3, %v4521_v40  ;;  %v12627_v46 = vld [vmem:[#allocation2 + $0x141] sm:$0xff] }
 0x3be   : > { %10100 = vmatmul.mubr.msk.f32.gmra.mxu0 %vm917_vm3, %v12599_v50  ;;  %4552 = vst.msk [vmem:[#allocation2 + $0x169] sm:$0xff] %vm917_vm3, %v4520_v49  ;;  %v4523_v28 = vmax.f32 %v4491_v51, 0.0  ;;  %v4490_v61 = vadd.f32 %v12167_v25, %v4451_v33  ;;  %v5271_v40 = vld [vmem:[#allocation2 + $0x2] sm:$0xff]  ;;  %v5272_v51 = vld [vmem:[#allocation2 + $0xa] sm:$0xff]  ;;  %v12673_v33 = vld [vmem:[#allocation2 + $0x1a] sm:$0xff] }
 0x3bf   : > { %v12615_v62 = vld [vmem:[#allocation2 + $0x139] sm:$0xff] }
 0x3c0   : > { %v12617_v20 = vld [vmem:[#allocation2 + $0x138] sm:$0xff]  ;;  %v12619_v30 = vld [vmem:[#allocation2 + $0x140] sm:$0xff]  ;;  %10052 = vmatprep.mubr.msk.f32.mxu1 %vm917_vm3, %v12615_v62  ;;  %4555 = vst.msk [vmem:[#allocation2 + $0x189] sm:$0xff] %vm917_vm3, %v4523_v28  ;;  %v4522_v22 = vmax.f32 %v4490_v61, 0.0 }
 0x3c1   : > { %14198 = vst [vmem:[#allocation9_spill] sm:$0xff] %v12617_v20  ;;  %14199 = vst [vmem:[#allocation37_spill] sm:$0xff] %v12619_v30  ;;  %10102 = vmatprep.mubr.msk.f32.mxu0 %vm917_vm3, %v12617_v20  ;;  %10053 = vmatmul.mubr.msk.f32.gmra.mxu1 %vm917_vm3, %v12627_v46  ;;  %v12634_v3 = vld [vmem:[#allocation2 + $0x151] sm:$0xff]  ;;  %v12645_v35 = vld [vmem:[#allocation2 + $0x159] sm:$0xff] }
 0x3c2   : > { %10103 = vmatmul.mubr.msk.f32.gmra.mxu0 %vm917_vm3, %v12619_v30  ;;  %v12636_v25 = vld [vmem:[#allocation2 + $0x150] sm:$0xff]  ;;  %v12638_v32 = vld [vmem:[#allocation2 + $0x158] sm:$0xff]  ;;  %4554 = vst.msk [vmem:[#allocation2 + $0x181] sm:$0xff] %vm917_vm3, %v4522_v22  ;;  %10055 = vmatprep.mubr.msk.f32.mxu1 %vm917_vm3, %v12634_v3 }
 0x3c3   : > { %14200 = vst [vmem:[#allocation36_spill] sm:$0xff] %v12636_v25  ;;  %14201 = vst [vmem:[#allocation90_spill] sm:$0xff] %v12638_v32  ;;  %10105 = vmatprep.mubr.msk.f32.mxu0 %vm917_vm3, %v12636_v25  ;;  %v12678_v28 = vld [vmem:[%s13851_s7 + $0x18] sm:$0xf]  ;;  %v12683_v61 = vld [vmem:[%s13851_s7 + $0x1c] sm:$0xf] }
 0x3c4   : > { %v12661_v49 = vld [vmem:[#allocation2 + $0x171] sm:$0xff] }
 0x3c5   : > { %10056 = vmatmul.mubr.msk.f32.gmra.mxu1 %vm917_vm3, %v12645_v35  ;;  %v12651_v42 = vld [vmem:[#allocation2 + $0x169] sm:$0xff]  ;;  %v14203_v22 = vld [vmem:[#allocation76_spill] sm:$0xff] }
 0x3c6   : > { %10106 = vmatmul.mubr.msk.f32.gmra.mxu0 %vm917_vm3, %v12638_v32  ;;  %v12653_v14 = vld [vmem:[#allocation2 + $0x168] sm:$0xff]  ;;  %v12655_v16 = vld [vmem:[#allocation2 + $0x170] sm:$0xff]  ;;  %10058 = vmatprep.mubr.msk.f32.mxu1 %vm917_vm3, %v12651_v42 }
 0x3c7   : > { %14202 = vst [vmem:[#allocation80_spill] sm:$0xff] %v12653_v14  ;;  %10108 = vmatprep.mubr.msk.f32.mxu0 %vm917_vm3, %v12653_v14 }
 0x3c9   : > { %10059 = vmatmul.mubr.msk.f32.gmra.mxu1 %vm917_vm3, %v12661_v49 }
 0x3ca   : > { %10109 = vmatmul.mubr.msk.f32.gmra.mxu0 %vm917_vm3, %v12655_v16  ;;  %10113 = vmatprep.mubr.msk.f32.mxu1 %vm917_vm3, %v5271_v40 }
 0x3cb   : > { %10163 = vmatprep.mubr.msk.f32.mxu0 %vm917_vm3, %v12267_v60  ;;  %v10015_v60 = vpop.f32.mrf.mxu1 }
 0x3cd   : > { %10114 = vmatmul.mubr.msk.f32.vlgmr.msra.gmra.mxu1 %vm917_vm3, %v5272_v51  ;;  %v12695_v51 = vld [vmem:[#allocation2 + $0x22] sm:$0xff] }
 0x3ce   : > { %10164 = vmatmul.mubr.msk.f32.vlgmr.msra.gmra.mxu0 %vm917_vm3, %v12269_v13  ;;  %10116 = vmatprep.mubr.msk.f32.mxu1 %vm917_vm3, %v12673_v33  ;;  %v10065_v13 = vpop.f32.mrf.mxu0 }
 0x3cf   : > { %10166 = vmatprep.mubr.msk.f32.mxu0 %vm917_vm3, %v12301_v34  ;;  %10212 = vmatpush3.msk.msra.mxu1 %vm1169_vm2, %v14203_v22  ;;  %v12693_v40 = vadd.f32 %v10065_v13, %v10015_v60  ;;  %v12705_v22 = vld [vmem:[#allocation2 + $0x32] sm:$0xff]  ;;  %v12717_v60 = vld [vmem:[#allocation2 + $0x4a] sm:$0xff] }
 0x3d0   : > { %10262 = vmatpush3.msk.msra.mxu0 %vm1169_vm2, %v12226_v12  ;;  %10311 = vmatprep.subr.msk.mxu1 %vm1169_vm2, %v12678_v28  ;;  %v12711_v12 = vld [vmem:[#allocation2 + $0x3a] sm:$0xff]  ;;  %v12723_v13 = vld [vmem:[#allocation2 + $0x52] sm:$0xff] }
 0x3d1   : > { %14204 = vst [vmem:[#allocation39_spill] sm:$0xff] %v12693_v40  ;;  %10361 = vmatprep.subr.msk.mxu0 %vm1169_vm2, %v12683_v61  ;;  %10117 = vmatmul.mubr.msk.f32.gmra.mxu1 %vm917_vm3, %v12695_v51  ;;  %v12729_v40 = vld [vmem:[#allocation2 + $0x62] sm:$0xff] }
 0x3d2   : > { %10167 = vmatmul.mubr.msk.f32.gmra.mxu0 %vm917_vm3, %v12303_v0  ;;  %10119 = vmatprep.mubr.msk.f32.mxu1 %vm917_vm3, %v12705_v22 }
 0x3d3   : > { %10169 = vmatprep.mubr.msk.f32.mxu0 %vm917_vm3, %v12334_v31  ;;  %v12863_v31 = vld [vmem:[#allocation2 + $0x180] sm:$0xff] }
 0x3d4   : > { %14205 = vst [vmem:[#allocation42_spill] sm:$0xff] %v12863_v31 }
 0x3d5   : > { %10120 = vmatmul.mubr.msk.f32.gmra.mxu1 %vm917_vm3, %v12711_v12 }
 0x3d6   : > { %10170 = vmatmul.mubr.msk.f32.gmra.mxu0 %vm917_vm3, %v12336_v10  ;;  %10122 = vmatprep.mubr.msk.f32.mxu1 %vm917_vm3, %v12717_v60  ;;  %v12735_v10 = vld [vmem:[#allocation2 + $0x6a] sm:$0xff] }
 0x3d7   : > { %10172 = vmatprep.mubr.msk.f32.mxu0 %vm917_vm3, %v12367_v24  ;;  %v12741_v24 = vld [vmem:[#allocation2 + $0x7a] sm:$0xff] }
 0x3d9   : > { %10123 = vmatmul.mubr.msk.f32.gmra.mxu1 %vm917_vm3, %v12723_v13 }
 0x3da   : > { %10173 = vmatmul.mubr.msk.f32.gmra.mxu0 %vm917_vm3, %v12369_v21  ;;  %10125 = vmatprep.mubr.msk.f32.mxu1 %vm917_vm3, %v12729_v40  ;;  %v12747_v21 = vld [vmem:[#allocation2 + $0x82] sm:$0xff] }
 0x3db   : > { %10175 = vmatprep.mubr.msk.f32.mxu0 %vm917_vm3, %v12400_v4  ;;  %v12753_v4 = vld [vmem:[#allocation2 + $0x92] sm:$0xff] }
 0x3dd   : > { %10126 = vmatmul.mubr.msk.f32.gmra.mxu1 %vm917_vm3, %v12735_v10 }
 0x3de   : > { %10176 = vmatmul.mubr.msk.f32.gmra.mxu0 %vm917_vm3, %v12402_v36  ;;  %10128 = vmatprep.mubr.msk.f32.mxu1 %vm917_vm3, %v12741_v24  ;;  %v12759_v36 = vld [vmem:[#allocation2 + $0x9a] sm:$0xff] }
 0x3df   : > { %10178 = vmatprep.mubr.msk.f32.mxu0 %vm917_vm3, %v12433_v43  ;;  %v12765_v43 = vld [vmem:[#allocation2 + $0xaa] sm:$0xff] }
 0x3e1   : > { %10129 = vmatmul.mubr.msk.f32.gmra.mxu1 %vm917_vm3, %v12747_v21 }
 0x3e2   : > { %10179 = vmatmul.mubr.msk.f32.gmra.mxu0 %vm917_vm3, %v12435_v5  ;;  %10131 = vmatprep.mubr.msk.f32.mxu1 %vm917_vm3, %v12753_v4  ;;  %v12771_v5 = vld [vmem:[#allocation2 + $0xb2] sm:$0xff] }
 0x3e3   : > { %10181 = vmatprep.mubr.msk.f32.mxu0 %vm917_vm3, %v12466_v2  ;;  %v12777_v2 = vld [vmem:[#allocation2 + $0xc2] sm:$0xff] }
 0x3e5   : > { %10132 = vmatmul.mubr.msk.f32.gmra.mxu1 %vm917_vm3, %v12759_v36 }
 0x3e6   : > { %10182 = vmatmul.mubr.msk.f32.gmra.mxu0 %vm917_vm3, %v12468_v57  ;;  %10134 = vmatprep.mubr.msk.f32.mxu1 %vm917_vm3, %v12765_v43  ;;  %v12783_v57 = vld [vmem:[#allocation2 + $0xca] sm:$0xff] }
 0x3e7   : > { %10184 = vmatprep.mubr.msk.f32.mxu0 %vm917_vm3, %v12497_v53  ;;  %v12789_v53 = vld [vmem:[#allocation2 + $0xda] sm:$0xff] }
 0x3e9   : > { %10135 = vmatmul.mubr.msk.f32.gmra.mxu1 %vm917_vm3, %v12771_v5 }
 0x3ea   : > { %10185 = vmatmul.mubr.msk.f32.gmra.mxu0 %vm917_vm3, %v12499_v59  ;;  %10137 = vmatprep.mubr.msk.f32.mxu1 %vm917_vm3, %v12777_v2  ;;  %v12795_v59 = vld [vmem:[#allocation2 + $0xe2] sm:$0xff] }
 0x3eb   : > { %10187 = vmatprep.mubr.msk.f32.mxu0 %vm917_vm3, %v12526_v44  ;;  %v12801_v44 = vld [vmem:[#allocation2 + $0xf2] sm:$0xff] }
 0x3ed   : > { %10138 = vmatmul.mubr.msk.f32.gmra.mxu1 %vm917_vm3, %v12783_v57 }
 0x3ee   : > { %10188 = vmatmul.mubr.msk.f32.gmra.mxu0 %vm917_vm3, %v12528_v17  ;;  %10140 = vmatprep.mubr.msk.f32.mxu1 %vm917_vm3, %v12789_v53  ;;  %v12807_v17 = vld [vmem:[#allocation2 + $0xfa] sm:$0xff] }
 0x3ef   : > { %10190 = vmatprep.mubr.msk.f32.mxu0 %vm917_vm3, %v12554_v38  ;;  %v12813_v38 = vld [vmem:[#allocation2 + $0x10a] sm:$0xff] }
 0x3f1   : > { %10141 = vmatmul.mubr.msk.f32.gmra.mxu1 %vm917_vm3, %v12795_v59 }
 0x3f2   : > { %10191 = vmatmul.mubr.msk.f32.gmra.mxu0 %vm917_vm3, %v12556_v39  ;;  %10143 = vmatprep.mubr.msk.f32.mxu1 %vm917_vm3, %v12801_v44  ;;  %v12819_v39 = vld [vmem:[#allocation2 + $0x112] sm:$0xff] }
 0x3f3   : > { %10193 = vmatprep.mubr.msk.f32.mxu0 %vm917_vm3, %v12576_v27  ;;  %v12825_v27 = vld [vmem:[#allocation2 + $0x122] sm:$0xff] }
 0x3f5   : > { %10144 = vmatmul.mubr.msk.f32.gmra.mxu1 %vm917_vm3, %v12807_v17 }
 0x3f6   : > { %10194 = vmatmul.mubr.msk.f32.gmra.mxu0 %vm917_vm3, %v12578_v9  ;;  %10146 = vmatprep.mubr.msk.f32.mxu1 %vm917_vm3, %v12813_v38  ;;  %v12831_v9 = vld [vmem:[#allocation2 + $0x12a] sm:$0xff] }
 0x3f7   : > { %10196 = vmatprep.mubr.msk.f32.mxu0 %vm917_vm3, %v12597_v19  ;;  %v12837_v19 = vld [vmem:[#allocation2 + $0x13a] sm:$0xff] }
 0x3f9   : > { %10147 = vmatmul.mubr.msk.f32.gmra.mxu1 %vm917_vm3, %v12819_v39 }
 0x3fa   : > { %10197 = vmatmul.mubr.msk.f32.gmra.mxu0 %vm917_vm3, %v12599_v50  ;;  %10149 = vmatprep.mubr.msk.f32.mxu1 %vm917_vm3, %v12825_v27  ;;  %v12843_v50 = vld [vmem:[#allocation2 + $0x142] sm:$0xff] }
 0x3fb   : > { %10199 = vmatprep.mubr.msk.f32.mxu0 %vm917_vm3, %v12617_v20  ;;  %v12849_v20 = vld [vmem:[#allocation2 + $0x152] sm:$0xff] }
 0x3fd   : > { %10150 = vmatmul.mubr.msk.f32.gmra.mxu1 %vm917_vm3, %v12831_v9 }
 0x3fe   : > { %10200 = vmatmul.mubr.msk.f32.gmra.mxu0 %vm917_vm3, %v12619_v30  ;;  %10152 = vmatprep.mubr.msk.f32.mxu1 %vm917_vm3, %v12837_v19  ;;  %v12855_v30 = vld [vmem:[#allocation2 + $0x15a] sm:$0xff] }
 0x3ff   : > { %10202 = vmatprep.mubr.msk.f32.mxu0 %vm917_vm3, %v12636_v25  ;;  %v12861_v25 = vld [vmem:[#allocation2 + $0x16a] sm:$0xff] }
 0x401   : > { %10153 = vmatmul.mubr.msk.f32.gmra.mxu1 %vm917_vm3, %v12843_v50 }
 0x402   : > { %10203 = vmatmul.mubr.msk.f32.gmra.mxu0 %vm917_vm3, %v12638_v32  ;;  %10155 = vmatprep.mubr.msk.f32.mxu1 %vm917_vm3, %v12849_v20  ;;  %v12869_v32 = vld [vmem:[#allocation2 + $0x172] sm:$0xff] }
 0x403   : > { %10205 = vmatprep.mubr.msk.f32.mxu0 %vm917_vm3, %v12653_v14  ;;  %v12871_v14 = vld [vmem:[#allocation2 + $0x188] sm:$0xff] }
 0x405   : > { %10156 = vmatmul.mubr.msk.f32.gmra.mxu1 %vm917_vm3, %v12855_v30 }
 0x406   : > { %10206 = vmatmul.mubr.msk.f32.gmra.mxu0 %vm917_vm3, %v12655_v16  ;;  %10158 = vmatprep.mubr.msk.f32.mxu1 %vm917_vm3, %v12861_v25 }
 0x407   : > { %10208 = vmatprep.mubr.msk.f32.mxu0 %vm917_vm3, %v12863_v31  ;;  %v12888_v31 = vld [vmem:[%s13851_s7 + $0x20] sm:$0xf] }
 0x409   : > { %10159 = vmatmul.mubr.msk.f32.gmra.mxu1 %vm917_vm3, %v12869_v32 }
 0x40a   : > { %10209 = vmatmul.mubr.msk.f32.gmra.mxu0 %vm917_vm3, %v12871_v14  ;;  %10213 = vmatprep.mubr.msk.f32.mxu1 %vm917_vm3, %v12265_v54  ;;  %v14206_v54 = vld [vmem:[#allocation8_spill] sm:$0xff] }
 0x40b   : > { %10263 = vmatprep.mubr.msk.f32.mxu0 %vm917_vm3, %v12673_v33  ;;  %v14208_v33 = vld [vmem:[#allocation78_spill] sm:$0xff] }
 0x40d   : > { %10214 = vmatmul.mubr.msk.f32.vlgmr.msra.gmra.mxu1 %vm917_vm3, %v12278_v45  ;;  %v14207_v45 = vld [vmem:[#allocation7_spill] sm:$0xff] }
 0x40e   : > { %10264 = vmatmul.mubr.msk.f32.vlgmr.msra.gmra.mxu0 %vm917_vm3, %v12695_v51  ;;  %10216 = vmatprep.mubr.msk.f32.mxu1 %vm917_vm3, %v12299_v58 }
 0x40f   : > { %10266 = vmatprep.mubr.msk.f32.mxu0 %vm917_vm3, %v12705_v22  ;;  %10312 = vmatpush3.msk.msra.mxu1 %vm1169_vm2, %v12678_v28 }
 0x410   : > { %10362 = vmatpush3.msk.msra.mxu0 %vm1169_vm2, %v12683_v61  ;;  %10411 = vmatprep.subr.msk.mxu1 %vm1169_vm2, %v12888_v31 }
 0x411   : > { %10217 = vmatmul.mubr.msk.f32.gmra.mxu1 %vm917_vm3, %v12312_v41 }
 0x412   : > { %10267 = vmatmul.mubr.msk.f32.gmra.mxu0 %vm917_vm3, %v12711_v12  ;;  %10219 = vmatprep.mubr.msk.f32.mxu1 %vm917_vm3, %v12332_v37 }
 0x413   : > { %10269 = vmatprep.mubr.msk.f32.mxu0 %vm917_vm3, %v12717_v60 }
 0x415   : > { %10220 = vmatmul.mubr.msk.f32.gmra.mxu1 %vm917_vm3, %v12345_v29 }
 0x416   : > { %10270 = vmatmul.mubr.msk.f32.gmra.mxu0 %vm917_vm3, %v12723_v13  ;;  %10222 = vmatprep.mubr.msk.f32.mxu1 %vm917_vm3, %v12365_v18 }
 0x417   : > { %10272 = vmatprep.mubr.msk.f32.mxu0 %vm917_vm3, %v12729_v40 }
 0x419   : > { %10223 = vmatmul.mubr.msk.f32.gmra.mxu1 %vm917_vm3, %v12378_v52 }
 0x41a   : > { %10273 = vmatmul.mubr.msk.f32.gmra.mxu0 %vm917_vm3, %v12735_v10  ;;  %10225 = vmatprep.mubr.msk.f32.mxu1 %vm917_vm3, %v12398_v1 }
 0x41b   : > { %10275 = vmatprep.mubr.msk.f32.mxu0 %vm917_vm3, %v12741_v24 }
 0x41d   : > { %10226 = vmatmul.mubr.msk.f32.gmra.mxu1 %vm917_vm3, %v12411_v23 }
 0x41e   : > { %10276 = vmatmul.mubr.msk.f32.gmra.mxu0 %vm917_vm3, %v12747_v21  ;;  %10228 = vmatprep.mubr.msk.f32.mxu1 %vm917_vm3, %v12431_v7 }
 0x41f   : > { %10278 = vmatprep.mubr.msk.f32.mxu0 %vm917_vm3, %v12753_v4 }
 0x421   : > { %10229 = vmatmul.mubr.msk.f32.gmra.mxu1 %vm917_vm3, %v14206_v54 }
 0x422   : > { %10279 = vmatmul.mubr.msk.f32.gmra.mxu0 %vm917_vm3, %v12759_v36  ;;  %10231 = vmatprep.mubr.msk.f32.mxu1 %vm917_vm3, %v14207_v45 }
 0x423   : > { %10281 = vmatprep.mubr.msk.f32.mxu0 %vm917_vm3, %v12765_v43 }
 0x425   : > { %10232 = vmatmul.mubr.msk.f32.gmra.mxu1 %vm917_vm3, %v14208_v33 }
 0x426   : > { %10282 = vmatmul.mubr.msk.f32.gmra.mxu0 %vm917_vm3, %v12771_v5  ;;  %10234 = vmatprep.mubr.msk.f32.mxu1 %vm917_vm3, %v12495_v15 }
 0x427   : > { %10284 = vmatprep.mubr.msk.f32.mxu0 %vm917_vm3, %v12777_v2 }
 0x429   : > { %10235 = vmatmul.mubr.msk.f32.gmra.mxu1 %vm917_vm3, %v12508_v48 }
 0x42a   : > { %10285 = vmatmul.mubr.msk.f32.gmra.mxu0 %vm917_vm3, %v12783_v57  ;;  %10237 = vmatprep.mubr.msk.f32.mxu1 %vm917_vm3, %v12524_v11 }
 0x42b   : > { %10287 = vmatprep.mubr.msk.f32.mxu0 %vm917_vm3, %v12789_v53 }
 0x42d   : > { %10238 = vmatmul.mubr.msk.f32.gmra.mxu1 %vm917_vm3, %v12537_v26 }
 0x42e   : > { %10288 = vmatmul.mubr.msk.f32.gmra.mxu0 %vm917_vm3, %v12795_v59  ;;  %10240 = vmatprep.mubr.msk.f32.mxu1 %vm917_vm3, %v12552_v8 }
 0x42f   : > { %10290 = vmatprep.mubr.msk.f32.mxu0 %vm917_vm3, %v12801_v44 }
 0x431   : > { %10241 = vmatmul.mubr.msk.f32.gmra.mxu1 %vm917_vm3, %v12564_v47 }
 0x432   : > { %10291 = vmatmul.mubr.msk.f32.gmra.mxu0 %vm917_vm3, %v12807_v17  ;;  %10243 = vmatprep.mubr.msk.f32.mxu1 %vm917_vm3, %v12574_v56 }
 0x433   : > { %10293 = vmatprep.mubr.msk.f32.mxu0 %vm917_vm3, %v12813_v38 }
 0x435   : > { %10244 = vmatmul.mubr.msk.f32.gmra.mxu1 %vm917_vm3, %v12587_v63 }
 0x436   : > { %10294 = vmatmul.mubr.msk.f32.gmra.mxu0 %vm917_vm3, %v12819_v39  ;;  %10246 = vmatprep.mubr.msk.f32.mxu1 %vm917_vm3, %v12595_v55  ;;  %v13008_v39 = vld [vmem:[#allocation2 + $0x181] sm:$0xff] }
 0x437   : > { %10296 = vmatprep.mubr.msk.f32.mxu0 %vm917_vm3, %v12825_v27 }
 0x439   : > { %10247 = vmatmul.mubr.msk.f32.gmra.mxu1 %vm917_vm3, %v12607_v6 }
 0x43a   : > { %10297 = vmatmul.mubr.msk.f32.gmra.mxu0 %vm917_vm3, %v12831_v9  ;;  %10249 = vmatprep.mubr.msk.f32.mxu1 %vm917_vm3, %v12615_v62  ;;  %v13010_v9 = vld [vmem:[#allocation2 + $0x182] sm:$0xff] }
 0x43b   : > { %10299 = vmatprep.mubr.msk.f32.mxu0 %vm917_vm3, %v12837_v19  ;;  %v13016_v19 = vld [vmem:[#allocation2 + $0x189] sm:$0xff] }
 0x43d   : > { %10250 = vmatmul.mubr.msk.f32.gmra.mxu1 %vm917_vm3, %v12627_v46 }
 0x43e   : > { %10300 = vmatmul.mubr.msk.f32.gmra.mxu0 %vm917_vm3, %v12843_v50  ;;  %10252 = vmatprep.mubr.msk.f32.mxu1 %vm917_vm3, %v12634_v3  ;;  %v13018_v50 = vld [vmem:[#allocation2 + $0x18a] sm:$0xff] }
 0x43f   : > { %10302 = vmatprep.mubr.msk.f32.mxu0 %vm917_vm3, %v12849_v20  ;;  %v14209_v20 = vld [vmem:[#allocation23_spill] sm:$0xff] }
 0x441   : > { %10253 = vmatmul.mubr.msk.f32.gmra.mxu1 %vm917_vm3, %v12645_v35 }
 0x442   : > { %10303 = vmatmul.mubr.msk.f32.gmra.mxu0 %vm917_vm3, %v12855_v30  ;;  %10255 = vmatprep.mubr.msk.f32.mxu1 %vm917_vm3, %v12651_v42  ;;  %v13036_v30 = vpop.f32.mrf.mxu1 }
 0x443   : > { %10305 = vmatprep.mubr.msk.f32.mxu0 %vm917_vm3, %v12861_v25  ;;  %v13038_v25 = vpop.f32.mrf.mxu0 }
 0x445   : > { %10256 = vmatmul.mubr.msk.f32.gmra.mxu1 %vm917_vm3, %v12661_v49 }
 0x446   : > { %10306 = vmatmul.mubr.msk.f32.gmra.mxu0 %vm917_vm3, %v12869_v32  ;;  %10258 = vmatprep.mubr.msk.f32.mxu1 %vm917_vm3, %v13008_v39  ;;  %v14210_v32 = vld [vmem:[#allocation28_spill] sm:$0xff] }
 0x447   : > { %10308 = vmatprep.mubr.msk.f32.mxu0 %vm917_vm3, %v13010_v9 }
 0x449   : > { %10259 = vmatmul.mubr.msk.f32.gmra.mxu1 %vm917_vm3, %v13016_v19 }
 0x44a   : > { %10309 = vmatmul.mubr.msk.f32.gmra.mxu0 %vm917_vm3, %v13018_v50  ;;  %10313 = vmatprep.mubr.msk.f32.mxu1 %vm917_vm3, %v12301_v34 }
 0x44b   : > { %10363 = vmatprep.mubr.msk.f32.mxu0 %vm917_vm3, %v12299_v58 }
 0x44d   : > { %10314 = vmatmul.mubr.msk.f32.vlgmr.msra.gmra.mxu1 %vm917_vm3, %v12303_v0  ;;  %v10018_v58 = vpop.f32.mrf.mxu1 }
 0x44e   : > { %10364 = vmatmul.mubr.msk.f32.vlgmr.msra.gmra.mxu0 %vm917_vm3, %v12312_v41  ;;  %10316 = vmatprep.mubr.msk.f32.mxu1 %vm917_vm3, %v14209_v20  ;;  %v10068_v34 = vpop.f32.mrf.mxu0  ;;  %v14211_v41 = vld [vmem:[#allocation32_spill] sm:$0xff]  ;;  %v14212_v20 = vld [vmem:[#allocation34_spill] sm:$0xff] }
 0x44f   : > { %10366 = vmatprep.mubr.msk.f32.mxu0 %vm917_vm3, %v12332_v37  ;;  %10412 = vmatpush3.msk.msra.mxu1 %vm1169_vm2, %v12888_v31  ;;  %v13046_v0 = vadd.f32 %v10068_v34, %v10018_v58  ;;  %v4798_v37 = vpop.f32.mrf.mxu1  ;;  %v14213_v58 = vld [vmem:[#allocation77_spill] sm:$0xff] }
 0x450   : > { %v5122_v28 = vpop.f32.mrf.mxu0 }
 0x451   : > { %10317 = vmatmul.mubr.msk.f32.gmra.mxu1 %vm917_vm3, %v14210_v32  ;;  %v13052_v61 = vadd.f32 %v5122_v28, %v4798_v37  ;;  %v10021_v31 = vpop.f32.mrf.mxu1  ;;  %v14214_v28 = vld [vmem:[#allocation81_spill] sm:$0xff] }
 0x452   : > { %10367 = vmatmul.mubr.msk.f32.gmra.mxu0 %vm917_vm3, %v12345_v29  ;;  %10319 = vmatprep.mubr.msk.f32.mxu1 %vm917_vm3, %v14211_v41  ;;  %v10071_v51 = vpop.f32.mrf.mxu0 }
 0x453   : > { %10369 = vmatprep.mubr.msk.f32.mxu0 %vm917_vm3, %v12365_v18  ;;  %v13058_v29 = vadd.f32 %v10071_v51, %v10021_v31  ;;  %v4808_v18 = vpop.f32.mrf.mxu1  ;;  %v14215_v31 = vld [vmem:[#allocation26_spill] sm:$0xff] }
 0x454   : > { %v5132_v34 = vpop.f32.mrf.mxu0 }
 0x455   : > { %10320 = vmatmul.mubr.msk.f32.gmra.mxu1 %vm917_vm3, %v14212_v20  ;;  %v13064_v32 = vadd.f32 %v5132_v34, %v4808_v18  ;;  %v14216_v34 = vld [vmem:[#allocation30_spill] sm:$0xff] }
 0x456   : > { %10370 = vmatmul.mubr.msk.f32.gmra.mxu0 %vm917_vm3, %v12378_v52  ;;  %10322 = vmatprep.mubr.msk.f32.mxu1 %vm917_vm3, %v14213_v58  ;;  %v10024_v41 = vpop.f32.mrf.mxu1  ;;  %v10074_v37 = vpop.f32.mrf.mxu0 }
 0x457   : > { %10372 = vmatprep.mubr.msk.f32.mxu0 %vm917_vm3, %v12398_v1  ;;  %v13070_v52 = vadd.f32 %v10074_v37, %v10024_v41  ;;  %v14217_v41 = vld [vmem:[#allocation33_spill] sm:$0xff] }
 0x458   : > { %v4818_v1 = vpop.f32.mrf.mxu1  ;;  %v5142_v51 = vpop.f32.mrf.mxu0 }
 0x459   : > { %10323 = vmatmul.mubr.msk.f32.gmra.mxu1 %vm917_vm3, %v14214_v28  ;;  %v13076_v20 = vadd.f32 %v5142_v51, %v4818_v1  ;;  %v14218_v51 = vld [vmem:[#allocation31_spill] sm:$0xff] }
 0x45a   : > { %10373 = vmatmul.mubr.msk.f32.gmra.mxu0 %vm917_vm3, %v12411_v23  ;;  %10325 = vmatprep.mubr.msk.f32.mxu1 %vm917_vm3, %v14215_v31  ;;  %v10027_v58 = vpop.f32.mrf.mxu1  ;;  %v10077_v18 = vpop.f32.mrf.mxu0 }
 0x45b   : > { %10375 = vmatprep.mubr.msk.f32.mxu0 %vm917_vm3, %v12431_v7  ;;  %v13082_v23 = vadd.f32 %v10077_v18, %v10027_v58  ;;  %v14219_v58 = vld [vmem:[#allocation84_spill] sm:$0xff] }
 0x45c   : > { %v4828_v7 = vpop.f32.mrf.mxu1  ;;  %v5152_v37 = vpop.f32.mrf.mxu0 }
 0x45d   : > { %10326 = vmatmul.mubr.msk.f32.gmra.mxu1 %vm917_vm3, %v14216_v34  ;;  %v13088_v28 = vadd.f32 %v5152_v37, %v4828_v7  ;;  %v14220_v37 = vld [vmem:[#allocation3_spill] sm:$0xff] }
 0x45e   : > { %10376 = vmatmul.mubr.msk.f32.gmra.mxu0 %vm917_vm3, %v14206_v54  ;;  %10328 = vmatprep.mubr.msk.f32.mxu1 %vm917_vm3, %v14217_v41 }
 0x45f   : > { %10378 = vmatprep.mubr.msk.f32.mxu0 %vm917_vm3, %v14207_v45  ;;  %v10030_v31 = vpop.f32.mrf.mxu1  ;;  %v10080_v1 = vpop.f32.mrf.mxu0 }
 0x460   : > { %v13094_v54 = vadd.f32 %v10080_v1, %v10030_v31  ;;  %v14221_v31 = vld [vmem:[#allocation4_spill] sm:$0xff] }
 0x461   : > { %10329 = vmatmul.mubr.msk.f32.gmra.mxu1 %vm917_vm3, %v14218_v51  ;;  %v4838_v45 = vpop.f32.mrf.mxu1  ;;  %v5162_v18 = vpop.f32.mrf.mxu0 }
 0x462   : > { %10379 = vmatmul.mubr.msk.f32.gmra.mxu0 %vm917_vm3, %v14208_v33  ;;  %10331 = vmatprep.mubr.msk.f32.mxu1 %vm917_vm3, %v14219_v58  ;;  %v13100_v34 = vadd.f32 %v5162_v18, %v4838_v45  ;;  %v14222_v18 = vld [vmem:[#allocation35_spill] sm:$0xff] }
 0x463   : > { %10381 = vmatprep.mubr.msk.f32.mxu0 %vm917_vm3, %v12495_v15  ;;  %v10033_v41 = vpop.f32.mrf.mxu1 }
 0x464   : > { %v10083_v7 = vpop.f32.mrf.mxu0 }
 0x465   : > { %10332 = vmatmul.mubr.msk.f32.gmra.mxu1 %vm917_vm3, %v14220_v37  ;;  %v13106_v33 = vadd.f32 %v10083_v7, %v10033_v41  ;;  %v4848_v15 = vpop.f32.mrf.mxu1  ;;  %v14223_v41 = vld [vmem:[#allocation38_spill] sm:$0xff] }
 0x466   : > { %10382 = vmatmul.mubr.msk.f32.gmra.mxu0 %vm917_vm3, %v12508_v48  ;;  %10334 = vmatprep.mubr.msk.f32.mxu1 %vm917_vm3, %v14221_v31  ;;  %v5172_v1 = vpop.f32.mrf.mxu0 }
 0x467   : > { %10384 = vmatprep.mubr.msk.f32.mxu0 %vm917_vm3, %v12524_v11  ;;  %v13112_v51 = vadd.f32 %v5172_v1, %v4848_v15  ;;  %v14224_v1 = vld [vmem:[#allocation87_spill] sm:$0xff] }
 0x468   : > { %v10036_v58 = vpop.f32.mrf.mxu1  ;;  %v10086_v45 = vpop.f32.mrf.mxu0 }
 0x469   : > { %10335 = vmatmul.mubr.msk.f32.gmra.mxu1 %vm917_vm3, %v14222_v18  ;;  %v13118_v48 = vadd.f32 %v10086_v45, %v10036_v58  ;;  %v14225_v58 = vld [vmem:[#allocation79_spill] sm:$0xff] }
 0x46a   : > { %10385 = vmatmul.mubr.msk.f32.gmra.mxu0 %vm917_vm3, %v12537_v26  ;;  %10337 = vmatprep.mubr.msk.f32.mxu1 %vm917_vm3, %v14223_v41  ;;  %v4858_v11 = vpop.f32.mrf.mxu1  ;;  %v5182_v7 = vpop.f32.mrf.mxu0 }
 0x46b   : > { %10387 = vmatprep.mubr.msk.f32.mxu0 %vm917_vm3, %v12552_v8  ;;  %v13124_v37 = vadd.f32 %v5182_v7, %v4858_v11  ;;  %v14226_v7 = vld [vmem:[#allocation5_spill] sm:$0xff] }
 0x46c   : > { %v10039_v31 = vpop.f32.mrf.mxu1  ;;  %v10089_v15 = vpop.f32.mrf.mxu0 }
 0x46d   : > { %10338 = vmatmul.mubr.msk.f32.gmra.mxu1 %vm917_vm3, %v14224_v1  ;;  %v13130_v26 = vadd.f32 %v10089_v15, %v10039_v31  ;;  %v14227_v31 = vld [vmem:[#allocation6_spill] sm:$0xff] }
 0x46e   : > { %10388 = vmatmul.mubr.msk.f32.gmra.mxu0 %vm917_vm3, %v12564_v47  ;;  %10340 = vmatprep.mubr.msk.f32.mxu1 %vm917_vm3, %v14225_v58  ;;  %v4868_v8 = vpop.f32.mrf.mxu1  ;;  %v5192_v45 = vpop.f32.mrf.mxu0 }
 0x46f   : > { %10390 = vmatprep.mubr.msk.f32.mxu0 %vm917_vm3, %v12574_v56  ;;  %v13136_v18 = vadd.f32 %v5192_v45, %v4868_v8  ;;  %v14228_v45 = vld [vmem:[#allocation11_spill] sm:$0xff] }
 0x470   : > { %v10042_v41 = vpop.f32.mrf.mxu1 }
 0x471   : > { %v10092_v11 = vpop.f32.mrf.mxu0  ;;  %10341 = vmatmul.mubr.msk.f32.gmra.mxu1 %vm917_vm3, %v14226_v7 }
 0x472   : > { %10391 = vmatmul.mubr.msk.f32.gmra.mxu0 %vm917_vm3, %v12587_v63  ;;  %v13142_v47 = vadd.f32 %v10092_v11, %v10042_v41  ;;  %10343 = vmatprep.mubr.msk.f32.mxu1 %vm917_vm3, %v14227_v31  ;;  %v4878_v56 = vpop.f32.mrf.mxu1  ;;  %v14229_v41 = vld [vmem:[#allocation9_spill] sm:$0xff] }
 0x473   : > { %10393 = vmatprep.mubr.msk.f32.mxu0 %vm917_vm3, %v12595_v55  ;;  %v5202_v15 = vpop.f32.mrf.mxu0 }
 0x474   : > { %v13148_v1 = vadd.f32 %v5202_v15, %v4878_v56  ;;  %v14230_v15 = vld [vmem:[#allocation37_spill] sm:$0xff] }
 0x475   : > { %v10045_v58 = vpop.f32.mrf.mxu1  ;;  %10344 = vmatmul.mubr.msk.f32.gmra.mxu1 %vm917_vm3, %v14228_v45 }
 0x476   : > { %v10095_v8 = vpop.f32.mrf.mxu0  ;;  %10394 = vmatmul.mubr.msk.f32.gmra.mxu0 %vm917_vm3, %v12607_v6  ;;  %10346 = vmatprep.mubr.msk.f32.mxu1 %vm917_vm3, %v14229_v41 }
 0x477   : > { %v13154_v63 = vadd.f32 %v10095_v8, %v10045_v58  ;;  %10396 = vmatprep.mubr.msk.f32.mxu0 %vm917_vm3, %v12615_v62  ;;  %v4888_v55 = vpop.f32.mrf.mxu1  ;;  %v14231_v58 = vld [vmem:[#allocation36_spill] sm:$0xff] }
 0x478   : > { %v5212_v11 = vpop.f32.mrf.mxu0 }
 0x479   : > { %v13160_v7 = vadd.f32 %v5212_v11, %v4888_v55  ;;  %v10048_v31 = vpop.f32.mrf.mxu1  ;;  %10347 = vmatmul.mubr.msk.f32.gmra.mxu1 %vm917_vm3, %v14230_v15  ;;  %v14232_v11 = vld [vmem:[#allocation90_spill] sm:$0xff] }
 0x47a   : > { %v10098_v56 = vpop.f32.mrf.mxu0  ;;  %10397 = vmatmul.mubr.msk.f32.gmra.mxu0 %vm917_vm3, %v12627_v46  ;;  %10349 = vmatprep.mubr.msk.f32.mxu1 %vm917_vm3, %v14231_v58 }
 0x47b   : > { %v13166_v6 = vadd.f32 %v10098_v56, %v10048_v31  ;;  %10399 = vmatprep.mubr.msk.f32.mxu0 %vm917_vm3, %v12634_v3  ;;  %v4898_v62 = vpop.f32.mrf.mxu1  ;;  %v14233_v31 = vld [vmem:[#allocation80_spill] sm:$0xff] }
 0x47c   : > { %v5222_v8 = vpop.f32.mrf.mxu0 }
 0x47d   : > { %v13172_v45 = vadd.f32 %v5222_v8, %v4898_v62  ;;  %v10051_v41 = vpop.f32.mrf.mxu1  ;;  %10350 = vmatmul.mubr.msk.f32.gmra.mxu1 %vm917_vm3, %v14232_v11  ;;  %v14234_v8 = vld [vmem:[#allocation42_spill] sm:$0xff]  ;;  %v7251_v11 = vld [vmem:[#allocation2 + $0x199] sm:$0xff] }
 0x47e   : > { %v10101_v55 = vpop.f32.mrf.mxu0  ;;  %10400 = vmatmul.mubr.msk.f32.gmra.mxu0 %vm917_vm3, %v12645_v35  ;;  %10352 = vmatprep.mubr.msk.f32.mxu1 %vm917_vm3, %v14233_v31 }
 0x47f   : > { %v13178_v46 = vadd.f32 %v10101_v55, %v10051_v41  ;;  %10402 = vmatprep.mubr.msk.f32.mxu0 %vm917_vm3, %v12651_v42  ;;  %v4908_v3 = vpop.f32.mrf.mxu1  ;;  %v6861_v55 = vld [vmem:[#allocation2 + $0x198] sm:$0xff] }
 0x480   : > { %v5232_v56 = vpop.f32.mrf.mxu0 }
 0x481   : > { %v13184_v15 = vadd.f32 %v5232_v56, %v4908_v3  ;;  %v10054_v58 = vpop.f32.mrf.mxu1  ;;  %10353 = vmatmul.mubr.msk.f32.gmra.mxu1 %vm917_vm3, %v12655_v16 }
 0x482   : > { %v10104_v62 = vpop.f32.mrf.mxu0  ;;  %10403 = vmatmul.mubr.msk.f32.gmra.mxu0 %vm917_vm3, %v12661_v49  ;;  %10355 = vmatprep.mubr.msk.f32.mxu1 %vm917_vm3, %v14234_v8  ;;  %v6862_v49 = vld [vmem:[#allocation2 + $0x1a0] sm:$0xff] }
 0x483   : > { %v13190_v35 = vadd.f32 %v10104_v62, %v10054_v58  ;;  %10405 = vmatprep.mubr.msk.f32.mxu0 %vm917_vm3, %v13008_v39  ;;  %v4918_v42 = vpop.f32.mrf.mxu1  ;;  %v7252_v39 = vld [vmem:[#allocation2 + $0x1a1] sm:$0xff] }
 0x484   : > { %v5242_v41 = vpop.f32.mrf.mxu0 }
 0x485   : > { %v13196_v31 = vadd.f32 %v5242_v41, %v4918_v42  ;;  %v10057_v3 = vpop.f32.mrf.mxu1  ;;  %10356 = vmatmul.mubr.msk.f32.gmra.mxu1 %vm917_vm3, %v12871_v14 }
 0x486   : > { %v10107_v56 = vpop.f32.mrf.mxu0  ;;  %10406 = vmatmul.mubr.msk.f32.gmra.mxu0 %vm917_vm3, %v13016_v19  ;;  %10358 = vmatprep.mubr.msk.f32.mxu1 %vm917_vm3, %v6861_v55 }
 0x487   : > { %v13202_v16 = vadd.f32 %v10107_v56, %v10057_v3  ;;  %10408 = vmatprep.mubr.msk.f32.mxu0 %vm917_vm3, %v7251_v11  ;;  %v4928_v58 = vpop.f32.mrf.mxu1 }
 0x488   : > { %v5252_v62 = vpop.f32.mrf.mxu0 }
 0x489   : > { %v13206_v8 = vadd.f32 %v5252_v62, %v4928_v58  ;;  %v10060_v42 = vpop.f32.mrf.mxu1  ;;  %10359 = vmatmul.mubr.msk.f32.gmra.mxu1 %vm917_vm3, %v6862_v49  ;;  %v5113_v58 = vadd.f32 %v13038_v25, %v13036_v30  ;;  %v14236_v49 = vld [vmem:[#allocation39_spill] sm:$0xff] }
 0x48a   : > { %v10110_v41 = vpop.f32.mrf.mxu0  ;;  %10409 = vmatmul.mubr.msk.f32.gmra.mxu0 %vm917_vm3, %v7252_v39  ;;  %10413 = vmatprep.mubr.msk.f32.mxu1 %vm917_vm3, %v12705_v22 }
 0x48b   : > { %v13210_v14 = vadd.f32 %v10110_v41, %v10060_v42  ;;  %v4938_v19 = vpop.f32.mrf.mxu1 }
 0x48c   : > { %v5262_v55 = vpop.f32.mrf.mxu0 }
 0x48d   : > { %v13214_v3 = vadd.f32 %v5262_v55, %v4938_v19  ;;  %v10115_v11 = vpop.f32.mrf.mxu1  ;;  %10414 = vmatmul.mubr.msk.f32.vlgmr.msra.gmra.mxu1 %vm917_vm3, %v12711_v12 }
 0x48e   : > { %v10165_v56 = vpop.f32.mrf.mxu0  ;;  %v5630_v62 = vadd.f32 %v10115_v11, %v14236_v49  ;;  %10416 = vmatprep.mubr.msk.f32.mxu1 %vm917_vm3, %v12717_v60 }
 0x48f   : > { %14235 = vst [vmem:[#allocation82_spill] sm:$0xff] %v13214_v3  ;;  %v5470_v39 = vpop.f32.mrf.mxu1 }
 0x490   : > { %v5860_v42 = vpop.f32.mrf.mxu0  ;;  %v13223_v22 = vadd.f32 %v10165_v56, %v5630_v62  ;;  %v5629_v41 = vadd.f32 %v5470_v39, %v5113_v58 }
 0x491   : > { %v10118_v19 = vpop.f32.mrf.mxu1  ;;  %10417 = vmatmul.mubr.msk.f32.gmra.mxu1 %vm917_vm3, %v12723_v13 }
 0x492   : > { %v10168_v55 = vpop.f32.mrf.mxu0  ;;  %v13227_v3 = vadd.f32 %v5860_v42, %v5629_v41  ;;  %v5632_v12 = vadd.f32 %v10118_v19, %v13046_v0  ;;  %10419 = vmatprep.mubr.msk.f32.mxu1 %vm917_vm3, %v12729_v40 }
 0x493   : > { %v5480_v30 = vpop.f32.mrf.mxu1 }
 0x494   : > { %v5870_v25 = vpop.f32.mrf.mxu0  ;;  %v13232_v60 = vadd.f32 %v10168_v55, %v5632_v12  ;;  %v5631_v11 = vadd.f32 %v5480_v30, %v13052_v61 }
 0x495   : > { %v10121_v56 = vpop.f32.mrf.mxu1  ;;  %10420 = vmatmul.mubr.msk.f32.gmra.mxu1 %vm917_vm3, %v12735_v10 }
 0x496   : > { %v10171_v58 = vpop.f32.mrf.mxu0  ;;  %v13237_v49 = vadd.f32 %v5870_v25, %v5631_v11  ;;  %v5634_v13 = vadd.f32 %v10121_v56, %v13058_v29  ;;  %10422 = vmatprep.mubr.msk.f32.mxu1 %vm917_vm3, %v12741_v24 }
 0x497   : > { %v5490_v0 = vpop.f32.mrf.mxu1 }
 0x498   : > { %v5880_v40 = vpop.f32.mrf.mxu0  ;;  %v13242_v62 = vadd.f32 %v10171_v58, %v5634_v13  ;;  %v5633_v39 = vadd.f32 %v5490_v0, %v13064_v32 }
 0x499   : > { %v10124_v42 = vpop.f32.mrf.mxu1  ;;  %10423 = vmatmul.mubr.msk.f32.gmra.mxu1 %vm917_vm3, %v12747_v21 }
 0x49a   : > { %v10174_v61 = vpop.f32.mrf.mxu0  ;;  %v13247_v41 = vadd.f32 %v5880_v40, %v5633_v39  ;;  %v5636_v10 = vadd.f32 %v10124_v42, %v13070_v52  ;;  %10425 = vmatprep.mubr.msk.f32.mxu1 %vm917_vm3, %v12753_v4 }
 0x49b   : > { %v5500_v29 = vpop.f32.mrf.mxu1 }
 0x49c   : > { %v5890_v24 = vpop.f32.mrf.mxu0  ;;  %v13252_v19 = vadd.f32 %v10174_v61, %v5636_v10  ;;  %v5635_v55 = vadd.f32 %v5500_v29, %v13076_v20 }
 0x49d   : > { %v10127_v12 = vpop.f32.mrf.mxu1  ;;  %10426 = vmatmul.mubr.msk.f32.gmra.mxu1 %vm917_vm3, %v12759_v36 }
 0x49e   : > { %v10177_v32 = vpop.f32.mrf.mxu0  ;;  %v13257_v30 = vadd.f32 %v5890_v24, %v5635_v55  ;;  %v5638_v21 = vadd.f32 %v10127_v12, %v13082_v23  ;;  %10428 = vmatprep.mubr.msk.f32.mxu1 %vm917_vm3, %v12765_v43 }
 0x49f   : > { %v5510_v52 = vpop.f32.mrf.mxu1 }
 0x4a0   : > { %v5900_v4 = vpop.f32.mrf.mxu0  ;;  %v13262_v25 = vadd.f32 %v10177_v32, %v5638_v21  ;;  %v5637_v11 = vadd.f32 %v5510_v52, %v13088_v28 }
 0x4a1   : > { %v10130_v56 = vpop.f32.mrf.mxu1  ;;  %10429 = vmatmul.mubr.msk.f32.gmra.mxu1 %vm917_vm3, %v12771_v5 }
 0x4a2   : > { %v10180_v20 = vpop.f32.mrf.mxu0  ;;  %v13267_v58 = vadd.f32 %v5900_v4, %v5637_v11  ;;  %v5640_v36 = vadd.f32 %v10130_v56, %v13094_v54  ;;  %10431 = vmatprep.mubr.msk.f32.mxu1 %vm917_vm3, %v12777_v2  ;;  %v7630_v4 = vld [vmem:[#allocation2 + $0x112] sm:$0xff] }
 0x4a3   : > { %v5520_v23 = vpop.f32.mrf.mxu1 }
 0x4a4   : > { %v5910_v43 = vpop.f32.mrf.mxu0  ;;  %v13272_v13 = vadd.f32 %v10180_v20, %v5640_v36  ;;  %v5639_v0 = vadd.f32 %v5520_v23, %v13100_v34  ;;  %v7632_v23 = vld [vmem:[#allocation2 + $0x12a] sm:$0xff] }
 0x4a5   : > { %v10133_v40 = vpop.f32.mrf.mxu1  ;;  %10432 = vmatmul.mubr.msk.f32.gmra.mxu1 %vm917_vm3, %v12783_v57 }
 0x4a6   : > { %v10183_v28 = vpop.f32.mrf.mxu0  ;;  %v13277_v39 = vadd.f32 %v5910_v43, %v5639_v0  ;;  %v5642_v5 = vadd.f32 %v10133_v40, %v13106_v33  ;;  %10434 = vmatprep.mubr.msk.f32.mxu1 %vm917_vm3, %v12789_v53  ;;  %v7633_v0 = vld [vmem:[#allocation2 + $0x13a] sm:$0xff] }
 0x4a7   : > { %v5530_v54 = vpop.f32.mrf.mxu1 }
 0x4a8   : > { %v5920_v2 = vpop.f32.mrf.mxu0  ;;  %v13282_v42 = vadd.f32 %v10183_v28, %v5642_v5  ;;  %v5641_v61 = vadd.f32 %v5530_v54, %v13112_v51 }
 0x4a9   : > { %v10136_v10 = vpop.f32.mrf.mxu1  ;;  %10435 = vmatmul.mubr.msk.f32.gmra.mxu1 %vm917_vm3, %v12795_v59 }
 0x4aa   : > { %v10186_v34 = vpop.f32.mrf.mxu0  ;;  %v13287_v29 = vadd.f32 %v5920_v2, %v5641_v61  ;;  %v5644_v57 = vadd.f32 %v10136_v10, %v13118_v48  ;;  %10437 = vmatprep.mubr.msk.f32.mxu1 %vm917_vm3, %v12801_v44  ;;  %v7634_v2 = vld [vmem:[#allocation2 + $0x142] sm:$0xff]  ;;  %v7635_v10 = vld [vmem:[#allocation2 + $0x152] sm:$0xff] }
 0x4ab   : > { %v5540_v33 = vpop.f32.mrf.mxu1 }
 0x4ac   : > { %v5930_v53 = vpop.f32.mrf.mxu0  ;;  %v13292_v24 = vadd.f32 %v10186_v34, %v5644_v57  ;;  %v5643_v55 = vadd.f32 %v5540_v33, %v13124_v37 }
 0x4ad   : > { %v10139_v12 = vpop.f32.mrf.mxu1  ;;  %10438 = vmatmul.mubr.msk.f32.gmra.mxu1 %vm917_vm3, %v12807_v17 }
 0x4ae   : > { %v10189_v51 = vpop.f32.mrf.mxu0  ;;  %v13297_v32 = vadd.f32 %v5930_v53, %v5643_v55  ;;  %v5646_v59 = vadd.f32 %v10139_v12, %v13130_v26  ;;  %10440 = vmatprep.mubr.msk.f32.mxu1 %vm917_vm3, %v12813_v38  ;;  %v7636_v12 = vld [vmem:[#allocation2 + $0x15a] sm:$0xff] }
 0x4af   : > { %v5550_v48 = vpop.f32.mrf.mxu1 }
 0x4b0   : > { %v5940_v44 = vpop.f32.mrf.mxu0  ;;  %v13302_v21 = vadd.f32 %v10189_v51, %v5646_v59  ;;  %v5645_v52 = vadd.f32 %v5550_v48, %v13136_v18  ;;  %v7637_v59 = vld [vmem:[#allocation2 + $0x16a] sm:$0xff] }
 0x4b1   : > { %v10142_v37 = vpop.f32.mrf.mxu1  ;;  %10441 = vmatmul.mubr.msk.f32.gmra.mxu1 %vm917_vm3, %v7630_v4 }
 0x4b2   : > { %v10192_v11 = vpop.f32.mrf.mxu0  ;;  %v13306_v56 = vadd.f32 %v5940_v44, %v5645_v52  ;;  %v5648_v17 = vadd.f32 %v10142_v37, %v13142_v47  ;;  %10443 = vmatprep.mubr.msk.f32.mxu1 %vm917_vm3, %v12825_v27 }
 0x4b3   : > { %v5560_v26 = vpop.f32.mrf.mxu1 }
 0x4b4   : > { %v5950_v38 = vpop.f32.mrf.mxu0  ;;  %v13311_v20 = vadd.f32 %v10192_v11, %v5648_v17  ;;  %v5647_v36 = vadd.f32 %v5560_v26, %v13148_v1  ;;  %v7638_v11 = vld [vmem:[#allocation2 + $0x172] sm:$0xff] }
 0x4b5   : > { %v10145_v18 = vpop.f32.mrf.mxu1  ;;  %10444 = vmatmul.mubr.msk.f32.gmra.mxu1 %vm917_vm3, %v7632_v23  ;;  %v7641_v23 = vld [vmem:[#allocation2 + $0x19a] sm:$0xff] }
 0x4b6   : > { %v10195_v43 = vpop.f32.mrf.mxu0  ;;  %v13315_v40 = vadd.f32 %v5950_v38, %v5647_v36  ;;  %v5650_v28 = vadd.f32 %v10145_v18, %v13154_v63  ;;  %10446 = vmatprep.mubr.msk.f32.mxu1 %vm917_vm3, %v7633_v0 }
 0x4b7   : > { %v5570_v47 = vpop.f32.mrf.mxu1 }
 0x4b8   : > { %v5960_v27 = vpop.f32.mrf.mxu0  ;;  %v13319_v5 = vadd.f32 %v10195_v43, %v5650_v28  ;;  %v5649_v54 = vadd.f32 %v5570_v47, %v13160_v7 }
 0x4b9   : > { %v10148_v1 = vpop.f32.mrf.mxu1  ;;  %10447 = vmatmul.mubr.msk.f32.gmra.mxu1 %vm917_vm3, %v7634_v2 }
 0x4ba   : > { %v10198_v61 = vpop.f32.mrf.mxu0  ;;  %v13323_v34 = vadd.f32 %v5960_v27, %v5649_v54  ;;  %v5652_v57 = vadd.f32 %v10148_v1, %v13166_v6  ;;  %10449 = vmatprep.mubr.msk.f32.mxu1 %vm917_vm3, %v7635_v10 }
 0x4bb   : > { %v5580_v63 = vpop.f32.mrf.mxu1 }
 0x4bc   : > { %v5970_v33 = vpop.f32.mrf.mxu0  ;;  %v13327_v53 = vadd.f32 %v10198_v61, %v5652_v57  ;;  %v5651_v55 = vadd.f32 %v5580_v63, %v13172_v45  ;;  %v14237_v63 = vld [vmem:[#allocation82_spill] sm:$0xff] }
 0x4bd   : > { %v10151_v7 = vpop.f32.mrf.mxu1  ;;  %10450 = vmatmul.mubr.msk.f32.gmra.mxu1 %vm917_vm3, %v7636_v12 }
 0x4be   : > { %v10201_v51 = vpop.f32.mrf.mxu0  ;;  %v13331_v48 = vadd.f32 %v5970_v33, %v5651_v55  ;;  %v5654_v44 = vadd.f32 %v10151_v7, %v13178_v46  ;;  %10452 = vmatprep.mubr.msk.f32.mxu1 %vm917_vm3, %v7637_v59 }
 0x4bf   : > { %v5590_v6 = vpop.f32.mrf.mxu1 }
 0x4c0   : > { %v5980_v52 = vpop.f32.mrf.mxu0  ;;  %v13335_v4 = vadd.f32 %v10201_v51, %v5654_v44  ;;  %v5653_v37 = vadd.f32 %v5590_v6, %v13184_v15 }
 0x4c1   : > { %v10154_v45 = vpop.f32.mrf.mxu1  ;;  %10453 = vmatmul.mubr.msk.f32.gmra.mxu1 %vm917_vm3, %v7638_v11 }
 0x4c2   : > { %v10204_v17 = vpop.f32.mrf.mxu0  ;;  %v13339_v26 = vadd.f32 %v5980_v52, %v5653_v37  ;;  %v5656_v38 = vadd.f32 %v10154_v45, %v13190_v35  ;;  %10455 = vmatprep.mubr.msk.f32.mxu1 %vm917_vm3, %v13010_v9  ;;  %v7642_v35 = vld [vmem:[#allocation2 + $0x1a2] sm:$0xff] }
 0x4c3   : > { %v5600_v46 = vpop.f32.mrf.mxu1 }
 0x4c4   : > { %v5990_v36 = vpop.f32.mrf.mxu0  ;;  %v13344_v18 = vadd.f32 %v10204_v17, %v5656_v38  ;;  %v5655_v43 = vadd.f32 %v5600_v46, %v13196_v31 }
 0x4c5   : > { %v10157_v15 = vpop.f32.mrf.mxu1  ;;  %10456 = vmatmul.mubr.msk.f32.gmra.mxu1 %vm917_vm3, %v13018_v50 }
 0x4c6   : > { %v10207_v0 = vpop.f32.mrf.mxu0  ;;  %v13349_v28 = vadd.f32 %v5990_v36, %v5655_v43  ;;  %v5658_v47 = vadd.f32 %v10157_v15, %v13202_v16  ;;  %10458 = vmatprep.mubr.msk.f32.mxu1 %vm917_vm3, %v7641_v23 }
 0x4c7   : > { %v5610_v9 = vpop.f32.mrf.mxu1 }
 0x4c8   : > { %v6000_v27 = vpop.f32.mrf.mxu0  ;;  %v13353_v54 = vadd.f32 %v10207_v0, %v5658_v47  ;;  %v5657_v2 = vadd.f32 %v5610_v9, %v13206_v8 }
 0x4c9   : > { %v10160_v1 = vpop.f32.mrf.mxu1  ;;  %10459 = vmatmul.mubr.msk.f32.gmra.mxu1 %vm917_vm3, %v7642_v35 }
 0x4ca   : > { %v10210_v31 = vpop.f32.mrf.mxu0  ;;  %v13357_v61 = vadd.f32 %v6000_v27, %v5657_v2  ;;  %v5660_v50 = vadd.f32 %v10160_v1, %v13210_v14 }
 0x4cb   : > { %v5620_v10 = vpop.f32.mrf.mxu1 }
 0x4cc   : > { %v6010_v57 = vpop.f32.mrf.mxu0  ;;  %v13360_v16 = vadd.f32 %v10210_v31, %v5660_v50  ;;  %v5659_v33 = vadd.f32 %v5620_v10, %v14237_v63 }
 0x4cd   : > { %v10215_v55 = vpop.f32.mrf.mxu1 }
 0x4ce   : > { %v13363_v12 = vpop.f32.mrf.mxu0  ;;  %v13365_v7 = vadd.f32 %v6010_v57, %v5659_v33  ;;  %v13368_v8 = vadd.f32 %v10215_v55, %v13223_v22 }
 0x4cf   : > { %v6250_v51 = vpop.f32.mrf.mxu1 }
 0x4d0   : > { %v13370_v59 = vpop.f32.mrf.mxu0  ;;  %v13373_v44 = vadd.f32 %v6250_v51, %v13227_v3 }
 0x4d1   : > { %v10218_v14 = vpop.f32.mrf.mxu1 }
 0x4d2   : > { %v13375_v6 = vpop.f32.mrf.mxu0  ;;  %v13378_v52 = vadd.f32 %v10218_v14, %v13232_v60 }
 0x4d3   : > { %v6260_v37 = vpop.f32.mrf.mxu1 }
 0x4d4   : > { %v13380_v11 = vpop.f32.mrf.mxu0  ;;  %v13383_v45 = vadd.f32 %v6260_v37, %v13237_v49 }
 0x4d5   : > { %v10221_v22 = vpop.f32.mrf.mxu1 }
 0x4d6   : > { %v13385_v17 = vpop.f32.mrf.mxu0  ;;  %v13388_v38 = vadd.f32 %v10221_v22, %v13242_v62 }
 0x4d7   : > { %v6270_v3 = vpop.f32.mrf.mxu1 }
 0x4d8   : > { %v13390_v46 = vpop.f32.mrf.mxu0  ;;  %v13393_v36 = vadd.f32 %v6270_v3, %v13247_v41 }
 0x4d9   : > { %v10224_v60 = vpop.f32.mrf.mxu1 }
 0x4da   : > { %v13395_v23 = vpop.f32.mrf.mxu0  ;;  %v13398_v43 = vadd.f32 %v10224_v60, %v13252_v19 }
 0x4db   : > { %v6280_v49 = vpop.f32.mrf.mxu1 }
 0x4dc   : > { %v13400_v15 = vpop.f32.mrf.mxu0  ;;  %v13403_v0 = vadd.f32 %v6280_v49, %v13257_v30 }
 0x4dd   : > { %v10227_v62 = vpop.f32.mrf.mxu1 }
 0x4de   : > { %v13405_v47 = vpop.f32.mrf.mxu0  ;;  %v13408_v35 = vadd.f32 %v10227_v62, %v13262_v25 }
 0x4df   : > { %v6290_v41 = vpop.f32.mrf.mxu1 }
 0x4e0   : > { %v13410_v9 = vpop.f32.mrf.mxu0  ;;  %v13413_v27 = vadd.f32 %v6290_v41, %v13267_v58 }
 0x4e1   : > { %v10230_v19 = vpop.f32.mrf.mxu1 }
 0x4e2   : > { %v13415_v2 = vpop.f32.mrf.mxu0  ;;  %v13418_v1 = vadd.f32 %v10230_v19, %v13272_v13 }
 0x4e3   : > { %v6300_v30 = vpop.f32.mrf.mxu1 }
 0x4e4   : > { %v13420_v31 = vpop.f32.mrf.mxu0  ;;  %v13423_v50 = vadd.f32 %v6300_v30, %v13277_v39 }
 0x4e5   : > { %v10233_v25 = vpop.f32.mrf.mxu1 }
 0x4e6   : > { %v13425_v10 = vpop.f32.mrf.mxu0  ;;  %v13428_v57 = vadd.f32 %v10233_v25, %v13282_v42 }
 0x4e7   : > { %v6310_v58 = vpop.f32.mrf.mxu1 }
 0x4e8   : > { %v13430_v63 = vpop.f32.mrf.mxu0  ;;  %v13433_v33 = vadd.f32 %v6310_v58, %v13287_v29 }
 0x4e9   : > { %v10236_v13 = vpop.f32.mrf.mxu1 }
 0x4ea   : > { %v13435_v55 = vpop.f32.mrf.mxu0  ;;  %v13438_v51 = vadd.f32 %v10236_v13, %v13292_v24 }
 0x4eb   : > { %14238 = vst [vmem:[#allocation93_spill] sm:$0xff] %v13435_v55  ;;  %v6320_v39 = vpop.f32.mrf.mxu1 }
 0x4ec   : > { %v13440_v14 = vpop.f32.mrf.mxu0  ;;  %v13443_v37 = vadd.f32 %v6320_v39, %v13297_v32 }
 0x4ed   : > { %14239 = vst [vmem:[#allocation10_spill] sm:$0xff] %v13440_v14  ;;  %v10239_v42 = vpop.f32.mrf.mxu1 }
 0x4ee   : > { %14240 = vst [vmem:[#allocation12_spill] sm:$0xff] %v13443_v37  ;;  %v13445_v22 = vpop.f32.mrf.mxu0  ;;  %v13448_v3 = vadd.f32 %v10239_v42, %v13302_v21 }
 0x4ef   : > { %14241 = vst [vmem:[#allocation14_spill] sm:$0xff] %v13445_v22  ;;  %v6330_v29 = vpop.f32.mrf.mxu1 }
 0x4f0   : > { %14242 = vst [vmem:[#allocation41_spill] sm:$0xff] %v13448_v3  ;;  %v13450_v60 = vpop.f32.mrf.mxu0  ;;  %v13453_v49 = vadd.f32 %v6330_v29, %v13306_v56 }
 0x4f1   : > { %14243 = vst [vmem:[#allocation40_spill] sm:$0xff] %v13450_v60  ;;  %v10242_v24 = vpop.f32.mrf.mxu1 }
 0x4f2   : > { %14244 = vst [vmem:[#allocation83_spill] sm:$0xff] %v13453_v49  ;;  %v13455_v62 = vpop.f32.mrf.mxu0  ;;  %v13458_v41 = vadd.f32 %v10242_v24, %v13311_v20 }
 0x4f3   : > { %14245 = vst [vmem:[#allocation96_spill] sm:$0xff] %v13455_v62  ;;  %v6340_v32 = vpop.f32.mrf.mxu1 }
 0x4f4   : > { %14246 = vst [vmem:[#allocation43_spill] sm:$0xff] %v13458_v41  ;;  %v13460_v19 = vpop.f32.mrf.mxu0  ;;  %v13463_v30 = vadd.f32 %v6340_v32, %v13315_v40 }
 0x4f5   : > { %14247 = vst [vmem:[#allocation46_spill] sm:$0xff] %v13460_v19  ;;  %v10245_v21 = vpop.f32.mrf.mxu1 }
 0x4f6   : > { %14248 = vst [vmem:[#allocation85_spill] sm:$0xff] %v13463_v30  ;;  %v13465_v25 = vpop.f32.mrf.mxu0  ;;  %v13468_v58 = vadd.f32 %v10245_v21, %v13319_v5 }
 0x4f7   : > { %14249 = vst [vmem:[#allocation13_spill] sm:$0xff] %v13465_v25  ;;  %v6350_v56 = vpop.f32.mrf.mxu1 }
 0x4f8   : > { %14250 = vst [vmem:[#allocation16_spill] sm:$0xff] %v13468_v58  ;;  %v13470_v13 = vpop.f32.mrf.mxu0  ;;  %v13473_v39 = vadd.f32 %v6350_v56, %v13323_v34 }
 0x4f9   : > { %14251 = vst [vmem:[#allocation45_spill] sm:$0xff] %v13470_v13  ;;  %v10248_v20 = vpop.f32.mrf.mxu1 }
 0x4fa   : > { %14252 = vst [vmem:[#allocation44_spill] sm:$0xff] %v13473_v39  ;;  %v13475_v42 = vpop.f32.mrf.mxu0  ;;  %v13478_v29 = vadd.f32 %v10248_v20, %v13327_v53 }
 0x4fb   : > { %14253 = vst [vmem:[#allocation86_spill] sm:$0xff] %v13475_v42  ;;  %v6360_v40 = vpop.f32.mrf.mxu1 }
 0x4fc   : > { %14254 = vst [vmem:[#allocation47_spill] sm:$0xff] %v13478_v29  ;;  %v13480_v24 = vpop.f32.mrf.mxu0  ;;  %v13483_v32 = vadd.f32 %v6360_v40, %v13331_v48 }
 0x4fd   : > { %14255 = vst [vmem:[#allocation50_spill] sm:$0xff] %v13480_v24  ;;  %v10251_v5 = vpop.f32.mrf.mxu1 }
 0x4fe   : > { %14256 = vst [vmem:[#allocation88_spill] sm:$0xff] %v13483_v32  ;;  %v13485_v21 = vpop.f32.mrf.mxu0  ;;  %v13488_v13 = vadd.f32 %v10251_v5, %v13335_v4 }
 0x4ff   : > { %14257 = vst [vmem:[#allocation15_spill] sm:$0xff] %v13485_v21  ;;  %v6370_v34 = vpop.f32.mrf.mxu1 }
 0x500   : > { %14258 = vst [vmem:[#allocation18_spill] sm:$0xff] %v13488_v13  ;;  %v13490_v56 = vpop.f32.mrf.mxu0  ;;  %v13493_v42 = vadd.f32 %v6370_v34, %v13339_v26 }
 0x501   : > { %14259 = vst [vmem:[#allocation49_spill] sm:$0xff] %v13490_v56  ;;  %v10254_v53 = vpop.f32.mrf.mxu1 }
 0x502   : > { %14260 = vst [vmem:[#allocation48_spill] sm:$0xff] %v13493_v42  ;;  %v13495_v20 = vpop.f32.mrf.mxu0  ;;  %v13498_v24 = vadd.f32 %v10254_v53, %v13344_v18 }
 0x503   : > { %14261 = vst [vmem:[#allocation89_spill] sm:$0xff] %v13495_v20  ;;  %v6380_v48 = vpop.f32.mrf.mxu1 }
 0x504   : > { %14262 = vst [vmem:[#allocation51_spill] sm:$0xff] %v13498_v24  ;;  %v13500_v40 = vpop.f32.mrf.mxu0  ;;  %v13503_v21 = vadd.f32 %v6380_v48, %v13349_v28 }
 0x505   : > { %14263 = vst [vmem:[#allocation54_spill] sm:$0xff] %v13500_v40  ;;  %v10257_v4 = vpop.f32.mrf.mxu1 }
 0x506   : > { %14264 = vst [vmem:[#allocation91_spill] sm:$0xff] %v13503_v21  ;;  %v13505_v5 = vpop.f32.mrf.mxu0  ;;  %v13508_v56 = vadd.f32 %v10257_v4, %v13353_v54 }
 0x507   : > { %14265 = vst [vmem:[#allocation17_spill] sm:$0xff] %v13505_v5  ;;  %v6390_v26 = vpop.f32.mrf.mxu1 }
 0x508   : > { %14266 = vst [vmem:[#allocation20_spill] sm:$0xff] %v13508_v56  ;;  %v13510_v34 = vpop.f32.mrf.mxu0  ;;  %v13513_v20 = vadd.f32 %v6390_v26, %v13357_v61 }
 0x509   : > { %14267 = vst [vmem:[#allocation53_spill] sm:$0xff] %v13510_v34  ;;  %v10260_v18 = vpop.f32.mrf.mxu1 }
 0x50a   : > { %14268 = vst [vmem:[#allocation52_spill] sm:$0xff] %v13513_v20  ;;  %v13515_v53 = vpop.f32.mrf.mxu0  ;;  %v13518_v40 = vadd.f32 %v10260_v18, %v13360_v16 }
 0x50b   : > { %14269 = vst [vmem:[#allocation92_spill] sm:$0xff] %v13515_v53  ;;  %v6400_v28 = vpop.f32.mrf.mxu1 }
 0x50c   : > { %14270 = vst [vmem:[#allocation55_spill] sm:$0xff] %v13518_v40  ;;  %v13520_v48 = vpop.f32.mrf.mxu0  ;;  %v13523_v5 = vadd.f32 %v6400_v28, %v13365_v7 }
 0x50d   : > { %14271 = vst [vmem:[#allocation58_spill] sm:$0xff] %v13520_v48  ;;  %v10315_v54 = vpop.f32.mrf.mxu1 }
 0x50e   : > { %14272 = vst [vmem:[#allocation94_spill] sm:$0xff] %v13523_v5  ;;  %v10365_v4 = vpop.f32.mrf.mxu0 }
 0x50f   : > { %v7030_v56 = vpop.f32.mrf.mxu1 }
 0x510   : > { %v7420_v21 = vpop.f32.mrf.mxu0 }
 0x511   : > { %v10318_v34 = vpop.f32.mrf.mxu1 }
 0x512   : > { %v10368_v61 = vpop.f32.mrf.mxu0 }
 0x513   : > { %v7040_v24 = vpop.f32.mrf.mxu1 }
 0x514   : > { %v13527_v53 = vpop.f32.mrf.mxu0 }
 0x515   : > { %v10321_v26 = vpop.f32.mrf.mxu1 }
 0x516   : > { %v13533_v48 = vpop.f32.mrf.mxu0 }
 0x517   : > { %v13525_v20 = vpop.f32.mrf.mxu1 }
 0x518   : > { %v13539_v5 = vpop.f32.mrf.mxu0 }
 0x519   : > { %v13529_v16 = vpop.f32.mrf.mxu1 }
 0x51a   : > { %v13545_v13 = vpop.f32.mrf.mxu0 }
 0x51b   : > { %v13531_v18 = vpop.f32.mrf.mxu1 }
 0x51c   : > { %v13551_v39 = vpop.f32.mrf.mxu0 }
 0x51d   : > { %v13535_v7 = vpop.f32.mrf.mxu1 }
 0x51e   : > { %v13557_v19 = vpop.f32.mrf.mxu0 }
 0x51f   : > { %v13537_v28 = vpop.f32.mrf.mxu1 }
 0x520   : > { %v13563_v41 = vpop.f32.mrf.mxu0 }
 0x521   : > { %v13541_v40 = vpop.f32.mrf.mxu1 }
 0x522   : > { %v13569_v22 = vpop.f32.mrf.mxu0 }
 0x523   : > { %v13543_v42 = vpop.f32.mrf.mxu1 }
 0x525   : > { %v13547_v32 = vpop.f32.mrf.mxu1 }
 0x527   : > { %v13549_v29 = vpop.f32.mrf.mxu1 }
 0x528   : > { %14273 = vst [vmem:[#allocation19_spill] sm:$0xff] %v13549_v29 }
 0x529   : > { %v13553_v25 = vpop.f32.mrf.mxu1 }
 0x52a   : > { %14274 = vst [vmem:[#allocation22_spill] sm:$0xff] %v13553_v25  ;;  %v13575_v25 = vpop.f32.mrf.mxu0 }
 0x52b   : > { %v13555_v58 = vpop.f32.mrf.mxu1 }
 0x52c   : > { %14275 = vst [vmem:[#allocation57_spill] sm:$0xff] %v13555_v58 }
 0x52d   : > { %v13559_v30 = vpop.f32.mrf.mxu1 }
 0x52e   : > { %14276 = vst [vmem:[#allocation56_spill] sm:$0xff] %v13559_v30  ;;  %v13581_v30 = vpop.f32.mrf.mxu0 }
 0x52f   : > { %v13561_v62 = vpop.f32.mrf.mxu1  ;;  %14284 = vst [vmem:[#allocation60_spill] sm:$0xff] %v13581_v30 }
 0x530   : > { %14277 = vst [vmem:[#allocation95_spill] sm:$0xff] %v13561_v62 }
 0x531   : > { %v13565_v60 = vpop.f32.mrf.mxu1 }
 0x532   : > { %14278 = vst [vmem:[#allocation59_spill] sm:$0xff] %v13565_v60  ;;  %v13587_v60 = vpop.f32.mrf.mxu0 }
 0x533   : > { %v13567_v49 = vpop.f32.mrf.mxu1  ;;  %14287 = vst [vmem:[#allocation66_spill] sm:$0xff] %v13587_v60 }
 0x534   : > { %14279 = vst [vmem:[#allocation62_spill] sm:$0xff] %v13567_v49 }
 0x535   : > { %v13571_v3 = vpop.f32.mrf.mxu1 }
 0x536   : > { %14280 = vst [vmem:[#allocation97_spill] sm:$0xff] %v13571_v3  ;;  %v13593_v3 = vpop.f32.mrf.mxu0 }
 0x537   : > { %v13573_v14 = vpop.f32.mrf.mxu1  ;;  %14290 = vst [vmem:[#allocation65_spill] sm:$0xff] %v13593_v3 }
 0x538   : > { %14281 = vst [vmem:[#allocation21_spill] sm:$0xff] %v13573_v14 }
 0x539   : > { %v13577_v58 = vpop.f32.mrf.mxu1 }
 0x53a   : > { %14282 = vst [vmem:[#allocation25_spill] sm:$0xff] %v13577_v58  ;;  %v6800_v58 = vadd.f32 %v13363_v12, %v13368_v8 }
 0x53b   : > { %v13579_v37 = vpop.f32.mrf.mxu1 }
 0x53c   : > { %14283 = vst [vmem:[#allocation61_spill] sm:$0xff] %v13579_v37  ;;  %v7190_v30 = vadd.f32 %v10315_v54, %v6800_v58  ;;  %v13620_v54 = vld [vmem:[%s13852_s8] ss:$0 sm:$0xff] }
 0x53d   : > { %v13583_v62 = vpop.f32.mrf.mxu1 }
 0x53e   : > { %14285 = vst [vmem:[#allocation98_spill] sm:$0xff] %v13583_v62  ;;  %v6799_v62 = vadd.f32 %v13370_v59, %v13373_v44  ;;  %v7580_v12 = vadd.f32 %v10365_v4, %v7190_v30  ;;  %v6804_v59 = vadd.f32 %v13385_v17, %v13388_v38  ;;  %v6806_v38 = vadd.f32 %v13395_v23, %v13398_v43 }
 0x53f   : > { %v13585_v29 = vpop.f32.mrf.mxu1  ;;  %v6805_v4 = vadd.f32 %v13400_v15, %v13403_v0 }
 0x540   : > { %14286 = vst [vmem:[#allocation63_spill] sm:$0xff] %v13585_v29  ;;  %v13603_v29 = vpop.f32.mrf.mxu0  ;;  %v7196_v23 = vadd.f32 %v13529_v16, %v6806_v38 }
 0x541   : > { %v13589_v49 = vpop.f32.mrf.mxu1  ;;  %v7195_v0 = vadd.f32 %v13531_v18, %v6805_v4 }
 0x542   : > { %14288 = vst [vmem:[#allocation24_spill] sm:$0xff] %v13589_v49  ;;  %v7189_v49 = vadd.f32 %v7030_v56, %v6799_v62  ;;  %v13615_v44 = vpop.f32.mrf.mxu0 }
 0x543   : > { %v13591_v55 = vpop.f32.mrf.mxu1 }
 0x544   : > { %14289 = vst [vmem:[#allocation29_spill] sm:$0xff] %v13591_v55  ;;  %v6802_v55 = vadd.f32 %v13375_v6, %v13378_v52  ;;  %v7579_v6 = vadd.f32 %v7420_v21, %v7189_v49  ;;  %v13635_v49 = vpop.f32.mrf.mxu0 }
 0x545   : > { %v13595_v14 = vpop.f32.mrf.mxu1 }
 0x546   : > { %14291 = vst [vmem:[#allocation64_spill] sm:$0xff] %v13595_v14  ;;  %v6801_v14 = vadd.f32 %v13380_v11, %v13383_v45  ;;  %v7192_v8 = vadd.f32 %v10318_v34, %v6802_v55  ;;  %v6803_v11 = vadd.f32 %v13390_v46, %v13393_v36  ;;  %v7194_v45 = vadd.f32 %v10321_v26, %v6804_v59  ;;  %v13649_v59 = vpop.f32.mrf.mxu0 }
 0x547   : > { %v13599_v37 = vpop.f32.mrf.mxu1 }
 0x548   : > { %v7191_v52 = vadd.f32 %v7040_v24, %v6801_v14  ;;  %v7582_v55 = vadd.f32 %v10368_v61, %v7192_v8  ;;  %v7193_v14 = vadd.f32 %v13525_v20, %v6803_v11  ;;  %v7584_v61 = vadd.f32 %v13533_v48, %v7194_v45 }
 0x549   : > { %v13605_v60 = vpop.f32.mrf.mxu1  ;;  %v6810_v11 = vadd.f32 %v13415_v2, %v13418_v1 }
 0x54a   : > { %v7581_v36 = vadd.f32 %v13527_v53, %v7191_v52  ;;  %v7583_v8 = vadd.f32 %v13539_v5, %v7193_v14  ;;  %v6812_v14 = vadd.f32 %v13425_v10, %v13428_v57 }
 0x54b   : > { %v13609_v3 = vpop.f32.mrf.mxu1  ;;  %v7200_v1 = vadd.f32 %v13541_v40, %v6810_v11 }
 0x54d   : > { %v10415_v58 = vpop.f32.mrf.mxu1  ;;  %v7590_v57 = vadd.f32 %v13569_v22, %v7200_v1  ;;  %v14304_v1 = vld [vmem:[#allocation56_spill] sm:$0xff] }
 0x54e   : > { %v7970_v62 = vadd.f32 %v10415_v58, %v7580_v12  ;;  %v6808_v12 = vadd.f32 %v13405_v47, %v13408_v35  ;;  %v7586_v35 = vadd.f32 %v13545_v13, %v7196_v23  ;;  %v14293_v23 = vld [vmem:[#allocation19_spill] sm:$0xff] }
 0x54f   : > { %v7810_v30 = vpop.f32.mrf.mxu1 }
 0x550   : > { %v8009_v56 = vadd.f32 %v13620_v54, %v7970_v62  ;;  %v7969_v17 = vadd.f32 %v7810_v30, %v7579_v6  ;;  %v6807_v6 = vadd.f32 %v13410_v9, %v13413_v27  ;;  %v7198_v52 = vadd.f32 %v13535_v7, %v6808_v12  ;;  %v13665_v30 = vpop.f32.mrf.mxu0  ;;  %v14294_v12 = vld [vmem:[#allocation12_spill] sm:$0xff] }
 0x551   : > { %v10418_v46 = vpop.f32.mrf.mxu1  ;;  %v7585_v27 = vadd.f32 %v13551_v39, %v7195_v0  ;;  %v14296_v0 = vld [vmem:[#allocation60_spill] sm:$0xff] }
 0x552   : > { %v8041_v24 = vmax.f32 %v8009_v56, 0.0  ;;  %v8008_v21 = vadd.f32 %v13620_v54, %v7969_v17  ;;  %v7972_v34 = vadd.f32 %v10418_v46, %v7582_v55  ;;  %v7197_v45 = vadd.f32 %v13537_v28, %v6807_v6 }
 0x553   : > { %v7820_v26 = vpop.f32.mrf.mxu1  ;;  %v6809_v56 = vadd.f32 %v13420_v31, %v13423_v50  ;;  %v7588_v17 = vadd.f32 %v13557_v19, %v7198_v52 }
 0x554   : > { %8073 = vst.msk [vmem:[%s13630_s17 + $0x8] sm:$0xff] %vm917_vm3, %v8041_v24  ;;  %v8040_v43 = vmax.f32 %v8008_v21, 0.0  ;;  %v8011_v20 = vadd.f32 %v13620_v54, %v7972_v34  ;;  %v7971_v53 = vadd.f32 %v7820_v26, %v7581_v36  ;;  %v7587_v46 = vadd.f32 %v13563_v41, %v7197_v45  ;;  %v13681_v36 = vpop.f32.mrf.mxu0 }
 0x555   : > { %v10421_v15 = vpop.f32.mrf.mxu1  ;;  %v7199_v50 = vadd.f32 %v13543_v42, %v6809_v56  ;;  %v6811_v21 = vadd.f32 %v13430_v63, %v13433_v33  ;;  %v7202_v34 = vadd.f32 %v13547_v32, %v6812_v14  ;;  %v14302_v56 = vld [vmem:[#allocation83_spill] sm:$0xff] }
 0x556   : > { %8072 = vst.msk [vmem:[%s13630_s17] sm:$0xff] %vm917_vm3, %v8040_v43  ;;  %v8043_v48 = vmax.f32 %v8011_v20, 0.0  ;;  %v8010_v16 = vadd.f32 %v13620_v54, %v7971_v53  ;;  %v7974_v58 = vadd.f32 %v10421_v15, %v7584_v61  ;;  %v14292_v61 = vld [vmem:[#allocation93_spill] sm:$0xff]  ;;  %v13697_v20 = vpop.f32.mrf.mxu0 }
 0x557   : > { %v7830_v47 = vpop.f32.mrf.mxu1  ;;  %v6814_v26 = vadd.f32 %v14292_v61, %v13438_v51  ;;  %v7201_v43 = vadd.f32 %v14293_v23, %v6811_v21  ;;  %v7589_v33 = vadd.f32 %v13575_v25, %v7199_v50  ;;  %v14308_v21 = vld [vmem:[#allocation95_spill] sm:$0xff]  ;;  %v14310_v23 = vld [vmem:[#allocation46_spill] sm:$0xff] }
 0x558   : > { %8075 = vst.msk [vmem:[%s13630_s17 + $0x18] sm:$0xff] %vm917_vm3, %v8043_v48  ;;  %v8042_v5 = vmax.f32 %v8010_v16, 0.0  ;;  %v8013_v18 = vadd.f32 %v13620_v54, %v7974_v58  ;;  %v7973_v62 = vadd.f32 %v7830_v47, %v7583_v8  ;;  %v14295_v8 = vld [vmem:[#allocation10_spill] sm:$0xff]  ;;  %v7592_v48 = vadd.f32 %v14296_v0, %v7202_v34  ;;  %v14298_v47 = vld [vmem:[#allocation41_spill] sm:$0xff]  ;;  %v13713_v11 = vpop.f32.mrf.mxu0 }
 0x559   : > { %v10424_v9 = vpop.f32.mrf.mxu1  ;;  %v6813_v15 = vadd.f32 %v14295_v8, %v14294_v12  ;;  %v14297_v16 = vld [vmem:[#allocation22_spill] sm:$0xff]  ;;  %v14312_v8 = vld [vmem:[#allocation16_spill] sm:$0xff] }
 0x55a   : > { %8074 = vst.msk [vmem:[%s13630_s17 + $0x10] sm:$0xff] %vm917_vm3, %v8042_v5  ;;  %v8045_v13 = vmax.f32 %v8013_v18, 0.0  ;;  %v8012_v7 = vadd.f32 %v13620_v54, %v7973_v62  ;;  %v7976_v55 = vadd.f32 %v10424_v9, %v7586_v35  ;;  %v7204_v58 = vadd.f32 %v14297_v16, %v6814_v26  ;;  %v14299_v35 = vld [vmem:[#allocation14_spill] sm:$0xff]  ;;  %v14301_v9 = vld [vmem:[#allocation57_spill] sm:$0xff] }
 0x55b   : > { %v7840_v2 = vpop.f32.mrf.mxu1  ;;  %v6816_v5 = vadd.f32 %v14299_v35, %v14298_v47  ;;  %v14300_v18 = vld [vmem:[#allocation66_spill] sm:$0xff]  ;;  %v14309_v26 = vld [vmem:[#allocation85_spill] sm:$0xff]  ;;  %v14315_v47 = vld [vmem:[#allocation44_spill] sm:$0xff] }
 0x55c   : > { %8077 = vst.msk [vmem:[%s13630_s17 + $0x28] sm:$0xff] %vm917_vm3, %v8045_v13  ;;  %v8044_v28 = vmax.f32 %v8012_v7, 0.0  ;;  %v8015_v39 = vadd.f32 %v13620_v54, %v7976_v55  ;;  %v7975_v38 = vadd.f32 %v7840_v2, %v7585_v27  ;;  %v7591_v62 = vadd.f32 %v14300_v18, %v7201_v43  ;;  %v14316_v35 = vld [vmem:[#allocation45_spill] sm:$0xff] }
 0x55d   : > { %v10427_v31 = vpop.f32.mrf.mxu1  ;;  %v7203_v27 = vadd.f32 %v14301_v9, %v6813_v15  ;;  %v6817_v43 = vadd.f32 %v14310_v23, %v14309_v26  ;;  %v14313_v15 = vld [vmem:[#allocation13_spill] sm:$0xff] }
 0x55e   : > { %8076 = vst.msk [vmem:[%s13630_s17 + $0x20] sm:$0xff] %vm917_vm3, %v8044_v28  ;;  %v8047_v19 = vmax.f32 %v8015_v39, 0.0  ;;  %v8014_v40 = vadd.f32 %v13620_v54, %v7975_v38  ;;  %v7978_v24 = vadd.f32 %v10427_v31, %v7588_v17  ;;  %v14303_v17 = vld [vmem:[#allocation40_spill] sm:$0xff]  ;;  %v7206_v28 = vadd.f32 %v14304_v1, %v6816_v5  ;;  %v14305_v38 = vld [vmem:[#allocation65_spill] sm:$0xff] }
 0x55f   : > { %v7850_v10 = vpop.f32.mrf.mxu1  ;;  %v6815_v2 = vadd.f32 %v14303_v17, %v14302_v56  ;;  %v7594_v14 = vadd.f32 %v14305_v38, %v7204_v58  ;;  %v6820_v0 = vadd.f32 %v14313_v15, %v14312_v8  ;;  %v14314_v58 = vld [vmem:[#allocation62_spill] sm:$0xff]  ;;  %v6819_v5 = vadd.f32 %v14316_v35, %v14315_v47  ;;  %v14317_v18 = vld [vmem:[#allocation97_spill] sm:$0xff] }
 0x560   : > { %8079 = vst.msk [vmem:[%s13630_s17 + $0x38] sm:$0xff] %vm917_vm3, %v8047_v19  ;;  %v8046_v41 = vmax.f32 %v8014_v40, 0.0  ;;  %v8017_v42 = vadd.f32 %v13620_v54, %v7978_v24  ;;  %v7977_v4 = vadd.f32 %v7850_v10, %v7587_v46  ;;  %v14306_v19 = vld [vmem:[#allocation43_spill] sm:$0xff]  ;;  %v14307_v40 = vld [vmem:[#allocation96_spill] sm:$0xff]  ;;  %v13729_v10 = vpop.f32.mrf.mxu0  ;;  %v14320_v17 = vld [vmem:[#allocation21_spill] sm:$0xff] }
 0x561   : > { %v10430_v63 = vpop.f32.mrf.mxu1  ;;  %v6818_v24 = vadd.f32 %v14307_v40, %v14306_v19  ;;  %v7205_v34 = vadd.f32 %v14308_v21, %v6815_v2  ;;  %v7209_v2 = vadd.f32 %v14320_v17, %v6819_v5 }
 0x562   : > { %8078 = vst.msk [vmem:[%s13630_s17 + $0x30] sm:$0xff] %vm917_vm3, %v8046_v41  ;;  %v8049_v22 = vmax.f32 %v8017_v42, 0.0  ;;  %v8016_v32 = vadd.f32 %v13620_v54, %v7977_v4  ;;  %v7980_v53 = vadd.f32 %v10430_v63, %v7590_v57  ;;  %v7593_v41 = vadd.f32 %v13603_v29, %v7203_v27 }
 0x563   : > { %v7860_v51 = vpop.f32.mrf.mxu1  ;;  %v7596_v63 = vadd.f32 %v13615_v44, %v7206_v28 }
 0x564   : > { %8081 = vst.msk [vmem:[%s13630_s17 + $0x48] sm:$0xff] %vm917_vm3, %v8049_v22  ;;  %v8048_v6 = vmax.f32 %v8016_v32, 0.0  ;;  %v8019_v25 = vadd.f32 %v13620_v54, %v7980_v53  ;;  %v7979_v52 = vadd.f32 %v7860_v51, %v7589_v33  ;;  %v14311_v22 = vld [vmem:[#allocation59_spill] sm:$0xff]  ;;  %v10401_v51 = vpop.f32.mrf.mxu0 }
 0x565   : > { %v10433_v45 = vpop.f32.mrf.mxu1  ;;  %v7208_v32 = vadd.f32 %v14311_v22, %v6818_v24  ;;  %v14323_v24 = vld [vmem:[#allocation25_spill] sm:$0xff] }
 0x566   : > { %8080 = vst.msk [vmem:[%s13630_s17 + $0x40] sm:$0xff] %vm917_vm3, %v8048_v6  ;;  %v8051_v13 = vmax.f32 %v8019_v25, 0.0  ;;  %v8018_v7 = vadd.f32 %v13620_v54, %v7979_v52  ;;  %v7982_v55 = vadd.f32 %v10433_v45, %v7592_v48  ;;  %v7595_v48 = vadd.f32 %v13635_v49, %v7205_v34  ;;  %v7540_v1 = vpop.f32.mrf.mxu0 }
 0x567   : > { %v7870_v39 = vpop.f32.mrf.mxu1  ;;  %v7207_v6 = vadd.f32 %v14314_v58, %v6817_v43  ;;  %v7598_v9 = vadd.f32 %v13649_v59, %v7208_v32  ;;  %v14326_v43 = vld [vmem:[#allocation61_spill] sm:$0xff]  ;;  %v14327_v32 = vld [vmem:[#allocation48_spill] sm:$0xff]  ;;  %v14330_v58 = vld [vmem:[#allocation51_spill] sm:$0xff] }
 0x568   : > { %8083 = vst.msk [vmem:[%s13630_s17 + $0x58] sm:$0xff] %vm917_vm3, %v8051_v13  ;;  %v8050_v46 = vmax.f32 %v8018_v7, 0.0  ;;  %v8021_v31 = vadd.f32 %v13620_v54, %v7982_v55  ;;  %v7981_v50 = vadd.f32 %v7870_v39, %v7591_v62  ;;  %v7210_v62 = vadd.f32 %v14317_v18, %v6820_v0  ;;  %v14318_v7 = vld [vmem:[#allocation47_spill] sm:$0xff]  ;;  %v14319_v55 = vld [vmem:[#allocation86_spill] sm:$0xff]  ;;  %v10404_v26 = vpop.f32.mrf.mxu0 }
 0x569   : > { %v10436_v57 = vpop.f32.mrf.mxu1  ;;  %v6822_v56 = vadd.f32 %v14319_v55, %v14318_v7  ;;  %v7597_v39 = vadd.f32 %v13665_v30, %v7207_v6  ;;  %v14331_v6 = vld [vmem:[#allocation89_spill] sm:$0xff]  ;;  %v14335_v7 = vld [vmem:[#allocation24_spill] sm:$0xff] }
 0x56a   : > { %8082 = vst.msk [vmem:[%s13630_s17 + $0x50] sm:$0xff] %vm917_vm3, %v8050_v46  ;;  %v8053_v42 = vmax.f32 %v8021_v31, 0.0  ;;  %v8020_v4 = vadd.f32 %v13620_v54, %v7981_v50  ;;  %v7984_v61 = vadd.f32 %v10436_v57, %v7594_v14  ;;  %v14321_v46 = vld [vmem:[#allocation88_spill] sm:$0xff]  ;;  %v14322_v31 = vld [vmem:[#allocation50_spill] sm:$0xff]  ;;  %v7600_v19 = vadd.f32 %v13681_v36, %v7210_v62  ;;  %v7550_v47 = vpop.f32.mrf.mxu0 }
 0x56b   : > { %v7880_v33 = vpop.f32.mrf.mxu1  ;;  %v6821_v50 = vadd.f32 %v14322_v31, %v14321_v46  ;;  %v7212_v21 = vadd.f32 %v14323_v24, %v6822_v56  ;;  %v14338_v46 = vld [vmem:[#allocation29_spill] sm:$0xff] }
 0x56c   : > { %8085 = vst.msk [vmem:[%s13630_s17 + $0x68] sm:$0xff] %vm917_vm3, %v8053_v42  ;;  %v8052_v53 = vmax.f32 %v8020_v4, 0.0  ;;  %v8023_v29 = vadd.f32 %v13620_v54, %v7984_v61  ;;  %v7983_v12 = vadd.f32 %v7880_v33, %v7593_v41  ;;  %v14324_v41 = vld [vmem:[#allocation18_spill] sm:$0xff]  ;;  %v14325_v42 = vld [vmem:[#allocation15_spill] sm:$0xff]  ;;  %v7599_v61 = vadd.f32 %v13697_v20, %v7209_v2  ;;  %v14336_v2 = vld [vmem:[#allocation20_spill] sm:$0xff] }
 0x56d   : > { %v10439_v16 = vpop.f32.mrf.mxu1  ;;  %v6824_v4 = vadd.f32 %v14325_v42, %v14324_v41  ;;  %v7602_v0 = vadd.f32 %v13713_v11, %v7212_v21  ;;  %v14340_v24 = vld [vmem:[#allocation53_spill] sm:$0xff] }
 0x56e   : > { %8084 = vst.msk [vmem:[%s13630_s17 + $0x60] sm:$0xff] %vm917_vm3, %v8052_v53  ;;  %v8055_v44 = vmax.f32 %v8023_v29, 0.0  ;;  %v8022_v25 = vadd.f32 %v13620_v54, %v7983_v12  ;;  %v7986_v52 = vadd.f32 %v10439_v16, %v7596_v63  ;;  %v7211_v63 = vadd.f32 %v14326_v43, %v6821_v50  ;;  %v14328_v53 = vld [vmem:[#allocation49_spill] sm:$0xff]  ;;  %v14329_v12 = vld [vmem:[#allocation98_spill] sm:$0xff] }
 0x56f   : > { %v7890_v45 = vpop.f32.mrf.mxu1  ;;  %v6823_v29 = vadd.f32 %v14328_v53, %v14327_v32  ;;  %v7214_v8 = vadd.f32 %v14329_v12, %v6824_v4  ;;  %v14345_v12 = vld [vmem:[#allocation58_spill] sm:$0xff] }
 0x570   : > { %8087 = vst.msk [vmem:[%s13630_s17 + $0x78] sm:$0xff] %vm917_vm3, %v8055_v44  ;;  %v8054_v49 = vmax.f32 %v8022_v25, 0.0  ;;  %v8025_v27 = vadd.f32 %v13620_v54, %v7986_v52  ;;  %v7985_v13 = vadd.f32 %v7890_v45, %v7595_v48  ;;  %v6826_v44 = vadd.f32 %v14331_v6, %v14330_v58  ;;  %v14332_v25 = vld [vmem:[#allocation63_spill] sm:$0xff] }
 0x571   : > { %v10442_v28 = vpop.f32.mrf.mxu1  ;;  %v7213_v52 = vadd.f32 %v14332_v25, %v6823_v29  ;;  %v7601_v5 = vadd.f32 %v13729_v10, %v7211_v63  ;;  %v14333_v45 = vld [vmem:[#allocation91_spill] sm:$0xff]  ;;  %v14344_v29 = vld [vmem:[#allocation94_spill] sm:$0xff] }
 0x572   : > { %8086 = vst.msk [vmem:[%s13630_s17 + $0x70] sm:$0xff] %vm917_vm3, %v8054_v49  ;;  %v8057_v38 = vmax.f32 %v8025_v27, 0.0  ;;  %v8024_v59 = vadd.f32 %v13620_v54, %v7985_v13  ;;  %v7988_v14 = vadd.f32 %v10442_v28, %v7598_v9  ;;  %v14334_v9 = vld [vmem:[#allocation54_spill] sm:$0xff]  ;;  %v7604_v27 = vadd.f32 %v10401_v51, %v7214_v8  ;;  %v14337_v28 = vld [vmem:[#allocation17_spill] sm:$0xff] }
 0x573   : > { %v7900_v40 = vpop.f32.mrf.mxu1  ;;  %v6825_v49 = vadd.f32 %v14334_v9, %v14333_v45  ;;  %v7216_v55 = vadd.f32 %v14335_v7, %v6826_v44  ;;  %v6829_v8 = vadd.f32 %v14345_v12, %v14344_v29 }
 0x574   : > { %8089 = vst.msk [vmem:[%s13630_s17 + $0x88] sm:$0xff] %vm917_vm3, %v8057_v38  ;;  %v8056_v34 = vmax.f32 %v8024_v59, 0.0  ;;  %v8027_v30 = vadd.f32 %v13620_v54, %v7988_v14  ;;  %v7987_v57 = vadd.f32 %v7900_v40, %v7597_v39  ;;  %v6828_v39 = vadd.f32 %v14337_v28, %v14336_v2  ;;  %v10407_v59 = vpop.f32.mrf.mxu0  ;;  %v14339_v40 = vld [vmem:[#allocation52_spill] sm:$0xff] }
 0x575   : > { %v10445_v23 = vpop.f32.mrf.mxu1  ;;  %v7603_v38 = vadd.f32 %v7540_v1, %v7213_v52  ;;  %v7215_v31 = vadd.f32 %v14338_v46, %v6825_v49  ;;  %v6827_v21 = vadd.f32 %v14340_v24, %v14339_v40  ;;  %v7606_v41 = vadd.f32 %v10404_v26, %v7216_v55 }
 0x576   : > { %8088 = vst.msk [vmem:[%s13630_s17 + $0x80] sm:$0xff] %vm917_vm3, %v8056_v34  ;;  %v8059_v36 = vmax.f32 %v8027_v30, 0.0  ;;  %v8026_v33 = vadd.f32 %v13620_v54, %v7987_v57  ;;  %v7990_v22 = vadd.f32 %v10445_v23, %v7600_v19  ;;  %v14341_v34 = vld [vmem:[#allocation64_spill] sm:$0xff]  ;;  %v7219_v25 = vadd.f32 %v13609_v3, %v6829_v8 }
 0x577   : > { %v7910_v15 = vpop.f32.mrf.mxu1  ;;  %v7218_v30 = vadd.f32 %v14341_v34, %v6828_v39  ;;  %v14343_v23 = vld [vmem:[#allocation92_spill] sm:$0xff]  ;;  %v7217_v63 = vadd.f32 %v13599_v37, %v6827_v21 }
 0x578   : > { %8091 = vst.msk [vmem:[%s13630_s17 + $0x98] sm:$0xff] %vm917_vm3, %v8059_v36  ;;  %v8058_v20 = vmax.f32 %v8026_v33, 0.0  ;;  %v8029_v48 = vadd.f32 %v13620_v54, %v7990_v22  ;;  %v7989_v16 = vadd.f32 %v7910_v15, %v7599_v61  ;;  %v14342_v61 = vld [vmem:[#allocation55_spill] sm:$0xff]  ;;  %v7560_v36 = vpop.f32.mrf.mxu0  ;;  %v7605_v22 = vadd.f32 %v7550_v47, %v7215_v31 }
 0x579   : > { %v10448_v35 = vpop.f32.mrf.mxu1  ;;  %v6830_v43 = vadd.f32 %v14343_v23, %v14342_v61  ;;  %v7608_v15 = vadd.f32 %v10407_v59, %v7218_v30  ;;  %v7607_v6 = vadd.f32 %v7560_v36, %v7217_v63 }
 0x57a   : > { %8090 = vst.msk [vmem:[%s13630_s17 + $0x90] sm:$0xff] %vm917_vm3, %v8058_v20  ;;  %v8061_v18 = vmax.f32 %v8029_v48, 0.0  ;;  %v8028_v11 = vadd.f32 %v13620_v54, %v7989_v16  ;;  %v7992_v62 = vadd.f32 %v10448_v35, %v7602_v0  ;;  %v10410_v0 = vpop.f32.mrf.mxu0 }
 0x57b   : > { %v7920_v13 = vpop.f32.mrf.mxu1  ;;  %v7220_v48 = vadd.f32 %v13605_v60, %v6830_v43 }
 0x57c   : > { %8093 = vst.msk [vmem:[%s13630_s17 + $0xa8] sm:$0xff] %vm917_vm3, %v8061_v18  ;;  %v8060_v56 = vmax.f32 %v8028_v11, 0.0  ;;  %v8031_v10 = vadd.f32 %v13620_v54, %v7992_v62  ;;  %v7991_v17 = vadd.f32 %v7920_v13, %v7601_v5  ;;  %v7570_v5 = vpop.f32.mrf.mxu0 }
 0x57d   : > { %v10451_v14 = vpop.f32.mrf.mxu1  ;;  %v7610_v18 = vadd.f32 %v10410_v0, %v7220_v48  ;;  %v7609_v3 = vadd.f32 %v7570_v5, %v7219_v25 }
 0x57e   : > { %8092 = vst.msk [vmem:[%s13630_s17 + $0xa0] sm:$0xff] %vm917_vm3, %v8060_v56  ;;  %v8063_v51 = vmax.f32 %v8031_v10, 0.0  ;;  %v8030_v50 = vadd.f32 %v13620_v54, %v7991_v17  ;;  %v7994_v19 = vadd.f32 %v10451_v14, %v7604_v27 }
 0x57f   : > { %v7930_v57 = vpop.f32.mrf.mxu1 }
 0x580   : > { %8095 = vst.msk [vmem:[%s13630_s17 + $0xb8] sm:$0xff] %vm917_vm3, %v8063_v51  ;;  %v8062_v1 = vmax.f32 %v8030_v50, 0.0  ;;  %v8033_v42 = vadd.f32 %v13620_v54, %v7994_v19  ;;  %v7993_v4 = vadd.f32 %v7930_v57, %v7603_v38 }
 0x581   : > { %v10454_v33 = vpop.f32.mrf.mxu1 }
 0x582   : > { %8094 = vst.msk [vmem:[%s13630_s17 + $0xb0] sm:$0xff] %vm917_vm3, %v8062_v1  ;;  %v8065_v32 = vmax.f32 %v8033_v42, 0.0  ;;  %v8032_v26 = vadd.f32 %v13620_v54, %v7993_v4  ;;  %v7996_v53 = vadd.f32 %v10454_v33, %v7606_v41 }
 0x583   : > { %v7940_v20 = vpop.f32.mrf.mxu1 }
 0x584   : > { %8097 = vst.msk [vmem:[%s13630_s17 + $0xc8] sm:$0xff] %vm917_vm3, %v8065_v32  ;;  %v8064_v37 = vmax.f32 %v8032_v26, 0.0  ;;  %v8035_v16 = vadd.f32 %v13620_v54, %v7996_v53  ;;  %v7995_v58 = vadd.f32 %v7940_v20, %v7605_v22 }
 0x585   : > { %v10457_v44 = vpop.f32.mrf.mxu1 }
 0x586   : > { %8096 = vst.msk [vmem:[%s13630_s17 + $0xc0] sm:$0xff] %vm917_vm3, %v8064_v37  ;;  %v8067_v52 = vmax.f32 %v8035_v16, 0.0  ;;  %v8034_v47 = vadd.f32 %v13620_v54, %v7995_v58  ;;  %v7998_v35 = vadd.f32 %v10457_v44, %v7608_v15 }
 0x587   : > { %v7950_v60 = vpop.f32.mrf.mxu1 }
 0x588   : > { %8099 = vst.msk [vmem:[%s13630_s17 + $0xd8] sm:$0xff] %vm917_vm3, %v8067_v52  ;;  %v8066_v11 = vmax.f32 %v8034_v47, 0.0  ;;  %v8037_v62 = vadd.f32 %v13620_v54, %v7998_v35  ;;  %v7997_v45 = vadd.f32 %v7950_v60, %v7607_v6 }
 0x589   : > { %v10460_v9 = vpop.f32.mrf.mxu1 }
 0x58a   : > { %8098 = vst.msk [vmem:[%s13630_s17 + $0xd0] sm:$0xff] %vm917_vm3, %v8066_v11  ;;  %v8069_v49 = vmax.f32 %v8037_v62, 0.0  ;;  %v8036_v27 = vadd.f32 %v13620_v54, %v7997_v45  ;;  %v8000_v13 = vadd.f32 %v10460_v9, %v7610_v18 }
 0x58b   : > { %v7960_v7 = vpop.f32.mrf.mxu1 }
 0x58c   : > { %8101 = vst.msk [vmem:[%s13630_s17 + $0xe8] sm:$0xff] %vm917_vm3, %v8069_v49  ;;  %v8068_v55 = vmax.f32 %v8036_v27, 0.0  ;;  %v8039_v56 = vadd.f32 %v13620_v54, %v8000_v13  ;;  %v7999_v10 = vadd.f32 %v7960_v7, %v7609_v3 }
 0x58e   : > { %8100 = vst.msk [vmem:[%s13630_s17 + $0xe0] sm:$0xff] %vm917_vm3, %v8068_v55  ;;  %v8071_v17 = vmax.f32 %v8039_v56, 0.0  ;;  %v8038_v2 = vadd.f32 %v13620_v54, %v7999_v10 }
 0x590   : > { %8103 = vst.msk [vmem:[%s13630_s17 + $0xf8] sm:$0xff] %vm917_vm3, %v8071_v17  ;;  %v8070_v28 = vmax.f32 %v8038_v2, 0.0 }
 0x592   : > { %8102 = vst.msk [vmem:[%s13630_s17 + $0xf0] sm:$0xff] %vm917_vm3, %v8070_v28 }
 0x593 PF: > { %s19_s30 = sadd.s32 1, %s10492_s30  }
 0x594   : > { %p16_p4 = scmp.ge.s32.totalorder %s19_s30, 4  }
 0x596   :  { %18 = sbr.rel (!%p16_p4) target bundleno = 1 (0x1), region = 107 }

</bundles_post_ra>
